<compile_context>
chip_gen: v7x
topology: tpu7x:2x2x1
jax: 0.10.0
libtpu: 0.0.40
codegen_flags: <defaults>
</compile_context>

<pallas_src>
import math

import jax
import jax.numpy as jnp
import numpy as np
from jax.experimental import pallas as pl
from jax.experimental.pallas import tpu as pltpu


def _attnpool_kernel(x_ref, pos0_ref, poss_ref, wqkv_ref, bqkv_ref,
                     wkv_ref, bkv_ref, wc_ref, bc_ref, g_ref, gt_ref, o_ref):
    f32 = jnp.float32
    bf16 = jnp.bfloat16
    bt, c, hw = x_ref.shape
    nh = g_ref.shape[1]

    x = x_ref[...]                                               # (Bt, C, HW) bf16

    # Mean token: reduce over the native last axis with f32 accumulation, add
    # the mean-token positional embedding in f32, drop to bf16 for the MXU.
    mean = jnp.mean(x, axis=2, dtype=f32)                        # (Bt, C) f32
    xm = (mean + pos0_ref[...]).astype(bf16)                     # (Bt, C) bf16

    # Spatial tokens: bf16 layout swap (XLU) + bf16 positional add.
    xs = jnp.transpose(x, (0, 2, 1)) + poss_ref[...][None]       # (Bt, HW, C) bf16
    xs2 = xs.reshape(bt * hw, c)

    # Fused projections: bf16 operands, f32 accumulation.
    # wq/bq inside wqkv/bqkv are pre-scaled by 1/sqrt(head_dim) on the host.
    qkv_m = jnp.dot(xm, wqkv_ref[...], preferred_element_type=f32) + bqkv_ref[...]   # (Bt, 3C)
    q = qkv_m[:, :c]                                             # (Bt, C) f32
    km = qkv_m[:, c:2 * c]                                       # (Bt, C) f32
    vm = qkv_m[:, 2 * c:]                                        # (Bt, C) f32
    kvx = jnp.dot(xs2, wkv_ref[...], preferred_element_type=f32) + bkv_ref[...]      # (Bt*HW, 2C)
    kx3 = kvx[:, :c].astype(bf16).reshape(bt, hw, c)             # (Bt, HW, C) bf16
    vx3 = kvx[:, c:].astype(bf16).reshape(bt, hw, c)             # (Bt, HW, C) bf16

    # All-head scores in one pass (query length is 1: the mean token).
    # s[b,t,h] = sum_{ch in head h} q[b,ch] * k[b,t,ch]  via the 0/1 G matrix.
    qb = q.astype(bf16)
    qk = qb[:, None, :] * kx3                                    # (Bt, HW, C) bf16
    sx = jnp.dot(qk.reshape(bt * hw, c), g_ref[...],
                 preferred_element_type=f32).reshape(bt, hw, nh) # (Bt, HW, H)
    sm = jnp.dot(qb * km.astype(bf16), g_ref[...],
                 preferred_element_type=f32)                     # (Bt, H)

    # Softmax over L = HW + 1 tokens (mean token kept separate; no concat).
    mx = jnp.maximum(jnp.max(sx, axis=1), sm)                    # (Bt, H)
    px = jnp.exp(sx - mx[:, None, :])                            # (Bt, HW, H) f32
    pm = jnp.exp(sm - mx)                                        # (Bt, H) f32
    denom = jnp.sum(px, axis=1) + pm                             # (Bt, H) f32

    # Expand per-head weights back onto all C lanes via G^T; weighted value sum.
    pex = jnp.dot(px.astype(bf16).reshape(bt * hw, nh), gt_ref[...],
                  preferred_element_type=f32).astype(bf16).reshape(bt, hw, c)
    pem = jnp.dot(pm.astype(bf16), gt_ref[...], preferred_element_type=f32)  # (Bt, C)
    o = jnp.sum(pex * vx3, axis=1, dtype=f32) + pem * vm                     # (Bt, C)
    dinv = pl.reciprocal(
        jnp.dot(denom.astype(bf16), gt_ref[...], preferred_element_type=f32),
        approx=True)                                                          # (Bt, C)
    o = (o * dinv).astype(bf16)

    out = jnp.dot(o, wc_ref[...], preferred_element_type=f32) + bc_ref[...]  # (Bt, out_pad)
    o_ref[...] = out.astype(o_ref.dtype)


def attention_pool_2d(x_nchw, params, num_heads, *, block_n=None):
    """AttentionPool2d forward. x_nchw: (N, C, H, W). Returns (N, out_dim) f32."""
    N, C, H, W = x_nchw.shape
    HW = H * W
    head_dim = C // num_heads
    out_dim = params["wc"].shape[0]
    out_pad = ((out_dim + 127) // 128) * 128      # lane-dense output slab
    scale = 1.0 / math.sqrt(head_dim)
    f32, bf16 = jnp.float32, jnp.bfloat16

    # Batch tile: cover the batch in at most 2 grid steps when possible (so
    # "parallel" can shard the steps across v7x's two TensorCores), with an
    # 8-row floor (sublane alignment) and a 64-row cap (bounds VMEM temps).
    if block_n is None:
        half = (N + 1) // 2
        block_n = max(8, min(64, ((half + 7) // 8) * 8))
    bt = block_n
    n_pad = pl.cdiv(N, bt) * bt

    # Native channels-first layout: reshape only (free), bf16 halves DMA bytes.
    x_cf = x_nchw.reshape(N, C, HW).astype(bf16)
    if n_pad != N:
        x_cf = jnp.pad(x_cf, ((0, n_pad - N), (0, 0), (0, 0)))

    # PyTorch Linear computes y = x @ W.T + b -> pass W.T (in, out), bf16.
    # 1/sqrt(head_dim) folded into the q projection (weight AND bias).
    wq_t = (params["wq"].T * scale).astype(bf16)
    wk_t = params["wk"].T.astype(bf16)
    wv_t = params["wv"].T.astype(bf16)
    bq = (params["bq"] * scale).astype(f32)
    bk = params["bk"].astype(f32)
    bv = params["bv"].astype(f32)

    wqkv_t = jnp.concatenate([wq_t, wk_t, wv_t], axis=1)         # (C, 3C)
    bqkv = jnp.concatenate([bq, bk, bv]).reshape(1, 3 * C)       # (1, 3C)
    wkv_t = jnp.concatenate([wk_t, wv_t], axis=1)                # (C, 2C)
    bkv = jnp.concatenate([bk, bv]).reshape(1, 2 * C)            # (1, 2C)

    wc_t = jnp.zeros((C, out_pad), bf16).at[:, :out_dim].set(params["wc"].T.astype(bf16))
    bc = jnp.zeros((1, out_pad), f32).at[:, :out_dim].set(params["bc"].astype(f32))

    pos0 = params["pos"][0:1].astype(f32)        # (1, C)  mean-token position (f32 path)
    poss = params["pos"][1:].astype(bf16)        # (HW, C) spatial positions   (bf16 path)

    # 0/1 head-grouping matrices (exact in bf16), built once and kept resident.
    ch_head = np.arange(C) // head_dim
    g_np = (ch_head[:, None] == np.arange(num_heads)[None, :]).astype(np.float32)
    g = jnp.asarray(g_np, dtype=bf16)            # (C, H)
    gt = jnp.asarray(g_np.T, dtype=bf16)         # (H, C)

    # Size the scoped-VMEM request to actual need (2x safety), cap at 32 MiB.
    bfb, fb = 2, 4
    resident = ((HW * C + C * (3 * C + 2 * C + out_pad) + 2 * C * num_heads) * bfb
                + (C + 3 * C + 2 * C + out_pad) * fb)
    x_tile = bt * C * HW * bfb
    out_tile = bt * out_pad * fb
    interm = (bt * HW * (6 * C * bfb + 2 * C * fb + 2 * num_heads * fb)
              + bt * 8 * C * fb)
    vmem_limit = int(min(32 * 2 ** 20,
                         max(8 * 2 ** 20, 2 * (2 * (x_tile + resident + out_tile) + interm))))

    const = lambda b: (0, 0)
    out = pl.pallas_call(
        _attnpool_kernel,
        out_shape=jax.ShapeDtypeStruct((n_pad, out_pad), f32),
        grid_spec=pltpu.PrefetchScalarGridSpec(
            num_scalar_prefetch=0,
            grid=(n_pad // bt,),
            in_specs=[
                pl.BlockSpec((bt, C, HW), lambda b: (b, 0, 0)),   # x (channels-first)
                pl.BlockSpec((1, C), const),                      # pos[0]
                pl.BlockSpec((HW, C), const),                     # pos[1:]
                pl.BlockSpec((C, 3 * C), const),                  # [wq|wk|wv]^T (q pre-scaled)
                pl.BlockSpec((1, 3 * C), const),                  # [bq|bk|bv]
                pl.BlockSpec((C, 2 * C), const),                  # [wk|wv]^T
                pl.BlockSpec((1, 2 * C), const),                  # [bk|bv]
                pl.BlockSpec((C, out_pad), const),                # wc^T (lane-padded)
                pl.BlockSpec((1, out_pad), const),                # bc  (lane-padded)
                pl.BlockSpec((C, num_heads), const),              # G
                pl.BlockSpec((num_heads, C), const),              # G^T
            ],
            out_specs=pl.BlockSpec((bt, out_pad), lambda b: (b, 0)),
        ),
        compiler_params=pltpu.CompilerParams(
            dimension_semantics=("parallel",),
            vmem_limit_bytes=vmem_limit),
    )(x_cf, pos0, poss, wqkv_t, bqkv, wkv_t, bkv, wc_t, bc, g, gt)

    return out[:N, :out_dim]


def reference_attention_pool_2d(x_nchw, params, num_heads):
    """Pure-JAX f32 reference mirroring the PyTorch forward exactly."""
    N, C, H, W = x_nchw.shape
    HW = H * W
    x = jnp.transpose(x_nchw.reshape(N, C, HW), (2, 0, 1))       # (HW, N, C)
    x = jnp.concatenate([x.mean(axis=0, keepdims=True), x], 0)   # (L, N, C)
    x = x + params["pos"][:, None, :]
    q = x[0] @ params["wq"].T + params["bq"]                     # (N, C)
    k = jnp.einsum("lnc,dc->lnd", x, params["wk"]) + params["bk"]
    v = jnp.einsum("lnc,dc->lnd", x, params["wv"]) + params["bv"]
    hd = C // num_heads
    qh = q.reshape(N, num_heads, hd) * (hd ** -0.5)
    kh = k.reshape(-1, N, num_heads, hd)
    vh = v.reshape(-1, N, num_heads, hd)
    s = jnp.einsum("nhd,lnhd->nhl", qh, kh)
    p = jax.nn.softmax(s, axis=-1)
    o = jnp.einsum("nhl,lnhd->nhd", p, vh).reshape(N, C)
    return o @ params["wc"].T + params["bc"]


if __name__ == "__main__":
    # Small module config: spacial_dim=8 (HW=64), embed_dim=64, heads=8, out=32.
    spacial_dim, embed_dim, num_heads, output_dim = 8, 64, 8, 32
    N = 16
    L = spacial_dim ** 2 + 1

    key = jax.random.PRNGKey(0)
    ks = jax.random.split(key, 10)
    params = {
        "pos": jax.random.normal(ks[0], (L, embed_dim), jnp.float32) / np.sqrt(embed_dim),
        "wq": 0.05 * jax.random.normal(ks[1], (embed_dim, embed_dim), jnp.float32),
        "bq": 0.05 * jax.random.normal(ks[2], (embed_dim,), jnp.float32),
        "wk": 0.05 * jax.random.normal(ks[3], (embed_dim, embed_dim), jnp.float32),
        "bk": 0.05 * jax.random.normal(ks[4], (embed_dim,), jnp.float32),
        "wv": 0.05 * jax.random.normal(ks[5], (embed_dim, embed_dim), jnp.float32),
        "bv": 0.05 * jax.random.normal(ks[6], (embed_dim,), jnp.float32),
        "wc": 0.05 * jax.random.normal(ks[7], (output_dim, embed_dim), jnp.float32),
        "bc": 0.05 * jax.random.normal(ks[8], (output_dim,), jnp.float32),
    }

    x = jax.random.normal(ks[9], (N, embed_dim, spacial_dim, spacial_dim), jnp.float32)

    out = attention_pool_2d(x, params, num_heads)
    out = jax.block_until_ready(out)

    ref = reference_attention_pool_2d(x, params, num_heads)
    # bf16 matmul operands / bf16 intermediates (f32 accumulation) vs f32 reference.
    np.testing.assert_allclose(np.asarray(out), np.asarray(ref), rtol=2e-2, atol=2e-2)
    print("KERNEL_OK")
</pallas_src>

<mosaic_0001>
module attributes {stable_mosaic.version = 11 : i64} {
  func.func @_attnpool_kernel(%arg0: i32, %arg1: memref<8x64x64xbf16, #tpu.memory_space<vmem>>, %arg2: memref<1x64xf32, #tpu.memory_space<vmem>>, %arg3: memref<64x64xbf16, #tpu.memory_space<vmem>>, %arg4: memref<64x192xbf16, #tpu.memory_space<vmem>>, %arg5: memref<1x192xf32, #tpu.memory_space<vmem>>, %arg6: memref<64x128xbf16, #tpu.memory_space<vmem>>, %arg7: memref<1x128xf32, #tpu.memory_space<vmem>>, %arg8: memref<64x128xbf16, #tpu.memory_space<vmem>>, %arg9: memref<1x128xf32, #tpu.memory_space<vmem>>, %arg10: memref<64x8xbf16, #tpu.memory_space<vmem>>, %arg11: memref<8x64xbf16, #tpu.memory_space<vmem>>, %arg12: memref<8x128xf32, #tpu.memory_space<vmem>>) attributes {dimension_semantics = [#tpu.dimension_semantics<parallel>], iteration_bounds = array<i64: 2>, scalar_prefetch = 0 : i64, scratch_operands = 0 : i64, tpu.core_type = #tpu.core_type<tc>, window_params = [{transform_indices = @transform_0, window_bounds = array<i64: 8, 64, 64>}, {pipeline_mode = #tpu.pipeline_mode<synchronous>, transform_indices = @transform_1, window_bounds = array<i64: 1, 64>}, {pipeline_mode = #tpu.pipeline_mode<synchronous>, transform_indices = @transform_2, window_bounds = array<i64: 64, 64>}, {pipeline_mode = #tpu.pipeline_mode<synchronous>, transform_indices = @transform_3, window_bounds = array<i64: 64, 192>}, {pipeline_mode = #tpu.pipeline_mode<synchronous>, transform_indices = @transform_4, window_bounds = array<i64: 1, 192>}, {pipeline_mode = #tpu.pipeline_mode<synchronous>, transform_indices = @transform_5, window_bounds = array<i64: 64, 128>}, {pipeline_mode = #tpu.pipeline_mode<synchronous>, transform_indices = @transform_6, window_bounds = array<i64: 1, 128>}, {pipeline_mode = #tpu.pipeline_mode<synchronous>, transform_indices = @transform_7, window_bounds = array<i64: 64, 128>}, {pipeline_mode = #tpu.pipeline_mode<synchronous>, transform_indices = @transform_8, window_bounds = array<i64: 1, 128>}, {pipeline_mode = #tpu.pipeline_mode<synchronous>, transform_indices = @transform_9, window_bounds = array<i64: 64, 8>}, {pipeline_mode = #tpu.pipeline_mode<synchronous>, transform_indices = @transform_10, window_bounds = array<i64: 8, 64>}, {transform_indices = @transform_11, window_bounds = array<i64: 8, 128>}]} {
    %c0 = arith.constant 0 : index
    %c0_0 = arith.constant 0 : index
    %c0_1 = arith.constant 0 : index
    %0 = vector.load %arg1[%c0, %c0_0, %c0_1] : memref<8x64x64xbf16, #tpu.memory_space<vmem>>, vector<8x64x64xbf16>
    %1 = arith.extf %0 : vector<8x64x64xbf16> to vector<8x64x64xf32>
    %cst = arith.constant dense<0.000000e+00> : vector<8x64xf32>
    %2 = vector.multi_reduction <add>, %1, %cst [2] : vector<8x64x64xf32> to vector<8x64xf32>
    %cst_2 = arith.constant 6.400000e+01 : f32
    %3 = vector.broadcast %cst_2 : f32 to vector<8x64xf32>
    %4 = arith.divf %2, %3 : vector<8x64xf32>
    %c0_3 = arith.constant 0 : index
    %c0_4 = arith.constant 0 : index
    %5 = vector.load %arg2[%c0_3, %c0_4] : memref<1x64xf32, #tpu.memory_space<vmem>>, vector<1x64xf32>
    %6 = vector.broadcast %5 : vector<1x64xf32> to vector<8x64xf32>
    %7 = arith.addf %4, %6 : vector<8x64xf32>
    %8 = arith.truncf %7 : vector<8x64xf32> to vector<8x64xbf16>
    %9 = tpu.transpose %0, [0, 2, 1] : vector<8x64x64xbf16> -> vector<8x64x64xbf16>
    %c0_5 = arith.constant 0 : index
    %c0_6 = arith.constant 0 : index
    %10 = vector.load %arg3[%c0_5, %c0_6] : memref<64x64xbf16, #tpu.memory_space<vmem>>, vector<64x64xbf16>
    %11 = vector.shape_cast %10 : vector<64x64xbf16> to vector<1x64x64xbf16>
    %12 = vector.broadcast %11 : vector<1x64x64xbf16> to vector<8x64x64xbf16>
    %13 = arith.addf %9, %12 : vector<8x64x64xbf16>
    %14 = vector.shape_cast %13 : vector<8x64x64xbf16> to vector<512x64xbf16>
    %c0_7 = arith.constant 0 : index
    %c0_8 = arith.constant 0 : index
    %15 = vector.load %arg4[%c0_7, %c0_8] : memref<64x192xbf16, #tpu.memory_space<vmem>>, vector<64x192xbf16>
    %cst_9 = arith.constant dense<0.000000e+00> : vector<8x192xf32>
    %16 = tpu.matmul %8, %15, %cst_9 {dimension_numbers = #tpu.dot_dimension_numbers<[1], [0], [0], [1], [0, 0, 1, 1], [], []>} : vector<8x64xbf16>, vector<64x192xbf16>, vector<8x192xf32> -> vector<8x192xf32>
    %c0_10 = arith.constant 0 : index
    %c0_11 = arith.constant 0 : index
    %17 = vector.load %arg5[%c0_10, %c0_11] : memref<1x192xf32, #tpu.memory_space<vmem>>, vector<1x192xf32>
    %18 = vector.broadcast %17 : vector<1x192xf32> to vector<8x192xf32>
    %19 = arith.addf %16, %18 : vector<8x192xf32>
    %20 = vector.extract_strided_slice %19 {offsets = [0, 0], sizes = [8, 64], strides = [1, 1]} : vector<8x192xf32> to vector<8x64xf32>
    %21 = vector.extract_strided_slice %19 {offsets = [0, 64], sizes = [8, 64], strides = [1, 1]} : vector<8x192xf32> to vector<8x64xf32>
    %22 = vector.extract_strided_slice %19 {offsets = [0, 128], sizes = [8, 64], strides = [1, 1]} : vector<8x192xf32> to vector<8x64xf32>
    %c0_12 = arith.constant 0 : index
    %c0_13 = arith.constant 0 : index
    %23 = vector.load %arg6[%c0_12, %c0_13] : memref<64x128xbf16, #tpu.memory_space<vmem>>, vector<64x128xbf16>
    %cst_14 = arith.constant dense<0.000000e+00> : vector<512x128xf32>
    %24 = tpu.matmul %14, %23, %cst_14 {dimension_numbers = #tpu.dot_dimension_numbers<[1], [0], [0], [1], [0, 0, 1, 1], [], []>} : vector<512x64xbf16>, vector<64x128xbf16>, vector<512x128xf32> -> vector<512x128xf32>
    %c0_15 = arith.constant 0 : index
    %c0_16 = arith.constant 0 : index
    %25 = vector.load %arg7[%c0_15, %c0_16] : memref<1x128xf32, #tpu.memory_space<vmem>>, vector<1x128xf32>
    %26 = vector.broadcast %25 : vector<1x128xf32> to vector<512x128xf32>
    %27 = arith.addf %24, %26 : vector<512x128xf32>
    %28 = vector.extract_strided_slice %27 {offsets = [0, 0], sizes = [512, 64], strides = [1, 1]} : vector<512x128xf32> to vector<512x64xf32>
    %29 = arith.truncf %28 : vector<512x64xf32> to vector<512x64xbf16>
    %30 = vector.shape_cast %29 : vector<512x64xbf16> to vector<8x64x64xbf16>
    %31 = vector.extract_strided_slice %27 {offsets = [0, 64], sizes = [512, 64], strides = [1, 1]} : vector<512x128xf32> to vector<512x64xf32>
    %32 = arith.truncf %31 : vector<512x64xf32> to vector<512x64xbf16>
    %33 = vector.shape_cast %32 : vector<512x64xbf16> to vector<8x64x64xbf16>
    %34 = arith.truncf %20 : vector<8x64xf32> to vector<8x64xbf16>
    %35 = vector.shape_cast %34 : vector<8x64xbf16> to vector<8x1x64xbf16>
    %36 = vector.broadcast %35 : vector<8x1x64xbf16> to vector<8x64x64xbf16>
    %37 = arith.mulf %36, %30 : vector<8x64x64xbf16>
    %38 = vector.shape_cast %37 : vector<8x64x64xbf16> to vector<512x64xbf16>
    %c0_17 = arith.constant 0 : index
    %c0_18 = arith.constant 0 : index
    %39 = vector.load %arg10[%c0_17, %c0_18] : memref<64x8xbf16, #tpu.memory_space<vmem>>, vector<64x8xbf16>
    %cst_19 = arith.constant dense<0.000000e+00> : vector<512x8xf32>
    %40 = tpu.matmul %38, %39, %cst_19 {dimension_numbers = #tpu.dot_dimension_numbers<[1], [0], [0], [1], [0, 0, 1, 1], [], []>} : vector<512x64xbf16>, vector<64x8xbf16>, vector<512x8xf32> -> vector<512x8xf32>
    %41 = vector.shape_cast %40 : vector<512x8xf32> to vector<8x64x8xf32>
    %42 = arith.truncf %21 : vector<8x64xf32> to vector<8x64xbf16>
    %43 = arith.mulf %34, %42 : vector<8x64xbf16>
    %c0_20 = arith.constant 0 : index
    %c0_21 = arith.constant 0 : index
    %44 = vector.load %arg10[%c0_20, %c0_21] : memref<64x8xbf16, #tpu.memory_space<vmem>>, vector<64x8xbf16>
    %cst_22 = arith.constant dense<0.000000e+00> : vector<8x8xf32>
    %45 = tpu.matmul %43, %44, %cst_22 {dimension_numbers = #tpu.dot_dimension_numbers<[1], [0], [0], [1], [0, 0, 1, 1], [], []>} : vector<8x64xbf16>, vector<64x8xbf16>, vector<8x8xf32> -> vector<8x8xf32>
    %cst_23 = arith.constant dense<0xFF800000> : vector<8x8xf32>
    %46 = vector.multi_reduction <maximumf>, %41, %cst_23 [1] : vector<8x64x8xf32> to vector<8x8xf32>
    %47 = arith.maximumf %46, %45 : vector<8x8xf32>
    %48 = vector.shape_cast %47 : vector<8x8xf32> to vector<8x1x8xf32>
    %49 = vector.broadcast %48 : vector<8x1x8xf32> to vector<8x64x8xf32>
    %50 = arith.subf %41, %49 : vector<8x64x8xf32>
    %51 = math.exp %50 : vector<8x64x8xf32>
    %52 = arith.subf %45, %47 : vector<8x8xf32>
    %53 = math.exp %52 : vector<8x8xf32>
    %cst_24 = arith.constant dense<0.000000e+00> : vector<8x8xf32>
    %54 = vector.multi_reduction <add>, %51, %cst_24 [1] : vector<8x64x8xf32> to vector<8x8xf32>
    %55 = arith.addf %54, %53 : vector<8x8xf32>
    %56 = arith.truncf %51 : vector<8x64x8xf32> to vector<8x64x8xbf16>
    %57 = vector.shape_cast %56 : vector<8x64x8xbf16> to vector<512x8xbf16>
    %c0_25 = arith.constant 0 : index
    %c0_26 = arith.constant 0 : index
    %58 = vector.load %arg11[%c0_25, %c0_26] : memref<8x64xbf16, #tpu.memory_space<vmem>>, vector<8x64xbf16>
    %cst_27 = arith.constant dense<0.000000e+00> : vector<512x64xf32>
    %59 = tpu.matmul %57, %58, %cst_27 {dimension_numbers = #tpu.dot_dimension_numbers<[1], [0], [0], [1], [0, 0, 1, 1], [], []>} : vector<512x8xbf16>, vector<8x64xbf16>, vector<512x64xf32> -> vector<512x64xf32>
    %60 = arith.truncf %59 : vector<512x64xf32> to vector<512x64xbf16>
    %61 = vector.shape_cast %60 : vector<512x64xbf16> to vector<8x64x64xbf16>
    %62 = arith.truncf %53 : vector<8x8xf32> to vector<8x8xbf16>
    %c0_28 = arith.constant 0 : index
    %c0_29 = arith.constant 0 : index
    %63 = vector.load %arg11[%c0_28, %c0_29] : memref<8x64xbf16, #tpu.memory_space<vmem>>, vector<8x64xbf16>
    %cst_30 = arith.constant dense<0.000000e+00> : vector<8x64xf32>
    %64 = tpu.matmul %62, %63, %cst_30 {dimension_numbers = #tpu.dot_dimension_numbers<[1], [0], [0], [1], [0, 0, 1, 1], [], []>} : vector<8x8xbf16>, vector<8x64xbf16>, vector<8x64xf32> -> vector<8x64xf32>
    %65 = arith.mulf %61, %33 : vector<8x64x64xbf16>
    %66 = arith.extf %65 : vector<8x64x64xbf16> to vector<8x64x64xf32>
    %cst_31 = arith.constant dense<0.000000e+00> : vector<8x64xf32>
    %67 = vector.multi_reduction <add>, %66, %cst_31 [1] : vector<8x64x64xf32> to vector<8x64xf32>
    %68 = arith.mulf %64, %22 : vector<8x64xf32>
    %69 = arith.addf %67, %68 : vector<8x64xf32>
    %70 = arith.truncf %55 : vector<8x8xf32> to vector<8x8xbf16>
    %c0_32 = arith.constant 0 : index
    %c0_33 = arith.constant 0 : index
    %71 = vector.load %arg11[%c0_32, %c0_33] : memref<8x64xbf16, #tpu.memory_space<vmem>>, vector<8x64xbf16>
    %cst_34 = arith.constant dense<0.000000e+00> : vector<8x64xf32>
    %72 = tpu.matmul %70, %71, %cst_34 {dimension_numbers = #tpu.dot_dimension_numbers<[1], [0], [0], [1], [0, 0, 1, 1], [], []>} : vector<8x8xbf16>, vector<8x64xbf16>, vector<8x64xf32> -> vector<8x64xf32>
    %73 = tpu.reciprocal %72 {approx = true} : vector<8x64xf32> -> vector<8x64xf32>
    %74 = arith.mulf %69, %73 : vector<8x64xf32>
    %75 = arith.truncf %74 : vector<8x64xf32> to vector<8x64xbf16>
    %c0_35 = arith.constant 0 : index
    %c0_36 = arith.constant 0 : index
    %76 = vector.load %arg8[%c0_35, %c0_36] : memref<64x128xbf16, #tpu.memory_space<vmem>>, vector<64x128xbf16>
    %cst_37 = arith.constant dense<0.000000e+00> : vector<8x128xf32>
    %77 = tpu.matmul %75, %76, %cst_37 {dimension_numbers = #tpu.dot_dimension_numbers<[1], [0], [0], [1], [0, 0, 1, 1], [], []>} : vector<8x64xbf16>, vector<64x128xbf16>, vector<8x128xf32> -> vector<8x128xf32>
    %c0_38 = arith.constant 0 : index
    %c0_39 = arith.constant 0 : index
    %78 = vector.load %arg9[%c0_38, %c0_39] : memref<1x128xf32, #tpu.memory_space<vmem>>, vector<1x128xf32>
    %79 = vector.broadcast %78 : vector<1x128xf32> to vector<8x128xf32>
    %80 = arith.addf %77, %79 : vector<8x128xf32>
    %c0_40 = arith.constant 0 : index
    %c0_41 = arith.constant 0 : index
    %81 = vector.load %arg12[%c0_40, %c0_41] : memref<8x128xf32, #tpu.memory_space<vmem>>, vector<8x128xf32>
    tpu.vector_store %arg12[%c0_40, %c0_41], %80 {strides = array<i32>} : memref<8x128xf32, #tpu.memory_space<vmem>>, vector<8x128xf32>,
    return
  }
  func.func @transform_0(%arg0: i32) -> (i32, i32, i32) {
    %c0_i32 = arith.constant 0 : i32
    %c0_i32_0 = arith.constant 0 : i32
    %c0_i32_1 = arith.constant 0 : i32
    return %arg0, %c0_i32, %c0_i32_0 : i32, i32, i32
  }
  func.func @transform_1(%arg0: i32) -> (i32, i32) {
    %c0_i32 = arith.constant 0 : i32
    %c0_i32_0 = arith.constant 0 : i32
    %c0_i32_1 = arith.constant 0 : i32
    return %c0_i32, %c0_i32_0 : i32, i32
  }
  func.func @transform_2(%arg0: i32) -> (i32, i32) {
    %c0_i32 = arith.constant 0 : i32
    %c0_i32_0 = arith.constant 0 : i32
    %c0_i32_1 = arith.constant 0 : i32
    return %c0_i32, %c0_i32_0 : i32, i32
  }
  func.func @transform_3(%arg0: i32) -> (i32, i32) {
    %c0_i32 = arith.constant 0 : i32
    %c0_i32_0 = arith.constant 0 : i32
    %c0_i32_1 = arith.constant 0 : i32
    return %c0_i32, %c0_i32_0 : i32, i32
  }
  func.func @transform_4(%arg0: i32) -> (i32, i32) {
    %c0_i32 = arith.constant 0 : i32
    %c0_i32_0 = arith.constant 0 : i32
    %c0_i32_1 = arith.constant 0 : i32
    return %c0_i32, %c0_i32_0 : i32, i32
  }
  func.func @transform_5(%arg0: i32) -> (i32, i32) {
    %c0_i32 = arith.constant 0 : i32
    %c0_i32_0 = arith.constant 0 : i32
    %c0_i32_1 = arith.constant 0 : i32
    return %c0_i32, %c0_i32_0 : i32, i32
  }
  func.func @transform_6(%arg0: i32) -> (i32, i32) {
    %c0_i32 = arith.constant 0 : i32
    %c0_i32_0 = arith.constant 0 : i32
    %c0_i32_1 = arith.constant 0 : i32
    return %c0_i32, %c0_i32_0 : i32, i32
  }
  func.func @transform_7(%arg0: i32) -> (i32, i32) {
    %c0_i32 = arith.constant 0 : i32
    %c0_i32_0 = arith.constant 0 : i32
    %c0_i32_1 = arith.constant 0 : i32
    return %c0_i32, %c0_i32_0 : i32, i32
  }
  func.func @transform_8(%arg0: i32) -> (i32, i32) {
    %c0_i32 = arith.constant 0 : i32
    %c0_i32_0 = arith.constant 0 : i32
    %c0_i32_1 = arith.constant 0 : i32
    return %c0_i32, %c0_i32_0 : i32, i32
  }
  func.func @transform_9(%arg0: i32) -> (i32, i32) {
    %c0_i32 = arith.constant 0 : i32
    %c0_i32_0 = arith.constant 0 : i32
    %c0_i32_1 = arith.constant 0 : i32
    return %c0_i32, %c0_i32_0 : i32, i32
  }
  func.func @transform_10(%arg0: i32) -> (i32, i32) {
    %c0_i32 = arith.constant 0 : i32
    %c0_i32_0 = arith.constant 0 : i32
    %c0_i32_1 = arith.constant 0 : i32
    return %c0_i32, %c0_i32_0 : i32, i32
  }
  func.func @transform_11(%arg0: i32) -> (i32, i32) {
    %c0_i32 = arith.constant 0 : i32
    %c0_i32_0 = arith.constant 0 : i32
    return %arg0, %c0_i32 : i32, i32
  }
}

</mosaic_0001>

<bundles_post_ra>
// kernel: tpu_custom_call.1
= control target key start
LH: loop header
LB: loop body
LE: loop exit
PB: predicated region body
PF: predicated region fallthrough
CT: control target
= control target key end

     0   :  { %s8545_s0 = inlined_call_operand.hbm [shape: bf16[16,64,64], index: 0, kind: input, shape index: {}]   ;;  %s8546_s1 = inlined_call_operand.vmem [shape: f32[1,64], index: 1, kind: input, shape index: {}]   ;;  %s8547_s2 = inlined_call_operand.vmem [shape: bf16[64,64], index: 2, kind: input, shape index: {}]   ;;  %s8548_s3 = inlined_call_operand.hbm [shape: bf16[64,192], index: 3, kind: input, shape index: {}]   ;;  %s8549_s4 = inlined_call_operand.vmem [shape: f32[1,192], index: 4, kind: input, shape index: {}]   ;;  %s8550_s5 = inlined_call_operand.hbm [shape: bf16[64,128], index: 5, kind: input, shape index: {}]   ;;  %s8551_s6 = inlined_call_operand.vmem [shape: f32[1,128], index: 6, kind: input, shape index: {}]   ;;  %s8552_s7 = inlined_call_operand.hbm [shape: bf16[64,128], index: 7, kind: input, shape index: {}]   ;;  %s8553_s8 = inlined_call_operand.vmem [shape: f32[1,128], index: 8, kind: input, shape index: {}]   ;;  %s8554_s9 = inlined_call_operand.vmem [shape: bf16[64,8], index: 9, kind: input, shape index: {}]   ;;  %s8555_s10 = inlined_call_operand.vmem [shape: bf16[8,64], index: 10, kind: input, shape index: {}]   ;;  %s8556_s11 = inlined_call_operand.hbm [shape: f32[16,128], index: 11, kind: output, shape index: {}]  }
   0x1   :  { %8594 = sst [smem:[#allocation40_spill]] %s8548_s3 }
   0x2   :  { %8595 = sst [smem:[#allocation41_spill]] %s8553_s8 }
   0x3   :  { %8596 = sst [smem:[#allocation42_spill]] %s8555_s10 }
   0x4   :  { %8597 = sst [smem:[#allocation43_spill]] %s8556_s11 }
   0x5   :  { %16 = vsyncpa [#allocation3], 0 }
   0x6   :  { %18 = vsyncpa [#allocation3 + $0x1], 0 }
   0x7   :  { %19 = vsyncpa [#allocation6], 0 }
   0x8   :  { %20 = vsyncpa [#allocation9], 0 }
   0x9   :  { %21 = vsyncpa [#allocation4], 0 }
   0xa   :  { %23 = vsyncpa [#allocation4 + $0x1], 0  ;;  %s6241_s17 = smov 0   ;;  %s6243_s18 = smov 0  }
   0xb   :  { %s6245_s19 = smov 0   ;;  %s6247_s20 = smov 0  }
   0xc LB: > { %8598 = sst [smem:[#allocation15_spill]] %s6153_s17  ;;  %s6262_s21 = sadd.s32 4294967295, %s6165_s20   ;;  %s6165_s20 = sphi %s6247_s20, %s8717_s20   ;;  %s6161_s19 = sphi %s6245_s19, %s8716_s19   ;;  %s6157_s18 = sphi %s6243_s18, %s8715_s18   ;;  %s6153_s17 = sphi %s6241_s17, %s8714_s17  }
   0xd   : > { %s5072_s22 = sadd.s32 4294967294, %s6165_s20   ;;  %p49_p0 = scmp.ne.s32.totalorder %s6157_s18, %s6153_s17 }
   0xe   : > { %p8557_p1 = scmp.eq.s32.totalorder %s6262_s21, 0  ;;  %p289_p3 = scmp.eq.s32.totalorder %s5072_s22, 1 }
   0xf   : > { %p5073_p5 = scmp.ge.s32.totalorder %s6165_s20, 1  ;;  %p296_p7 = scmp.lt.s32.totalorder %s6165_s20, 3 }
  0x10   : > { %p6271_p4 = por %p8557_p1, %p49_p0  ;;  %p6276_p6 = por %p289_p3, %p49_p0 }
  0x11   : > { %p6281_p8 = pnand %p5073_p5, %p296_p7  ;;  %s6167_s26 = smov [#allocation5]  }
  0x12   : > { %s8599_s23 = scalar_select %p6271_p4, 1, 0 }
  0x13   : > { %s8600_s24 = scalar_select %p6276_p6, 1, 0 }
  0x14   : > { %s8602_s25 = scalar_select %p6281_p8, 1, 0 }
  0x15   : > { %8601 = sst [smem:[#allocation16_spill]] %s8600_s24  ;;  %s314_s27 = sshll.u32 %s6167_s26, 4  ;;  %s6285_s27 = int_to_ptr.vmem [resolvable:$true] %s314_s27 }
  0x16   : > { %p5648_p9 = pneg %p6281_p8  ;;  %s6168_s29 = smov [#allocation7]  }
  0x17   : > { %s330_s30 = sshll.u32 %s6168_s29, 4  ;;  %s8604_s3 = sld [smem:[#allocation40_spill]]  ;;  %s6296_s30 = int_to_ptr.vmem [resolvable:$true] %s330_s30 }
  0x18   : > { %p6292_p11 = pnand %p5648_p9, %p8557_p1 }
  0x1a   : > { %p6306_p13 = pneg %p6292_p11 }
  0x1d   : > { %s5977_s14 = scalar_lea.hbm %s8604_s3, 1024 }
  0x1e   : > { %p5978_p12 = scmp.ne.s32.totalorder %s8604_s3, %s5977_s14  ;;  %p5984_p5 = scmp.lt.u32.totalorder %s5977_s14, %s8604_s3 }
  0x20   : > { %p5980_p0 = pnand %p6306_p13, %p5978_p12 }
  0x22   : > { %p5981_p3 = pneg %p5980_p0 }
  0x24   : > { %p5986_p7 = pnand %p5984_p5, %p5981_p3 }
  0x26   : > { %5989 = shalt.err (!%p5986_p7)
}
  0x27   : > { %s5990_s12 = scalar_lea.vmem %s6285_s27, 1024  ;;  %p5998_p2 = scmp.lt.s32.totalorder %s6285_s27, %s6285_s27 }
  0x28   : > { %p5991_p9 = scmp.ne.s32.totalorder %s6285_s27, %s5990_s12  ;;  %p5999_p6 = scmp.lt.s32.totalorder %s5990_s12, %s5990_s12 }
  0x2a   : > { %p5993_p10 = pnand %p5991_p9, %p6306_p13  ;;  %p6000_p12 = por %p5999_p6, %p5998_p2 }
  0x2c   : > { %p5994_p1 = pneg %p5993_p10 }
  0x2e   : > { %p6001_p0 = pnand %p6000_p12, %p5994_p1 }
  0x30   : > { %6004 = shalt.err (!%p6001_p0)
}
  0x31   : > { %s6169_s13 = smov 128   ;;  %s6170_s14 = smov 8  }
  0x32   : > { %5651 = dma.hbm_to_vmem [thread:$0]  (!%p6292_p11), %s8604_s3, 1024, %s6285_s27, [#allocation6], %s6169_s13, %s6169_s13, %s6170_s14  }
  0x33   : > { %s6005_s24 = scalar_lea.hbm %s8550_s5, 512 }
  0x34   : > { %p6006_p2 = scmp.ne.s32.totalorder %s8550_s5, %s6005_s24  ;;  %p6012_p10 = scmp.lt.u32.totalorder %s6005_s24, %s8550_s5 }
  0x36   : > { %p6008_p1 = pnand %p6006_p2, %p6306_p13 }
  0x38   : > { %p6009_p6 = pneg %p6008_p1 }
  0x3a   : > { %p6014_p3 = pnand %p6012_p10, %p6009_p6 }
  0x3c   : > { %6017 = shalt.err (!%p6014_p3)
}
  0x3d   : > { %s6018_s27 = scalar_lea.vmem %s6296_s30, 512  ;;  %p6026_p12 = scmp.lt.s32.totalorder %s6296_s30, %s6296_s30 }
  0x3e   : > { %p6019_p5 = scmp.ne.s32.totalorder %s6296_s30, %s6018_s27  ;;  %p6027_p0 = scmp.lt.s32.totalorder %s6018_s27, %s6018_s27 }
  0x40   : > { %p6021_p7 = pnand %p6019_p5, %p6306_p13  ;;  %p6028_p2 = por %p6027_p0, %p6026_p12 }
  0x42   : > { %p6022_p9 = pneg %p6021_p7 }
  0x44   : > { %p6029_p1 = pnand %p6028_p2, %p6022_p9 }
  0x46   : > { %6032 = shalt.err (!%p6029_p1)
}
  0x47   : > { %s6171_s11 = smov 64   ;;  %s6172_s8 = smov 4  }
  0x48   : > { %5654 = dma.hbm_to_vmem [thread:$0]  (!%p6292_p11), %s8550_s5, 512, %s6296_s30, [#allocation6], %s6171_s11, %s6171_s11, %s6172_s8  }
  0x49   : > { %s6173_s13 = smov [#allocation8]   ;;  %s6354_s15 = sadd.s32 1, %s6165_s20  }
  0x4a   : > { %s346_s14 = sshll.u32 %s6173_s13, 4  ;;  %s6033_s29 = scalar_lea.hbm %s8552_s7, 512  ;;  %s347_s14 = int_to_ptr.vmem [resolvable:$true] %s346_s14 }
  0x4b   : > { %p6034_p6 = scmp.ne.s32.totalorder %s8552_s7, %s6033_s29  ;;  %p6040_p5 = scmp.lt.u32.totalorder %s6033_s29, %s8552_s7 }
  0x4d   : > { %p6036_p10 = pnand %p6034_p6, %p6306_p13 }
  0x4f   : > { %p6037_p3 = pneg %p6036_p10 }
  0x51   : > { %p6042_p7 = pnand %p6040_p5, %p6037_p3 }
  0x53   : > { %6045 = shalt.err (!%p6042_p7)
}
  0x54   : > { %s6046_s30 = scalar_lea.vmem %s347_s14, 512  ;;  %p6054_p2 = scmp.lt.s32.totalorder %s347_s14, %s347_s14 }
  0x55   : > { %p6047_p9 = scmp.ne.s32.totalorder %s347_s14, %s6046_s30  ;;  %p6055_p1 = scmp.lt.s32.totalorder %s6046_s30, %s6046_s30 }
  0x57   : > { %p6049_p12 = pnand %p6047_p9, %p6306_p13  ;;  %p6056_p4 = por %p6055_p1, %p6054_p2 }
  0x59   : > { %p6050_p0 = pneg %p6049_p12 }
  0x5b   : > { %p6057_p8 = pnand %p6056_p4, %p6050_p0 }
  0x5d   : > { %6060 = shalt.err (!%p6057_p8)
}
  0x5e   : > { %5657 = dma.hbm_to_vmem [thread:$0]  (!%p6292_p11), %s8552_s7, 512, %s347_s14, [#allocation9], %s6171_s11, %s6171_s11, %s6172_s8  }
  0x5f   : > { %s33_s22 = ssub.s32 %s6165_s20, %s6354_s15  ;;  %s36_s28 = sadd.s32 1, %s6161_s19 }
  0x60   : > { %p34_p4 = scmp.eq.s32.totalorder %s33_s22, 0  ;;  %p43_p8 = scmp.ne.s32.totalorder %s6161_s19, %s6157_s18 }
  0x61   : > { %p44_p13 = scmp.eq.s32.totalorder %s6165_s20, 0  ;;  %p5669_p6 = scmp.lt.s32.totalorder %s6165_s20, 2 }
  0x62   : > { %s6385_s17 = scalar_select %p34_p4, %s6161_s19, %s36_s28  }
  0x63   : > { %p45_p10 = por %p44_p13, %p43_p8  ;;  %p8606_p3 = scmp.eq.s32.totalorder %s6262_s21, 1 }
  0x64   : > { %s369_s13 = sand.u32 1, %s6161_s19   ;;  %s5257_s16 = sshll.u32 %s6165_s20, 12 }
  0x65   : > { %p6389_p5 = por %p8606_p3, %p43_p8  ;;  %s5078_s26 = sshll.u32 %s369_s13, 8 }
  0x66   : > { %s6398_s14 = scalar_lea.hbm %s8545_s0, %s5257_s16  ;;  %s373_s27 = scalar_lea.vmem [#allocation2], %s5078_s26 }
  0x67   : > { %s381_s30 = sshll.u32 %s373_s27, 4  ;;  %p6400_p11 = pnand %p5669_p6, %p45_p10  ;;  %s6404_s30 = int_to_ptr.vmem [resolvable:$true] %s381_s30 }
  0x68   : > { %s6406_s10 = scalar_lea.sflag [#allocation3], %s369_s13  ;;  %s6061_s22 = scalar_lea.hbm %s6398_s14, 4096 }
  0x69   : > { %p6062_p7 = scmp.ne.s32.totalorder %s6398_s14, %s6061_s22  ;;  %p6063_p9 = pneg %p6400_p11 }
  0x6a   : > { %s6066_s26 = scalar_lea.hbm %s8545_s0, 8192  ;;  %p6067_p2 = scmp.lt.u32.totalorder %s6398_s14, %s8545_s0 }
  0x6b   : > { %p6064_p12 = pnand %p6063_p9, %p6062_p7  ;;  %p6068_p1 = scmp.lt.u32.totalorder %s6066_s26, %s6061_s22 }
  0x6c   : > { %p6070_p8 = scmp.lt.u32.totalorder %s6061_s22, %s6398_s14 }
  0x6d   : > { %p6065_p0 = pneg %p6064_p12  ;;  %p6069_p4 = por %p6068_p1, %p6067_p2 }
  0x6f   : > { %p6071_p13 = por %p6070_p8, %p6069_p4 }
  0x71   : > { %p6072_p6 = pnand %p6071_p13, %p6065_p0 }
  0x73   : > { %6075 = shalt.err (!%p6072_p6)
}
  0x74   : > { %s6076_s13 = scalar_lea.vmem %s6404_s30, 4096  ;;  %s6174_s27 = smov [#allocation2]  }
  0x75   : > { %p6077_p10 = scmp.ne.s32.totalorder %s6404_s30, %s6076_s13  ;;  %s6081_s28 = sshll.u32 %s6174_s27, 4  ;;  %s6082_s28 = int_to_ptr.vmem [resolvable:$false] %s6081_s28 }
  0x76   : > { %s6083_s16 = scalar_lea.vmem %s6082_s28, 8192  ;;  %p6084_p12 = scmp.lt.s32.totalorder %s6404_s30, %s6082_s28 }
  0x77   : > { %p6079_p3 = pnand %p6077_p10, %p6063_p9  ;;  %p6085_p2 = scmp.lt.s32.totalorder %s6083_s16, %s6076_s13 }
  0x79   : > { %p6080_p7 = pneg %p6079_p3  ;;  %p6086_p1 = por %p6085_p2, %p6084_p12 }
  0x7b   : > { %p6087_p4 = pnand %p6086_p1, %p6080_p7 }
  0x7d   : > { %6090 = shalt.err (!%p6087_p4)
}
  0x7e   : > { %5661 = dma.hbm_to_vmem [thread:$0]  (!%p6400_p11), %s6398_s14, 4096, %s6404_s30, %s6406_s10, %s6171_s11, %s6171_s11, %s6172_s8  }
  0x7f   : > { %p8609_p9 = scmp.ne.s32.totalorder %s8602_s25, 0 }
  0x81   : > { %393 = sbr.rel (%p8609_p9) target bundleno = 1880 (0x758), region = 64 }
  0x88   : > { %s6440_s22 = sand.u32 1, %s6157_s18   ;;  %p8610_p0 = scmp.ne.s32.totalorder %s8599_s23, 0 }
  0x89   : > { %s5083_s26 = sshll.u32 %s6440_s22, 8  ;;  %s396_s29 = scalar_lea.sflag [#allocation3], %s6440_s22 }
  0x8a   : > { %s6444_s12 = scalar_lea.vmem [#allocation2], %s5083_s26 }
  0x8b   : > { %6136 = dma.done.wait (%p8610_p0), %s396_s29, 4096  }
  0x8c   : > { %6138 = vsyncadd (%p8610_p0), %s396_s29, 4294963200  ;;  %p8611_p11 = scmp.eq.s32.totalorder %s6262_s21, 0 }
  0x8e   : > { %6140 = dma.done.wait (%p8611_p11), [#allocation6], 1536   ;;  %p8612_p8 = pmov %p8611_p11 }
  0x90   : > { %6142 = vsyncadd (%p8612_p8), [#allocation6], 4294965760  ;;  %p8613_p13 = pmov %p8612_p8 }
  0x91   : > { %p8614_p6 = pmov %p8612_p8 }
  0x92   : > { %6144 = dma.done.wait (%p8613_p13), [#allocation9], 512  }
  0x93   : > { %6146 = vsyncadd (%p8614_p6), [#allocation9], 4294966784  ;;  %v460_v0 = vld [vmem:[%s6444_s12 + $0x20] sm:$0xff]   ;;  %vm580_vm0 = vcmask 523264   ;;  %v455_v6 = vld [vmem:[%s6444_s12 + $0x8] sm:$0xff]   ;;  %vm1682_vm1 = vcmask 130112  }
  0x94   : > { %v452_v1 = vld [vmem:[%s6444_s12] sm:$0xff]   ;;  %v524_v2 = vunpack.c.l.bf16 %v460_v0  ;;  %v525_v4 = vunpack.c.h.bf16 %v460_v0  ;;  %v519_v11 = vunpack.c.h.bf16 %v455_v6  ;;  %v518_v12 = vunpack.c.l.bf16 %v455_v6  ;;  %v463_v13 = vld [vmem:[%s6444_s12 + $0x28] sm:$0xff]   ;;  %v457_v33 = vld [vmem:[%s6444_s12 + $0x10] sm:$0xff]   ;;  %s6179_s30 = smov 64   ;;  %s8659_s28 = sld [smem:[#allocation42_spill]] }
  0x95   : > { %v516_v3 = vunpack.c.l.bf16 %v452_v1  ;;  %v517_v5 = vunpack.c.h.bf16 %v452_v1  ;;  %v527_v14 = vunpack.c.h.bf16 %v463_v13  ;;  %v526_v17 = vunpack.c.l.bf16 %v463_v13  ;;  %v469_v18 = vld [vmem:[%s6444_s12 + $0x40] sm:$0xff]   ;;  %v471_v23 = vld [vmem:[%s6444_s12 + $0x48] sm:$0xff]   ;;  %v465_v38 = vld [vmem:[%s6444_s12 + $0x30] sm:$0xff]   ;;  %s5087_s29 = sshll.u32 %s6440_s22, 3  ;;  %s8707_s25 = sld [smem:[#allocation41_spill]] }
  0x96   : > { %v605_v7 = vsel %vm580_vm0, %v524_v2, 0.0  ;;  %v608_v9 = vsel %vm580_vm0, %v525_v4, 0.0  ;;  %v590_v15 = vsel %vm580_vm0, %v519_v11, 0.0  ;;  %v587_v16 = vsel %vm580_vm0, %v518_v12, 0.0  ;;  %v477_v28 = vld [vmem:[%s6444_s12 + $0x60] sm:$0xff]   ;;  %v479_v43 = vld [vmem:[%s6444_s12 + $0x68] sm:$0xff]  }
  0x97   : > { %v581_v8 = vsel %vm580_vm0, %v516_v3, 0.0  ;;  %606 = vadd.xlane.f32.xlu1 %v605_v7  ;;  %v584_v10 = vsel %vm580_vm0, %v517_v5, 0.0  ;;  %v614_v19 = vsel %vm580_vm0, %v527_v14, 0.0  ;;  %v611_v20 = vsel %vm580_vm0, %v526_v17, 0.0  ;;  %v485_v48 = vld [vmem:[%s6444_s12 + $0x80] sm:$0xff]   ;;  %v473_v53 = vld [vmem:[%s6444_s12 + $0x50] sm:$0xff]  }
  0x98   : > { %582 = vadd.xlane.f32.xlu0 %v581_v8  ;;  %v533_v21 = vunpack.c.h.bf16 %v469_v18  ;;  %v532_v22 = vunpack.c.l.bf16 %v469_v18  ;;  %v535_v26 = vunpack.c.h.bf16 %v471_v23  ;;  %v534_v27 = vunpack.c.l.bf16 %v471_v23  ;;  %v487_v58 = vld [vmem:[%s6444_s12 + $0x88] sm:$0xff]   ;;  %v493_v63 = vld [vmem:[%s6444_s12 + $0xa0] sm:$0xff]   ;;  %v459_v4 = vld [vmem:[%s6444_s12 + $0x18] sm:$0xff]   ;;  %s5253_s11 = sshll.u32 %s6262_s21, 7  ;;  %s449_s8 = scalar_lea.vmem [#allocation10], %s5087_s29 }
  0x99   : > { %v541_v31 = vunpack.c.h.bf16 %v477_v28  ;;  %v540_v32 = vunpack.c.l.bf16 %v477_v28  ;;  %v521_v36 = vunpack.c.h.bf16 %v457_v33  ;;  %v520_v37 = vunpack.c.l.bf16 %v457_v33  ;;  %v481_v14 = vld [vmem:[%s6444_s12 + $0x70] sm:$0xff]   ;;  %s4973_s14 = sshll.u32 %s449_s8, 4  ;;  %s8708_s10 = sld [smem:[#allocation43_spill]]  ;;  %s8503_s14 = int_to_ptr.vmem [resolvable:$true] %s4973_s14 }
  0x9a   : > { %v632_v24 = vsel %vm580_vm0, %v533_v21, 0.0  ;;  %v629_v25 = vsel %vm580_vm0, %v532_v22, 0.0  ;;  %v638_v29 = vsel %vm580_vm0, %v535_v26, 0.0  ;;  %v635_v30 = vsel %vm580_vm0, %v534_v27, 0.0  ;;  %s4960_s27 = scalar_lea.sflag [#allocation4], %s6440_s22  ;;  %s6091_s21 = scalar_lea.vmem %s8503_s14, 128 }
  0x9b   : > { %609 = vadd.xlane.f32.xlu1 %v608_v9  ;;  %v656_v34 = vsel %vm580_vm0, %v541_v31, 0.0  ;;  %v653_v35 = vsel %vm580_vm0, %v540_v32, 0.0  ;;  %v596_v39 = vsel %vm580_vm0, %v521_v36, 0.0  ;;  %v593_v40 = vsel %vm580_vm0, %v520_v37, 0.0  ;;  %v467_v9 = vld [vmem:[%s6444_s12 + $0x38] sm:$0xff]   ;;  %p6092_p10 = scmp.ne.s32.totalorder %s8503_s14, %s6091_s21 }
  0x9c   : > { %585 = vadd.xlane.f32.xlu0 %v584_v10  ;;  %v529_v41 = vunpack.c.h.bf16 %v465_v38  ;;  %v528_v42 = vunpack.c.l.bf16 %v465_v38  ;;  %v543_v46 = vunpack.c.h.bf16 %v479_v43  ;;  %v542_v47 = vunpack.c.l.bf16 %v479_v43 }
  0x9d   : > { %v549_v51 = vunpack.c.h.bf16 %v485_v48  ;;  %v548_v52 = vunpack.c.l.bf16 %v485_v48  ;;  %v537_v56 = vunpack.c.h.bf16 %v473_v53  ;;  %v536_v57 = vunpack.c.l.bf16 %v473_v53  ;;  %p6093_p3 = pnand %p6092_p10, %p6389_p5 }
  0x9e   : > { %v620_v44 = vsel %vm580_vm0, %v529_v41, 0.0  ;;  %v617_v45 = vsel %vm580_vm0, %v528_v42, 0.0  ;;  %v662_v49 = vsel %vm580_vm0, %v543_v46, 0.0  ;;  %v659_v50 = vsel %vm580_vm0, %v542_v47, 0.0 }
  0x9f   : > { %591 = vadd.xlane.f32.xlu1 %v590_v15  ;;  %v680_v54 = vsel %vm580_vm0, %v549_v51, 0.0  ;;  %v677_v55 = vsel %vm580_vm0, %v548_v52, 0.0  ;;  %v644_v59 = vsel %vm580_vm0, %v537_v56, 0.0  ;;  %v641_v60 = vsel %vm580_vm0, %v536_v57, 0.0  ;;  %s8501_s13 = scalar_lea.hbm %s8708_s10, %s5253_s11  ;;  %p6094_p7 = pneg %p6093_p3 }
  0xa0   : > { %588 = vadd.xlane.f32.xlu0 %v587_v16  ;;  %v551_v61 = vunpack.c.h.bf16 %v487_v58  ;;  %v550_v62 = vunpack.c.l.bf16 %v487_v58  ;;  %v557_v2 = vunpack.c.h.bf16 %v493_v63  ;;  %v556_v3 = vunpack.c.l.bf16 %v493_v63 }
  0xa1   : > { %v523_v7 = vunpack.c.h.bf16 %v459_v4  ;;  %v522_v8 = vunpack.c.l.bf16 %v459_v4  ;;  %v531_v12 = vunpack.c.h.bf16 %v467_v9  ;;  %v530_v13 = vunpack.c.l.bf16 %v467_v9 }
  0xa2   : > { %v686_v0 = vsel %vm580_vm0, %v551_v61, 0.0  ;;  %v683_v1 = vsel %vm580_vm0, %v550_v62, 0.0  ;;  %v704_v5 = vsel %vm580_vm0, %v557_v2, 0.0  ;;  %v701_v6 = vsel %vm580_vm0, %v556_v3, 0.0 }
  0xa3   : > { %615 = vadd.xlane.f32.xlu1 %v614_v19  ;;  %v602_v10 = vsel %vm580_vm0, %v523_v7, 0.0  ;;  %v599_v11 = vsel %vm580_vm0, %v522_v8, 0.0  ;;  %v626_v15 = vsel %vm580_vm0, %v531_v12, 0.0  ;;  %v623_v16 = vsel %vm580_vm0, %v530_v13, 0.0  ;;  %v495_v19 = vld [vmem:[%s6444_s12 + $0xa8] sm:$0xff]  }
  0xa4   : > { %612 = vadd.xlane.f32.xlu0 %v611_v20  ;;  %v545_v17 = vunpack.c.h.bf16 %v481_v14  ;;  %v544_v18 = vunpack.c.l.bf16 %v481_v14  ;;  %v559_v22 = vunpack.c.h.bf16 %v495_v19  ;;  %v558_v23 = vunpack.c.l.bf16 %v495_v19 }
  0xa5   : > { %vm1689_vm2 = vcmask 195712   ;;  %vm1696_vm3 = vcmask 261312   ;;  %vm1703_vm4 = vcmask 326912   ;;  %vm1710_vm5 = vcmask 392512  }
  0xa6   : > { %v668_v20 = vsel %vm580_vm0, %v545_v17, 0.0  ;;  %v665_v21 = vsel %vm580_vm0, %v544_v18, 0.0  ;;  %v707_v26 = vsel %vm580_vm0, %v558_v23, 0.0  ;;  %vm1717_vm6 = vcmask 458112  }
  0xa7   : > { %633 = vadd.xlane.f32.xlu1 %v632_v24  ;;  %v501_v24 = vld [vmem:[%s6444_s12 + $0xc0] sm:$0xff]   ;;  %vm1724_vm7 = vcmask 523712   ;;  %vm1999_vm8 = vcmask 1041409   ;;  %vm2001_vm9 = vcmask 1042434   ;;  %vm2003_vm10 = vcmask 1043459  }
  0xa8   : > { %630 = vadd.xlane.f32.xlu0 %v629_v25  ;;  %v710_v25 = vsel %vm580_vm0, %v559_v22, 0.0  ;;  %v565_v27 = vunpack.c.h.bf16 %v501_v24  ;;  %v564_v28 = vunpack.c.l.bf16 %v501_v24  ;;  %vm2005_vm11 = vcmask 1044484  }
  0xa9   : > { %vm2007_vm12 = vcmask 1045509   ;;  %vm2009_vm13 = vcmask 1046534   ;;  %vm2011_vm14 = vcmask 1047559   ;;  %vm6178_vm15 = vmmov 0  }
  0xaa   : > { %v725_v31 = vsel %vm580_vm0, %v564_v28, 0.0 }
  0xab   : > { %639 = vadd.xlane.f32.xlu1 %v638_v29  ;;  %v475_v29 = vld [vmem:[%s6444_s12 + $0x58] sm:$0xff]  }
  0xac   : > { %636 = vadd.xlane.f32.xlu0 %v635_v30  ;;  %v728_v30 = vsel %vm580_vm0, %v565_v27, 0.0  ;;  %v539_v32 = vunpack.c.h.bf16 %v475_v29  ;;  %v538_v33 = vunpack.c.l.bf16 %v475_v29 }
  0xae   : > { %v647_v36 = vsel %vm580_vm0, %v538_v33, 0.0 }
  0xaf   : > { %657 = vadd.xlane.f32.xlu1 %v656_v34  ;;  %v489_v34 = vld [vmem:[%s6444_s12 + $0x90] sm:$0xff]  }
  0xb0   : > { %654 = vadd.xlane.f32.xlu0 %v653_v35  ;;  %v650_v35 = vsel %vm580_vm0, %v539_v32, 0.0  ;;  %v553_v37 = vunpack.c.h.bf16 %v489_v34  ;;  %v552_v38 = vunpack.c.l.bf16 %v489_v34  ;;  %v5088_v32 = vld [vmem:[%s8546_s1] ss:$0 sm:$0xff] }
  0xb2   : > { %v689_v41 = vsel %vm580_vm0, %v552_v38, 0.0 }
  0xb3   : > { %597 = vadd.xlane.f32.xlu1 %v596_v39  ;;  %v503_v39 = vld [vmem:[%s6444_s12 + $0xc8] sm:$0xff]  }
  0xb4   : > { %594 = vadd.xlane.f32.xlu0 %v593_v40  ;;  %v692_v40 = vsel %vm580_vm0, %v553_v37, 0.0  ;;  %v567_v42 = vunpack.c.h.bf16 %v503_v39  ;;  %v566_v43 = vunpack.c.l.bf16 %v503_v39  ;;  %v6175_v37 = vmov 0  }
  0xb5   : > { %5719 = vset.pattern.permute.xlu1 %v6175_v37  ;;  %5718 = vset.pattern.permute.xlu0 %v6175_v37 }
  0xb6   : > { %v731_v46 = vsel %vm580_vm0, %v566_v43, 0.0  ;;  %2089 = vmatprep.mubr.bf16.mxu0 %v6175_v37 }
  0xb7   : > { %621 = vadd.xlane.f32.xlu1 %v620_v44  ;;  %v509_v44 = vld [vmem:[%s6444_s12 + $0xe0] sm:$0xff]  }
  0xb8   : > { %618 = vadd.xlane.f32.xlu0 %v617_v45  ;;  %v734_v45 = vsel %vm580_vm0, %v567_v42, 0.0  ;;  %v573_v47 = vunpack.c.h.bf16 %v509_v44  ;;  %v572_v48 = vunpack.c.l.bf16 %v509_v44 }
  0xba   : > { %v749_v51 = vsel %vm580_vm0, %v572_v48, 0.0 }
  0xbb   : > { %663 = vadd.xlane.f32.xlu1 %v662_v49  ;;  %v483_v49 = vld [vmem:[%s6444_s12 + $0x78] sm:$0xff]  }
  0xbc   : > { %660 = vadd.xlane.f32.xlu0 %v659_v50  ;;  %v752_v50 = vsel %vm580_vm0, %v573_v47, 0.0  ;;  %v547_v52 = vunpack.c.h.bf16 %v483_v49  ;;  %v546_v53 = vunpack.c.l.bf16 %v483_v49 }
  0xbe   : > { %v671_v56 = vsel %vm580_vm0, %v546_v53, 0.0 }
  0xbf   : > { %681 = vadd.xlane.f32.xlu1 %v680_v54  ;;  %v497_v54 = vld [vmem:[%s6444_s12 + $0xb0] sm:$0xff]  }
  0xc0   : > { %678 = vadd.xlane.f32.xlu0 %v677_v55  ;;  %v674_v55 = vsel %vm580_vm0, %v547_v52, 0.0  ;;  %v561_v57 = vunpack.c.h.bf16 %v497_v54  ;;  %v560_v58 = vunpack.c.l.bf16 %v497_v54 }
  0xc2   : > { %v713_v61 = vsel %vm580_vm0, %v560_v58, 0.0 }
  0xc3   : > { %645 = vadd.xlane.f32.xlu1 %v644_v59  ;;  %v511_v59 = vld [vmem:[%s6444_s12 + $0xe8] sm:$0xff]  }
  0xc4   : > { %642 = vadd.xlane.f32.xlu0 %v641_v60  ;;  %v716_v60 = vsel %vm580_vm0, %v561_v57, 0.0  ;;  %v575_v62 = vunpack.c.h.bf16 %v511_v59  ;;  %v574_v63 = vunpack.c.l.bf16 %v511_v59 }
  0xc6   : > { %v755_v2 = vsel %vm580_vm0, %v574_v63, 0.0 }
  0xc7   : > { %687 = vadd.xlane.f32.xlu1 %v686_v0  ;;  %v491_v0 = vld [vmem:[%s6444_s12 + $0x98] sm:$0xff]  }
  0xc8   : > { %684 = vadd.xlane.f32.xlu0 %v683_v1  ;;  %v758_v1 = vsel %vm580_vm0, %v575_v62, 0.0  ;;  %v555_v3 = vunpack.c.h.bf16 %v491_v0  ;;  %v554_v4 = vunpack.c.l.bf16 %v491_v0 }
  0xca   : > { %v695_v7 = vsel %vm580_vm0, %v554_v4, 0.0 }
  0xcb   : > { %705 = vadd.xlane.f32.xlu1 %v704_v5  ;;  %v505_v5 = vld [vmem:[%s6444_s12 + $0xd0] sm:$0xff]  }
  0xcc   : > { %702 = vadd.xlane.f32.xlu0 %v701_v6  ;;  %v698_v6 = vsel %vm580_vm0, %v555_v3, 0.0  ;;  %v569_v8 = vunpack.c.h.bf16 %v505_v5  ;;  %v568_v9 = vunpack.c.l.bf16 %v505_v5 }
  0xce   : > { %v737_v12 = vsel %vm580_vm0, %v568_v9, 0.0 }
  0xcf   : > { %603 = vadd.xlane.f32.xlu1 %v602_v10  ;;  %v499_v10 = vld [vmem:[%s6444_s12 + $0xb8] sm:$0xff]  }
  0xd0   : > { %600 = vadd.xlane.f32.xlu0 %v599_v11  ;;  %v740_v11 = vsel %vm580_vm0, %v569_v8, 0.0  ;;  %v563_v13 = vunpack.c.h.bf16 %v499_v10  ;;  %v562_v14 = vunpack.c.l.bf16 %v499_v10 }
  0xd2   : > { %v719_v17 = vsel %vm580_vm0, %v562_v14, 0.0 }
  0xd3   : > { %627 = vadd.xlane.f32.xlu1 %v626_v15  ;;  %v513_v15 = vld [vmem:[%s6444_s12 + $0xf0] sm:$0xff]  }
  0xd4   : > { %624 = vadd.xlane.f32.xlu0 %v623_v16  ;;  %v722_v16 = vsel %vm580_vm0, %v563_v13, 0.0  ;;  %v577_v18 = vunpack.c.h.bf16 %v513_v15  ;;  %v576_v19 = vunpack.c.l.bf16 %v513_v15 }
  0xd6   : > { %v761_v22 = vsel %vm580_vm0, %v576_v19, 0.0 }
  0xd7   : > { %669 = vadd.xlane.f32.xlu1 %v668_v20  ;;  %v507_v20 = vld [vmem:[%s6444_s12 + $0xd8] sm:$0xff]  }
  0xd8   : > { %666 = vadd.xlane.f32.xlu0 %v665_v21  ;;  %v764_v21 = vsel %vm580_vm0, %v577_v18, 0.0  ;;  %v571_v23 = vunpack.c.h.bf16 %v507_v20  ;;  %v570_v24 = vunpack.c.l.bf16 %v507_v20 }
  0xda   : > { %v743_v27 = vsel %vm580_vm0, %v570_v24, 0.0 }
  0xdb   : > { %711 = vadd.xlane.f32.xlu1 %v710_v25  ;;  %v515_v25 = vld [vmem:[%s6444_s12 + $0xf8] sm:$0xff]  }
  0xdc   : > { %708 = vadd.xlane.f32.xlu0 %v707_v26  ;;  %v746_v26 = vsel %vm580_vm0, %v571_v23, 0.0  ;;  %v579_v28 = vunpack.c.h.bf16 %v515_v25  ;;  %v578_v29 = vunpack.c.l.bf16 %v515_v25 }
  0xdf   : > { %729 = vadd.xlane.f32.xlu1 %v728_v30  ;;  %v770_v30 = vsel %vm580_vm0, %v579_v28, 0.0 }
  0xe0   : > { %726 = vadd.xlane.f32.xlu0 %v725_v31  ;;  %v767_v31 = vsel %vm580_vm0, %v578_v29, 0.0 }
  0xe3   : > { %651 = vadd.xlane.f32.xlu1 %v650_v35 }
  0xe4   : > { %648 = vadd.xlane.f32.xlu0 %v647_v36 }
  0xe7   : > { %693 = vadd.xlane.f32.xlu1 %v692_v40 }
  0xe8   : > { %690 = vadd.xlane.f32.xlu0 %v689_v41 }
  0xeb   : > { %735 = vadd.xlane.f32.xlu1 %v734_v45 }
  0xec   : > { %732 = vadd.xlane.f32.xlu0 %v731_v46 }
  0xef   : > { %753 = vadd.xlane.f32.xlu1 %v752_v50 }
  0xf0   : > { %750 = vadd.xlane.f32.xlu0 %v749_v51 }
  0xf3   : > { %675 = vadd.xlane.f32.xlu1 %v674_v55 }
  0xf4   : > { %672 = vadd.xlane.f32.xlu0 %v671_v56 }
  0xf7   : > { %717 = vadd.xlane.f32.xlu1 %v716_v60 }
  0xf8   : > { %714 = vadd.xlane.f32.xlu0 %v713_v61 }
  0xfb   : > { %759 = vadd.xlane.f32.xlu1 %v758_v1 }
  0xfc   : > { %756 = vadd.xlane.f32.xlu0 %v755_v2 }
  0xff   : > { %699 = vadd.xlane.f32.xlu1 %v698_v6 }
 0x100   : > { %696 = vadd.xlane.f32.xlu0 %v695_v7 }
 0x103   : > { %741 = vadd.xlane.f32.xlu1 %v740_v11 }
 0x104   : > { %738 = vadd.xlane.f32.xlu0 %v737_v12 }
 0x107   : > { %723 = vadd.xlane.f32.xlu1 %v722_v16 }
 0x108   : > { %720 = vadd.xlane.f32.xlu0 %v719_v17 }
 0x10b   : > { %765 = vadd.xlane.f32.xlu1 %v764_v21 }
 0x10c   : > { %762 = vadd.xlane.f32.xlu0 %v761_v22 }
 0x10f   : > { %747 = vadd.xlane.f32.xlu1 %v746_v26 }
 0x110   : > { %744 = vadd.xlane.f32.xlu0 %v743_v27 }
 0x113   : > { %771 = vadd.xlane.f32.xlu1 %v770_v30 }
 0x114   : > { %768 = vadd.xlane.f32.xlu0 %v767_v31 }
 0x124   : > { %v6557_v33 = vpop.xlane.xlu1 %606  ;;  %849 = vbcast.lane.b32.xlu1 %v5088_v32, 264 }
 0x125   : > { %v6559_v34 = vpop.xlane.xlu0 %582 }
 0x128   : > { %v6561_v35 = vpop.xlane.xlu1 %609  ;;  %853 = vbcast.lane.b32.xlu1 %v5088_v32, 272 }
 0x129   : > { %v6563_v36 = vpop.xlane.xlu0 %585 }
 0x12a   : > { %845 = vbcast.lane.b32.xlu0 %v5088_v32, 256 }
 0x12c   : > { %v6565_v38 = vpop.xlane.xlu1 %591  ;;  %857 = vbcast.lane.b32.xlu1 %v5088_v32, 280 }
 0x12d   : > { %v6567_v39 = vpop.xlane.xlu0 %588 }
 0x12e   : > { %861 = vbcast.lane.b32.xlu0 %v5088_v32, 288 }
 0x130   : > { %v6569_v40 = vpop.xlane.xlu1 %615  ;;  %865 = vbcast.lane.b32.xlu1 %v5088_v32, 296 }
 0x131   : > { %v6571_v41 = vpop.xlane.xlu0 %612 }
 0x132   : > { %869 = vbcast.lane.b32.xlu0 %v5088_v32, 304 }
 0x134   : > { %v6573_v42 = vpop.xlane.xlu1 %633  ;;  %873 = vbcast.lane.b32.xlu1 %v5088_v32, 312 }
 0x135   : > { %v6575_v43 = vpop.xlane.xlu0 %630 }
 0x138   : > { %v6577_v44 = vpop.xlane.xlu1 %639 }
 0x139   : > { %v6579_v45 = vpop.xlane.xlu0 %636 }
 0x13c   : > { %v6581_v46 = vpop.xlane.xlu1 %657 }
 0x13d   : > { %v6583_v47 = vpop.xlane.xlu0 %654 }
 0x140   : > { %v6585_v48 = vpop.xlane.xlu1 %597 }
 0x141   : > { %v6587_v49 = vpop.xlane.xlu0 %594 }
 0x144   : > { %v6589_v50 = vpop.xlane.xlu1 %621 }
 0x145   : > { %v6591_v51 = vpop.xlane.xlu0 %618 }
 0x148   : > { %v6593_v52 = vpop.xlane.xlu1 %663 }
 0x149   : > { %v6595_v53 = vpop.xlane.xlu0 %660 }
 0x14c   : > { %v6597_v54 = vpop.xlane.xlu1 %681 }
 0x14d   : > { %v6599_v55 = vpop.xlane.xlu0 %678 }
 0x150   : > { %v6601_v56 = vpop.xlane.xlu1 %645 }
 0x151   : > { %v6603_v57 = vpop.xlane.xlu0 %642 }
 0x154   : > { %v6605_v58 = vpop.xlane.xlu1 %687 }
 0x155   : > { %v6607_v59 = vpop.xlane.xlu0 %684 }
 0x158   : > { %v6609_v60 = vpop.xlane.xlu1 %705 }
 0x159   : > { %v6611_v61 = vpop.xlane.xlu0 %702 }
 0x15c   : > { %v6613_v62 = vpop.xlane.xlu1 %603 }
 0x15d   : > { %v6615_v63 = vpop.xlane.xlu0 %600 }
 0x160   : > { %v6617_v0 = vpop.xlane.xlu1 %627 }
 0x161   : > { %v6619_v1 = vpop.xlane.xlu0 %624 }
 0x164   : > { %v6621_v2 = vpop.xlane.xlu1 %669 }
 0x165   : > { %8615 = vst [vmem:[#allocation17_spill] sm:$0xff] %v6621_v2  ;;  %v6623_v3 = vpop.xlane.xlu0 %666  ;;  %v777_v2 = vmul.f32 0.015625, %v6565_v38 }
 0x166   : > { %8616 = vst [vmem:[#allocation18_spill] sm:$0xff] %v6623_v3  ;;  %v790_v3 = vmul.f32 0.015625, %v6575_v43 }
 0x168   : > { %v6625_v4 = vpop.xlane.xlu1 %711 }
 0x169   : > { %8617 = vst [vmem:[#allocation19_spill] sm:$0xff] %v6625_v4  ;;  %v6627_v5 = vpop.xlane.xlu0 %708 }
 0x16a   : > { %8618 = vst [vmem:[#allocation20_spill] sm:$0xff] %v6627_v5 }
 0x16c   : > { %v6629_v6 = vpop.xlane.xlu1 %729 }
 0x16d   : > { %v6631_v7 = vpop.xlane.xlu0 %726 }
 0x170   : > { %v6633_v8 = vpop.xlane.xlu1 %651 }
 0x171   : > { %8619 = vst [vmem:[#allocation21_spill] sm:$0xff] %v6633_v8  ;;  %v6635_v9 = vpop.xlane.xlu0 %648 }
 0x172   : > { %8620 = vst [vmem:[#allocation22_spill] sm:$0xff] %v6635_v9 }
 0x174   : > { %v6637_v10 = vpop.xlane.xlu1 %693 }
 0x175   : > { %v6639_v11 = vpop.xlane.xlu0 %690 }
 0x178   : > { %v6641_v12 = vpop.xlane.xlu1 %735 }
 0x179   : > { %v6643_v13 = vpop.xlane.xlu0 %732 }
 0x17c   : > { %v6645_v14 = vpop.xlane.xlu1 %753 }
 0x17d   : > { %v6647_v15 = vpop.xlane.xlu0 %750 }
 0x180   : > { %v6649_v16 = vpop.xlane.xlu1 %675 }
 0x181   : > { %8621 = vst [vmem:[#allocation23_spill] sm:$0xff] %v6649_v16  ;;  %v6651_v17 = vpop.xlane.xlu0 %672  ;;  %v775_v16 = vmul.f32 0.015625, %v6563_v36  ;;  %v791_v36 = vmul.f32 0.015625, %v6573_v42 }
 0x182   : > { %8622 = vst [vmem:[#allocation24_spill] sm:$0xff] %v6651_v17  ;;  %v783_v17 = vmul.f32 0.015625, %v6561_v35 }
 0x184   : > { %v6653_v18 = vpop.xlane.xlu1 %717 }
 0x185   : > { %v6655_v19 = vpop.xlane.xlu0 %714 }
 0x188   : > { %v6657_v20 = vpop.xlane.xlu1 %759 }
 0x189   : > { %v6659_v21 = vpop.xlane.xlu0 %756 }
 0x18c   : > { %v6661_v22 = vpop.xlane.xlu1 %699 }
 0x18d   : > { %v6663_v23 = vpop.xlane.xlu0 %696 }
 0x190   : > { %v6665_v24 = vpop.xlane.xlu1 %741 }
 0x191   : > { %8623 = vst [vmem:[#allocation25_spill] sm:$0xff] %v6665_v24  ;;  %v6667_v25 = vpop.xlane.xlu0 %738  ;;  %v782_v24 = vmul.f32 0.015625, %v6557_v33 }
 0x192   : > { %8624 = vst [vmem:[#allocation26_spill] sm:$0xff] %v6667_v25  ;;  %v774_v25 = vmul.f32 0.015625, %v6559_v34 }
 0x194   : > { %v6669_v26 = vpop.xlane.xlu1 %723 }
 0x195   : > { %v6671_v27 = vpop.xlane.xlu0 %720 }
 0x198   : > { %v6673_v28 = vpop.xlane.xlu1 %765 }
 0x199   : > { %8625 = vst [vmem:[#allocation27_spill] sm:$0xff] %v6673_v28  ;;  %v6675_v29 = vpop.xlane.xlu0 %762 }
 0x19a   : > { %8626 = vst [vmem:[#allocation28_spill] sm:$0xff] %v6675_v29 }
 0x19c   : > { %v6677_v30 = vpop.xlane.xlu1 %747 }
 0x19d   : > { %v6679_v31 = vpop.xlane.xlu0 %744 }
 0x1a0   : > { %v6681_v32 = vpop.xlane.xlu1 %771 }
 0x1a1   : > { %8627 = vst [vmem:[#allocation29_spill] sm:$0xff] %v6681_v32  ;;  %v6683_v37 = vpop.xlane.xlu0 %768 }
 0x1a2   : > { %8628 = vst [vmem:[#allocation30_spill] sm:$0xff] %v6683_v37 }
 0x1a4   : > { %v6689_v9 = vpop.permute.xlu1 %849 }
 0x1a5   : > { %v6691_v28 = vpop.permute.xlu0 %845  ;;  %v884_v8 = vadd.f32 %v6689_v9, %v775_v16  ;;  %v892_v37 = vadd.f32 %v6689_v9, %v783_v17  ;;  %v785_v16 = vmul.f32 0.015625, %v6569_v40  ;;  %v900_v42 = vadd.f32 %v6689_v9, %v791_v36 }
 0x1a6   : > { %v883_v29 = vadd.f32 %v6691_v28, %v774_v25  ;;  %v891_v32 = vadd.f32 %v6691_v28, %v782_v24  ;;  %v776_v25 = vmul.f32 0.015625, %v6567_v39  ;;  %v784_v24 = vmul.f32 0.015625, %v6571_v41 }
 0x1a7   : > { %v798_v36 = vmul.f32 0.015625, %v6583_v47 }
 0x1a8   : > { %v947_v5 = vpack.c.bf16 %v884_v8, %v883_v29  ;;  %v6697_v33 = vpop.permute.xlu1 %853  ;;  %v951_v34 = vpack.c.bf16 %v892_v37, %v891_v32 }
 0x1a9   : > { %v885_v43 = vadd.f32 %v6697_v33, %v776_v25  ;;  %v893_v39 = vadd.f32 %v6697_v33, %v784_v24  ;;  %v792_v25 = vmul.f32 0.015625, %v6579_v45  ;;  %v801_v45 = vmul.f32 0.015625, %v6593_v52 }
 0x1aa   : > { %v1416_v4 = vunpack.c.h.b16 %v947_v5  ;;  %v1415_v35 = vunpack.c.l.b16 %v947_v5  ;;  %v1423_v17 = vunpack.c.l.b16 %v951_v34  ;;  %v1424_v29 = vunpack.c.h.b16 %v951_v34 }
 0x1ab   : > { %v899_v5 = vadd.f32 %v6691_v28, %v790_v3  ;;  %v793_v34 = vmul.f32 0.015625, %v6577_v44  ;;  %v799_v3 = vmul.f32 0.015625, %v6581_v46  ;;  %v787_v44 = vmul.f32 0.015625, %v6589_v50 }
 0x1ac   : > { %1483 = vperm.xlu1 %5719, %v1416_v4   ;;  %1480 = vperm.xlu0 %5718, %v1415_v35   ;;  %v6705_v8 = vpop.permute.xlu1 %857  ;;  %v786_v46 = vmul.f32 0.015625, %v6591_v51  ;;  %v822_v50 = vmul.f32 0.015625, %v6631_v7  ;;  %v811_v51 = vmul.f32 0.015625, %v6637_v10  ;;  %v810_v52 = vmul.f32 0.015625, %v6639_v11 }
 0x1ad   : > { %v886_v38 = vadd.f32 %v6705_v8, %v777_v2  ;;  %v894_v40 = vadd.f32 %v6705_v8, %v785_v16  ;;  %v955_v35 = vpack.c.bf16 %v900_v42, %v899_v5  ;;  %v779_v2 = vmul.f32 0.015625, %v6585_v48 }
 0x1ae   : > { %v778_v16 = vmul.f32 0.015625, %v6587_v49  ;;  %v902_v24 = vadd.f32 %v6705_v8, %v793_v34  ;;  %v800_v48 = vmul.f32 0.015625, %v6595_v53  ;;  %v807_v42 = vmul.f32 0.015625, %v6597_v54 }
 0x1af   : > { %v948_v41 = vpack.c.bf16 %v886_v38, %v885_v43  ;;  %v952_v4 = vpack.c.bf16 %v894_v40, %v893_v39  ;;  %v1431_v5 = vunpack.c.l.b16 %v955_v35  ;;  %v1432_v47 = vunpack.c.h.b16 %v955_v35  ;;  %v6736_v40 = vpop.permute.xlu0 %861 }
 0x1b0   : > { %1504 = vperm.xlu1 %5719, %v1423_v17   ;;  %1507 = vperm.xlu0 %5718, %v1424_v29   ;;  %v907_v17 = vadd.f32 %v6691_v28, %v798_v36  ;;  %v908_v29 = vadd.f32 %v6689_v9, %v799_v3  ;;  %v6727_v43 = vpop.permute.xlu1 %865  ;;  %v901_v49 = vadd.f32 %v6697_v33, %v792_v25  ;;  %v806_v38 = vmul.f32 0.015625, %v6599_v55 }
 0x1b1   : > { %v1417_v32 = vunpack.c.l.b16 %v948_v41  ;;  %v1425_v37 = vunpack.c.l.b16 %v952_v4  ;;  %v823_v39 = vmul.f32 0.015625, %v6629_v6  ;;  %v825_v53 = vmul.f32 0.015625, %v6641_v12 }
 0x1b2   : > { %v6738_v54 = vpack.c.bf16 %v902_v24, %v901_v49  ;;  %v1426_v35 = vunpack.c.h.b16 %v952_v4  ;;  %v888_v55 = vadd.f32 %v6727_v43, %v779_v2  ;;  %v931_v6 = vadd.f32 %v6691_v28, %v822_v50 }
 0x1b3   : > { %v824_v7 = vmul.f32 0.015625, %v6643_v13  ;;  %v831_v10 = vmul.f32 0.015625, %v6645_v14  ;;  %v830_v34 = vmul.f32 0.015625, %v6647_v15  ;;  %v932_v11 = vadd.f32 %v6689_v9, %v823_v39 }
 0x1b4   : > { %1486 = vperm.xlu1 %5719, %v1417_v32   ;;  %1510 = vperm.xlu0 %5718, %v1425_v37   ;;  %v959_v32 = vpack.c.bf16 %v908_v29, %v907_v17  ;;  %v1418_v37 = vunpack.c.h.b16 %v948_v41  ;;  %v819_v12 = vmul.f32 0.015625, %v6653_v18  ;;  %v818_v3 = vmul.f32 0.015625, %v6655_v19  ;;  %v6775_v50 = vpop.permute.xlu1 %873 }
 0x1b5   : > { %v833_v36 = vmul.f32 0.015625, %v6657_v20  ;;  %v887_v41 = vadd.f32 %v6736_v40, %v778_v16  ;;  %v1433_v4 = vunpack.c.l.b16 %v6738_v54  ;;  %v896_v13 = vadd.f32 %v6727_v43, %v787_v44 }
 0x1b6   : > { %v1439_v25 = vunpack.c.l.b16 %v959_v32  ;;  %v6752_v14 = vpack.c.bf16 %v932_v11, %v931_v6  ;;  %v919_v2 = vadd.f32 %v6736_v40, %v810_v52  ;;  %v920_v18 = vadd.f32 %v6727_v43, %v811_v51 }
 0x1b7   : > { %v6754_v15 = vpack.c.bf16 %v888_v55, %v887_v41  ;;  %v939_v19 = vadd.f32 %v6691_v28, %v830_v34  ;;  %v895_v20 = vadd.f32 %v6736_v40, %v786_v46  ;;  %v915_v24 = vadd.f32 %v6691_v28, %v806_v38 }
 0x1b8   : > { %1528 = vperm.xlu1 %5719, %v1431_v5   ;;  %1531 = vperm.xlu0 %5718, %v1432_v47   ;;  %v916_v16 = vadd.f32 %v6689_v9, %v807_v42  ;;  %v940_v17 = vadd.f32 %v6689_v9, %v831_v10  ;;  %v832_v29 = vmul.f32 0.015625, %v6659_v21  ;;  %v6764_v44 = vpack.c.bf16 %v920_v18, %v919_v2  ;;  %v6773_v42 = vpop.permute.xlu0 %869 }
 0x1b9   : > { %v933_v5 = vadd.f32 %v6697_v33, %v824_v7  ;;  %v934_v47 = vadd.f32 %v6705_v8, %v825_v53  ;;  %v1440_v49 = vunpack.c.h.b16 %v959_v32  ;;  %v6768_v39 = vpack.c.bf16 %v896_v13, %v895_v20 }
 0x1ba   : > { %v910_v46 = vadd.f32 %v6705_v8, %v801_v45  ;;  %v6771_v38 = vpack.c.bf16 %v940_v17, %v939_v19  ;;  %v1419_v21 = vunpack.c.l.b16 %v6754_v15  ;;  %v927_v52 = vadd.f32 %v6736_v40, %v818_v3 }
 0x1bb   : > { %v6778_v51 = vpack.c.bf16 %v934_v47, %v933_v5  ;;  %v813_v53 = vmul.f32 0.015625, %v6661_v22  ;;  %v812_v32 = vmul.f32 0.015625, %v6663_v23  ;;  %v909_v45 = vadd.f32 %v6697_v33, %v800_v48 }
 0x1bc   : > { %1489 = vperm.xlu1 %5719, %v1418_v37   ;;  %1513 = vperm.xlu0 %5718, %v1426_v35   ;;  %v928_v37 = vadd.f32 %v6727_v43, %v819_v12  ;;  %v821_v35 = vmul.f32 0.015625, %v6669_v26  ;;  %v941_v6 = vadd.f32 %v6697_v33, %v832_v29  ;;  %v942_v7 = vadd.f32 %v6705_v8, %v833_v36 }
 0x1bd   : > { %v820_v10 = vmul.f32 0.015625, %v6671_v27  ;;  %v963_v34 = vpack.c.bf16 %v916_v16, %v915_v24  ;;  %v921_v11 = vadd.f32 %v6773_v42, %v812_v32  ;;  %v922_v22 = vadd.f32 %v6775_v50, %v813_v53 }
 0x1be   : > { %v6786_v55 = vpack.c.bf16 %v928_v37, %v927_v52  ;;  %v1427_v23 = vunpack.c.l.b16 %v6768_v39  ;;  %v1434_v48 = vunpack.c.h.b16 %v6738_v54  ;;  %v960_v26 = vpack.c.bf16 %v910_v46, %v909_v45 }
 0x1bf   : > { %v6795_v12 = vpack.c.bf16 %v942_v7, %v941_v6  ;;  %v6797_v3 = vpack.c.bf16 %v922_v22, %v921_v11  ;;  %v929_v41 = vadd.f32 %v6773_v42, %v820_v10  ;;  %v930_v36 = vadd.f32 %v6775_v50, %v821_v35  ;;  %v8630_v7 = vld [vmem:[#allocation18_spill] sm:$0xff] }
 0x1c0   : > { %1534 = vperm.xlu1 %5719, %v1433_v4   ;;  %1552 = vperm.xlu0 %5718, %v1439_v25   ;;  %v795_v27 = vmul.f32 0.015625, %v6601_v56  ;;  %v829_v4 = vmul.f32 0.015625, %v6677_v30  ;;  %v828_v25 = vmul.f32 0.015625, %v6679_v31  ;;  %v794_v13 = vmul.f32 0.015625, %v6603_v57 }
 0x1c1   : > { %v1447_v54 = vunpack.c.l.b16 %v963_v34  ;;  %v6805_v2 = vpack.c.bf16 %v930_v36, %v929_v41  ;;  %v1441_v18 = vunpack.c.l.b16 %v960_v26  ;;  %v809_v56 = vmul.f32 0.015625, %v6605_v58  ;;  %v8632_v41 = vld [vmem:[#allocation20_spill] sm:$0xff] }
 0x1c2   : > { %v904_v19 = vadd.f32 %v6727_v43, %v795_v27  ;;  %v937_v20 = vadd.f32 %v6773_v42, %v828_v25  ;;  %v938_v24 = vadd.f32 %v6775_v50, %v829_v4  ;;  %v903_v30 = vadd.f32 %v6736_v40, %v794_v13 }
 0x1c3   : > { %v808_v57 = vmul.f32 0.015625, %v6607_v59  ;;  %v1448_v16 = vunpack.c.h.b16 %v963_v34  ;;  %v1420_v17 = vunpack.c.h.b16 %v6754_v15  ;;  %v918_v5 = vadd.f32 %v6705_v8, %v809_v56 }
 0x1c4   : > { %1555 = vperm.xlu1 %5719, %v1440_v49   ;;  %1492 = vperm.xlu0 %5718, %v1419_v21   ;;  %v6812_v31 = vpack.c.bf16 %v938_v24, %v937_v20  ;;  %v957_v29 = vpack.c.bf16 %v904_v19, %v903_v30  ;;  %v815_v47 = vmul.f32 0.015625, %v6609_v60  ;;  %v814_v49 = vmul.f32 0.015625, %v6611_v61  ;;  %v8633_v30 = vld [vmem:[#allocation21_spill] sm:$0xff] }
 0x1c5   : > { %v917_v58 = vadd.f32 %v6697_v33, %v808_v57  ;;  %v1428_v59 = vunpack.c.h.b16 %v6768_v39  ;;  %v781_v15 = vmul.f32 0.015625, %v6613_v62  ;;  %v789_v53 = vmul.f32 0.015625, %v6617_v0  ;;  %v8629_v39 = vld [vmem:[#allocation17_spill] sm:$0xff] }
 0x1c6   : > { %v923_v46 = vadd.f32 %v6691_v28, %v814_v49  ;;  %v924_v21 = vadd.f32 %v6689_v9, %v815_v47  ;;  %v1435_v52 = vunpack.c.l.b16 %v957_v29  ;;  %v780_v60 = vmul.f32 0.015625, %v6615_v63 }
 0x1c7   : > { %v964_v37 = vpack.c.bf16 %v918_v5, %v917_v58  ;;  %v788_v61 = vmul.f32 0.015625, %v6619_v1  ;;  %v1442_v45 = vunpack.c.h.b16 %v960_v26  ;;  %v898_v28 = vadd.f32 %v6775_v50, %v789_v53 }
 0x1c8   : > { %1516 = vperm.xlu1 %5719, %v1427_v23   ;;  %1537 = vperm.xlu0 %5718, %v1434_v48   ;;  %v967_v32 = vpack.c.bf16 %v924_v21, %v923_v46  ;;  %v890_v9 = vadd.f32 %v6775_v50, %v781_v15  ;;  %v803_v6 = vmul.f32 0.015625, %v8629_v39  ;;  %v889_v0 = vadd.f32 %v6773_v42, %v780_v60  ;;  %v8631_v23 = vld [vmem:[#allocation19_spill] sm:$0xff]  ;;  %v8636_v15 = vld [vmem:[#allocation24_spill] sm:$0xff] }
 0x1c9   : > { %v1449_v35 = vunpack.c.l.b16 %v964_v37  ;;  %v897_v62 = vadd.f32 %v6773_v42, %v788_v61  ;;  %v802_v10 = vmul.f32 0.015625, %v8630_v7  ;;  %v817_v48 = vmul.f32 0.015625, %v8631_v23  ;;  %v8637_v7 = vld [vmem:[#allocation25_spill] sm:$0xff] }
 0x1ca   : > { %v1455_v63 = vunpack.c.l.b16 %v967_v32  ;;  %v1456_v34 = vunpack.c.h.b16 %v967_v32  ;;  %v950_v11 = vpack.c.bf16 %v890_v9, %v889_v0  ;;  %v912_v22 = vadd.f32 %v6727_v43, %v803_v6 }
 0x1cb   : > { %v954_v1 = vpack.c.bf16 %v898_v28, %v897_v62  ;;  %v911_v26 = vadd.f32 %v6736_v40, %v802_v10  ;;  %v816_v36 = vmul.f32 0.015625, %v8632_v41  ;;  %v926_v13 = vadd.f32 %v6705_v8, %v817_v48  ;;  %v8639_v48 = vld [vmem:[#allocation27_spill] sm:$0xff]  ;;  %v8640_v41 = vld [vmem:[#allocation28_spill] sm:$0xff] }
 0x1cc   : > { %1558 = vperm.xlu1 %5719, %v1441_v18   ;;  %1576 = vperm.xlu0 %5718, %v1447_v54   ;;  %v1421_v4 = vunpack.c.l.b16 %v950_v11  ;;  %v1436_v19 = vunpack.c.h.b16 %v957_v29  ;;  %v1450_v56 = vunpack.c.h.b16 %v964_v37  ;;  %v797_v57 = vmul.f32 0.015625, %v8633_v30  ;;  %v8635_v37 = vld [vmem:[#allocation23_spill] sm:$0xff] }
 0x1cd   : > { %v1429_v27 = vunpack.c.l.b16 %v954_v1  ;;  %v961_v25 = vpack.c.bf16 %v912_v22, %v911_v26  ;;  %v925_v54 = vadd.f32 %v6697_v33, %v816_v36  ;;  %v1464_v5 = vunpack.c.h.b16 %v6752_v14 }
 0x1ce   : > { %v1463_v8 = vunpack.c.l.b16 %v6752_v14  ;;  %v906_v47 = vadd.f32 %v6775_v50, %v797_v57  ;;  %v1430_v29 = vunpack.c.h.b16 %v954_v1  ;;  %v1422_v49 = vunpack.c.h.b16 %v950_v11 }
 0x1cf   : > { %v1443_v18 = vunpack.c.l.b16 %v961_v25  ;;  %v968_v20 = vpack.c.bf16 %v926_v13, %v925_v54  ;;  %v1444_v46 = vunpack.c.h.b16 %v961_v25  ;;  %v805_v14 = vmul.f32 0.015625, %v8635_v37 }
 0x1d0   : > { %1579 = vperm.xlu1 %5719, %v1448_v16   ;;  %1495 = vperm.xlu0 %5718, %v1420_v17   ;;  %v8634_v16 = vld [vmem:[#allocation22_spill] sm:$0xff]  ;;  %v804_v53 = vmul.f32 0.015625, %v8636_v15  ;;  %v1471_v60 = vunpack.c.l.b16 %v6771_v38  ;;  %v1465_v61 = vunpack.c.l.b16 %v6778_v51  ;;  %v1472_v28 = vunpack.c.h.b16 %v6771_v38 }
 0x1d1   : > { %v1457_v24 = vunpack.c.l.b16 %v968_v20  ;;  %v796_v17 = vmul.f32 0.015625, %v8634_v16  ;;  %v914_v32 = vadd.f32 %v6775_v50, %v805_v14  ;;  %v1452_v39 = vunpack.c.h.b16 %v6764_v44  ;;  %v5752_v16 = vld [vmem:[#allocation5 + $0x4] ss:$8 sps:$4 sm:$0xff]  }
 0x1d2   : > { %v1466_v62 = vunpack.c.h.b16 %v6778_v51  ;;  %v1459_v0 = vunpack.c.l.b16 %v6786_v55  ;;  %v827_v10 = vmul.f32 0.015625, %v8637_v7  ;;  %v1473_v38 = vunpack.c.l.b16 %v6795_v12  ;;  %2057 = vmatprep.subr.bf16.mxu0 %v5752_v16  ;;  %v6890_v14 = vld [vmem:[#allocation7 + $0x8] sm:$0xff]  }
 0x1d3   : > { %v905_v33 = vadd.f32 %v6773_v42, %v796_v17  ;;  %v1460_v22 = vunpack.c.h.b16 %v6786_v55  ;;  %v1453_v51 = vunpack.c.l.b16 %v6797_v3  ;;  %v835_v26 = vmul.f32 0.015625, %v8639_v48  ;;  %v5754_v17 = vld [vmem:[#allocation5] ss:$8 sps:$4 sm:$0xff]   ;;  %8644 = vst [vmem:[#allocation18_spill] sm:$0xff] %v6890_v14 }
 0x1d4   : > { %1519 = vperm.xlu1 %5719, %v1428_v59   ;;  %1540 = vperm.xlu0 %5718, %v1435_v52   ;;  %v1458_v59 = vunpack.c.h.b16 %v968_v20  ;;  %v1451_v52 = vunpack.c.l.b16 %v6764_v44  ;;  %v936_v11 = vadd.f32 %v6727_v43, %v827_v10  ;;  %v834_v36 = vmul.f32 0.015625, %v8640_v41  ;;  %v5945_v7 = vld [vmem:[%s6444_s12 + $0x28] sm:$0xff]   ;;  %v5946_v10 = vld [vmem:[%s6444_s12] sm:$0xff]   ;;  %v5952_v41 = vld [vmem:[%s6444_s12 + $0x18] sm:$0xff]  }
 0x1d5   : > { %v958_v58 = vpack.c.bf16 %v906_v47, %v905_v33  ;;  %v944_v25 = vadd.f32 %v6727_v43, %v835_v26  ;;  %v1461_v55 = vunpack.c.l.b16 %v6805_v2  ;;  %v1454_v54 = vunpack.c.h.b16 %v6797_v3  ;;  %2058 = vmatpush1.bf16.msra.mxu0 %v5754_v17  ;;  %v5755_v33 = vld [vmem:[#allocation5 + $0x14] ss:$8 sps:$4 sm:$0xff]   ;;  %v5951_v26 = vld [vmem:[%s6444_s12 + $0x40] sm:$0xff]   ;;  %v5961_v17 = vld [vmem:[%s6444_s12 + $0x88] sm:$0xff]  }
 0x1d6   : > { %v943_v13 = vadd.f32 %v6736_v40, %v834_v36  ;;  %v1469_v43 = vunpack.c.l.b16 %v6812_v31  ;;  %v1462_v57 = vunpack.c.h.b16 %v6805_v2  ;;  %2059 = vmatprep.subr.bf16.mxu0 %v5755_v33  ;;  %v5964_v33 = vld [vmem:[%s6444_s12 + $0xa8] sm:$0xff]  }
 0x1d7   : > { %v1437_v21 = vunpack.c.l.b16 %v958_v58 }
 0x1d8   : > { %1561 = vperm.xlu1 %5719, %v1442_v45   ;;  %1582 = vperm.xlu0 %5718, %v1449_v35   ;;  %v913_v45 = vadd.f32 %v6773_v42, %v804_v53  ;;  %v1438_v35 = vunpack.c.h.b16 %v958_v58  ;;  %v5760_v58 = vld [vmem:[#allocation5 + $0x20] ss:$8 sps:$4 sm:$0xff]  }
 0x1da   : > { %v962_v9 = vpack.c.bf16 %v914_v32, %v913_v45  ;;  %v6906_v45 = vld [vmem:[#allocation7 + $0x18] sm:$0xff]  }
 0x1db   : > { %8646 = vst [vmem:[#allocation20_spill] sm:$0xff] %v6906_v45 }
 0x1dc   : > { %1600 = vperm.xlu1 %5719, %v1455_v63   ;;  %1603 = vperm.xlu0 %5718, %v1456_v34   ;;  %v1445_v6 = vunpack.c.l.b16 %v962_v9  ;;  %v8638_v63 = vld [vmem:[#allocation26_spill] sm:$0xff]  ;;  %v1446_v1 = vunpack.c.h.b16 %v962_v9 }
 0x1dd   : > { %v826_v34 = vmul.f32 0.015625, %v8638_v63 }
 0x1df   : > { %v935_v44 = vadd.f32 %v6736_v40, %v826_v34 }
 0x1e0   : > { %1522 = vperm.xlu0 %5718, %v1429_v27   ;;  %1498 = vperm.xlu1 %5719, %v1421_v4   ;;  %v1474_v27 = vunpack.c.h.b16 %v6795_v12  ;;  %v8642_v12 = vld [vmem:[#allocation30_spill] sm:$0xff] }
 0x1e1   : > { %v973_v23 = vpack.c.bf16 %v936_v11, %v935_v44  ;;  %v836_v30 = vmul.f32 0.015625, %v8642_v12 }
 0x1e3   : > { %v1467_v4 = vunpack.c.l.b16 %v973_v23  ;;  %v1468_v20 = vunpack.c.h.b16 %v973_v23  ;;  %v945_v3 = vadd.f32 %v6773_v42, %v836_v30 }
 0x1e4   : > { %1564 = vperm.xlu0 %5718, %v1443_v18   ;;  %1543 = vperm.xlu1 %5719, %v1436_v19   ;;  %v977_v18 = vpack.c.bf16 %v944_v25, %v943_v13  ;;  %v5954_v25 = vld [vmem:[%s6444_s12 + $0x60] sm:$0xff]  }
 0x1e6   : > { %v1475_v19 = vunpack.c.l.b16 %v977_v18 }
 0x1e8   : > { %1606 = vperm.xlu0 %5718, %v1457_v24   ;;  %1585 = vperm.xlu1 %5719, %v1450_v56   ;;  %v8641_v24 = vld [vmem:[#allocation29_spill] sm:$0xff] }
 0x1e9   : > { %v837_v56 = vmul.f32 0.015625, %v8641_v24  ;;  %v5957_v24 = vld [vmem:[%s6444_s12 + $0x58] sm:$0xff]  }
 0x1eb   : > { %v946_v40 = vadd.f32 %v6775_v50, %v837_v56  ;;  %v5758_v50 = vld [vmem:[#allocation5 + $0x24] ss:$8 sps:$4 sm:$0xff]   ;;  %v5958_v56 = vld [vmem:[%s6444_s12 + $0x70] sm:$0xff]  }
 0x1ec   : > { %1627 = vperm.xlu0 %5718, %v1464_v5   ;;  %1624 = vperm.xlu1 %5719, %v1463_v8   ;;  %v1470_v5 = vunpack.c.h.b16 %v6812_v31  ;;  %v1476_v8 = vunpack.c.h.b16 %v977_v18  ;;  %v5956_v18 = vld [vmem:[%s6444_s12 + $0x68] sm:$0xff]  }
 0x1ed   : > { %v978_v47 = vpack.c.bf16 %v946_v40, %v945_v3  ;;  %v5962_v3 = vld [vmem:[%s6444_s12 + $0xa0] sm:$0xff]  }
 0x1ef   : > { %v1478_v2 = vunpack.c.h.b16 %v978_v47 }
 0x1f0   : > { %1525 = vperm.xlu0 %5718, %v1430_v29   ;;  %1501 = vperm.xlu1 %5719, %v1422_v49   ;;  %v5757_v29 = vld [vmem:[#allocation5 + $0x10] ss:$8 sps:$4 sm:$0xff]   ;;  %v1477_v49 = vunpack.c.l.b16 %v978_v47 }
 0x1f1   : > { %2060 = vmatpush1.bf16.msra.mxu0 %v5757_v29  ;;  %v5963_v47 = vld [vmem:[%s6444_s12 + $0x90] sm:$0xff]  }
 0x1f2   : > { %2061 = vmatprep.subr.bf16.mxu0 %v5758_v50  ;;  %v5966_v50 = vld [vmem:[%s6444_s12 + $0xb0] sm:$0xff]  }
 0x1f4   : > { %1567 = vperm.xlu0 %5718, %v1444_v46   ;;  %1546 = vperm.xlu1 %5719, %v1437_v21   ;;  %v5761_v46 = vld [vmem:[#allocation5 + $0x34] ss:$8 sps:$4 sm:$0xff]   ;;  %v5763_v21 = vld [vmem:[#allocation5 + $0x30] ss:$8 sps:$4 sm:$0xff]  }
 0x1f5   : > { %2062 = vmatpush1.bf16.msra.mxu0 %v5760_v58 }
 0x1f6   : > { %2063 = vmatprep.subr.bf16.mxu0 %v5761_v46 }
 0x1f8   : > { %1609 = vperm.xlu0 %5718, %v1458_v59   ;;  %1588 = vperm.xlu1 %5719, %v1451_v52   ;;  %v6881_v59 = vld [vmem:[#allocation7] sm:$0xff]  }
 0x1f9   : > { %8643 = vst [vmem:[#allocation17_spill] sm:$0xff] %v6881_v59  ;;  %2064 = vmatpush1.bf16.msra.mxu0 %v5763_v21  ;;  %5623 = vmatprep.subr.bf16.mxu1 %v6881_v59  ;;  %v5967_v21 = vld [vmem:[%s6444_s12 + $0xc0] sm:$0xff]  }
 0x1fa   : > { %5377 = vmatprep.subr.bf16.mxu0 %v6881_v59  ;;  %5627 = vmatpush3.bf16.msra.mxu1 %v6881_v59 }
 0x1fb   : > { %5624 = vmatprep.subr.bf16.mxu1 %v6890_v14 }
 0x1fc   : > { %1648 = vperm.xlu0 %5718, %v1471_v60   ;;  %1630 = vperm.xlu1 %5719, %v1465_v61   ;;  %v6898_v60 = vld [vmem:[#allocation7 + $0x10] sm:$0xff]  }
 0x1fd   : > { %8645 = vst [vmem:[#allocation19_spill] sm:$0xff] %v6898_v60 }
 0x1fe   : > { %5628 = vmatpush3.bf16.msra.mxu1 %v6890_v14 }
 0x1ff   : > { %5625 = vmatprep.subr.bf16.mxu1 %v6898_v60 }
 0x200   : > { %1549 = vperm.xlu0 %5718, %v1438_v35   ;;  %1651 = vperm.xlu1 %5719, %v1472_v28  }
 0x202   : > { %5629 = vmatpush3.bf16.msra.mxu1 %v6898_v60 }
 0x203   : > { %5626 = vmatprep.subr.bf16.mxu1 %v6906_v45 }
 0x204   : > { %1591 = vperm.xlu0 %5718, %v1452_v39   ;;  %1570 = vperm.xlu1 %5719, %v1445_v6   ;;  %v5944_v6 = vld [vmem:[%s6444_s12 + $0x20] sm:$0xff]  }
 0x206   : > { %5630 = vmatpush3.bf16.msra.mxu1 %v6906_v45 }
 0x208   : > { %1633 = vperm.xlu0 %5718, %v1466_v62   ;;  %1612 = vperm.xlu1 %5719, %v1459_v0  }
 0x20c   : > { %1573 = vperm.xlu0 %5718, %v1446_v1   ;;  %1654 = vperm.xlu1 %5719, %v1473_v38   ;;  %v5947_v1 = vld [vmem:[%s6444_s12 + $0x30] sm:$0xff]   ;;  %v5948_v38 = vld [vmem:[%s6444_s12 + $0x8] sm:$0xff]  }
 0x210   : > { %1615 = vperm.xlu0 %5718, %v1460_v22   ;;  %1594 = vperm.xlu1 %5719, %v1453_v51   ;;  %v5949_v22 = vld [vmem:[%s6444_s12 + $0x38] sm:$0xff]   ;;  %v5950_v51 = vld [vmem:[%s6444_s12 + $0x10] sm:$0xff]  }
 0x214   : > { %1657 = vperm.xlu0 %5718, %v1474_v27   ;;  %1636 = vperm.xlu1 %5719, %v1467_v4   ;;  %v5953_v4 = vld [vmem:[%s6444_s12 + $0x48] sm:$0xff]  }
 0x218   : > { %1618 = vperm.xlu0 %5718, %v1461_v55   ;;  %1597 = vperm.xlu1 %5719, %v1454_v54   ;;  %v5955_v54 = vld [vmem:[%s6444_s12 + $0x50] sm:$0xff]  }
 0x21c   : > { %1660 = vperm.xlu0 %5718, %v1475_v19   ;;  %1639 = vperm.xlu1 %5719, %v1468_v20  }
 0x220   : > { %1642 = vperm.xlu0 %5718, %v1469_v43   ;;  %1621 = vperm.xlu1 %5719, %v1462_v57   ;;  %v5959_v43 = vld [vmem:[%s6444_s12 + $0x80] sm:$0xff]   ;;  %v5960_v57 = vld [vmem:[%s6444_s12 + $0x78] sm:$0xff]  }
 0x224   : > { %1645 = vperm.xlu0 %5718, %v1470_v5   ;;  %1663 = vperm.xlu1 %5719, %v1476_v8  }
 0x228   : > { %1669 = vperm.xlu0 %5718, %v1478_v2   ;;  %1666 = vperm.xlu1 %5719, %v1477_v49   ;;  %v5965_v49 = vld [vmem:[%s6444_s12 + $0x98] sm:$0xff]  }
 0x22b   : > { %v6877_v42 = vpop.permute.xlu1 %1483  ;;  %v6879_v31 = vpop.permute.xlu0 %1480 }
 0x22f   : > { %v6883_v52 = vpop.permute.xlu1 %1504  ;;  %v6885_v37 = vpop.permute.xlu0 %1507 }
 0x233   : > { %v6892_v15 = vpop.permute.xlu1 %1486  ;;  %v6894_v53 = vpop.permute.xlu0 %1510 }
 0x237   : > { %v6900_v61 = vpop.permute.xlu1 %1528  ;;  %v6902_v32 = vpop.permute.xlu0 %1531 }
 0x23b   : > { %v6908_v35 = vpop.permute.xlu1 %1489  ;;  %v6910_v28 = vpop.permute.xlu0 %1513 }
 0x23f   : > { %v6914_v9 = vpop.permute.xlu1 %1534  ;;  %v6916_v39 = vpop.permute.xlu0 %1552 }
 0x243   : > { %v6919_v62 = vpop.permute.xlu1 %1555  ;;  %v6921_v0 = vpop.permute.xlu0 %1492 }
 0x246   : > { %1187 = vxpose.xlu0.c.b16.start [1/4] (short) (narrow) %v5944_v6, 64  ;;  %v5968_v6 = vld [vmem:[%s6444_s12 + $0xb8] sm:$0xff]  }
 0x247   : > { %v6925_v63 = vpop.permute.xlu1 %1516  ;;  %v6927_v34 = vpop.permute.xlu0 %1537 }
 0x24a   : > { %1188 = vxpose.xlu0.c.b16.cont [2/4] (short) (narrow) %v5945_v7, 64 }
 0x24b   : > { %v6931_v11 = vpop.permute.xlu1 %1558  ;;  %v6933_v44 = vpop.permute.xlu0 %1576  ;;  %1171 = vxpose.xlu1.c.b16.start [1/4] (short) (narrow) %v5946_v10, 64 }
 0x24e   : > { %1189 = vxpose.xlu0.c.b16.cont [3/4] (short) (narrow) %v5947_v1, 64  ;;  %v5969_v1 = vld [vmem:[%s6444_s12 + $0xc8] sm:$0xff]  }
 0x24f   : > { %v6937_v23 = vpop.permute.xlu1 %1579  ;;  %v6939_v48 = vpop.permute.xlu0 %1495  ;;  %1172 = vxpose.xlu1.c.b16.cont [2/4] (short) (narrow) %v5948_v38, 64  ;;  %v5970_v38 = vld [vmem:[%s6444_s12 + $0xe0] sm:$0xff]  }
 0x252   : > { %1190 = vxpose.xlu0.c.b16.end [4/4] (short) (narrow) %v5949_v22, 64 }
 0x253   : > { %v6943_v36 = vpop.permute.xlu1 %1519  ;;  %v6945_v27 = vpop.permute.xlu0 %1540  ;;  %1173 = vxpose.xlu1.c.b16.cont [3/4] (short) (narrow) %v5950_v51, 64 }
 0x256   : > { %1203 = vxpose.xlu0.c.b16.start [1/4] (short) (narrow) %v5951_v26, 64  ;;  %v1373_v26 = vlaneseq }
 0x257   : > { %v6949_v13 = vpop.permute.xlu1 %1561  ;;  %v6951_v55 = vpop.permute.xlu0 %1582  ;;  %1174 = vxpose.xlu1.c.b16.end [4/4] (short) (narrow) %v5952_v41, 64  ;;  %v5971_v41 = vld [vmem:[%s6444_s12 + $0xd0] sm:$0xff]  }
 0x25a   : > { %1204 = vxpose.xlu0.c.b16.cont [2/4] (short) (narrow) %v5953_v4, 64  ;;  %v5972_v4 = vld [vmem:[%s6444_s12 + $0xe8] sm:$0xff]  }
 0x25b   : > { %v6955_v19 = vpop.permute.xlu1 %1600  ;;  %v6957_v20 = vpop.permute.xlu0 %1603  ;;  %1219 = vxpose.xlu1.c.b16.start [1/4] (short) (narrow) %v5954_v25, 64 }
 0x25e   : > { %1205 = vxpose.xlu0.c.b16.cont [3/4] (short) (narrow) %v5955_v54, 64 }
 0x25f   : > { %v6961_v12 = vpop.permute.xlu1 %1498  ;;  %v6963_v30 = vpop.permute.xlu0 %1522  ;;  %1220 = vxpose.xlu1.c.b16.cont [2/4] (short) (narrow) %v5956_v18, 64  ;;  %v1672_v18 = vand.u32 127, %v1373_v26 }
 0x261   : > { %v1712_v14 = vadd.s32 4294967248, %v1672_v18  ;;  %v1719_v59 = vadd.s32 4294967240, %v1672_v18 }
 0x262   : > { %1206 = vxpose.xlu0.c.b16.end [4/4] (short) (narrow) %v5957_v24, 64  ;;  %v5973_v24 = vld [vmem:[%s6444_s12 + $0xd8] sm:$0xff]  }
 0x263   : > { %v6967_v40 = vpop.permute.xlu1 %1543  ;;  %v6969_v16 = vpop.permute.xlu0 %1564  ;;  %1221 = vxpose.xlu1.c.b16.cont [3/4] (short) (narrow) %v5958_v56, 64  ;;  %v5974_v56 = vld [vmem:[%s6444_s12 + $0xf0] sm:$0xff]  }
 0x266   : > { %1235 = vxpose.xlu0.c.b16.start [1/4] (short) (narrow) %v5959_v43, 64 }
 0x267   : > { %v6973_v5 = vpop.permute.xlu1 %1585  ;;  %v6975_v8 = vpop.permute.xlu0 %1606  ;;  %1222 = vxpose.xlu1.c.b16.end [4/4] (short) (narrow) %v5960_v57, 64 }
 0x26a   : > { %1236 = vxpose.xlu0.c.b16.cont [2/4] (short) (narrow) %v5961_v17, 64  ;;  %v7013_v17 = vshrl.u32 %v1373_v26, 7 }
 0x26b   : > { %v6979_v29 = vpop.permute.xlu1 %1624  ;;  %v6981_v2 = vpop.permute.xlu0 %1627  ;;  %1251 = vxpose.xlu1.c.b16.start [1/4] (short) (narrow) %v5962_v3, 64  ;;  %v1677_v3 = vadd.s32 4294967288, %v1672_v18 }
 0x26c   : > { %8647 = vst [vmem:[#allocation21_spill] sm:$0xff] %v7013_v17 }
 0x26e   : > { %1237 = vxpose.xlu0.c.b16.cont [3/4] (short) (narrow) %v5963_v47, 64  ;;  %v1684_v47 = vadd.s32 4294967280, %v1672_v18 }
 0x26f   : > { %v6985_v58 = vpop.permute.xlu1 %1501  ;;  %v6987_v46 = vpop.permute.xlu0 %1525  ;;  %1252 = vxpose.xlu1.c.b16.cont [2/4] (short) (narrow) %v5964_v33, 64  ;;  %v5975_v33 = vld [vmem:[%s6444_s12 + $0xf8] sm:$0xff]  }
 0x272   : > { %1238 = vxpose.xlu0.c.b16.end [4/4] (short) (narrow) %v5965_v49, 64  ;;  %v1691_v49 = vadd.s32 4294967272, %v1672_v18 }
 0x273   : > { %v6991_v7 = vpop.permute.xlu1 %1546  ;;  %v6993_v10 = vpop.permute.xlu0 %1567  ;;  %1253 = vxpose.xlu1.c.b16.cont [3/4] (short) (narrow) %v5966_v50, 64 }
 0x274   : > { %v7030_v26 = vsub.s32 %v1691_v49, %v7013_v17 }
 0x276   : > { %1267 = vxpose.xlu0.c.b16.start [1/4] (short) (narrow) %v5967_v21, 64 }
 0x277   : > { %v6997_v22 = vpop.permute.xlu1 %1588  ;;  %v6999_v51 = vpop.permute.xlu0 %1609  ;;  %1254 = vxpose.xlu1.c.b16.end [4/4] (short) (narrow) %v5968_v6, 64  ;;  %v7021_v6 = vsub.s32 %v1677_v3, %v7013_v17 }
 0x279   : > { %v1681_v3 = vrot.slane %v6877_v42, %v7021_v6  ;;  %v1733_v49 = vrot.slane %v6885_v37, %v7021_v6  ;;  %v1743_v37 = vrot.slane %v6910_v28, %v7030_v26  ;;  %v1811_v28 = vrot.slane %v6919_v62, %v7021_v6 }
 0x27a   : > { %1268 = vxpose.xlu0.c.b16.cont [2/4] (short) (narrow) %v5969_v1, 64  ;;  %v7024_v1 = vsub.s32 %v1672_v18, %v7013_v17 }
 0x27b   : > { %v7003_v25 = vpop.permute.xlu1 %1630  ;;  %v7005_v54 = vpop.permute.xlu0 %1648  ;;  %1283 = vxpose.xlu1.c.b16.start [1/4] (short) (narrow) %v5970_v38, 64  ;;  %v7027_v38 = vsub.s32 %v1684_v47, %v7013_v17 }
 0x27c   : > { %v1676_v47 = vrot.slane %v6879_v31, %v7024_v1  ;;  %v1729_v45 = vrot.slane %v6883_v52, %v7024_v1  ;;  %v1768_v42 = vrot.slane %v6900_v61, %v7024_v1  ;;  %v1772_v31 = vrot.slane %v6902_v32, %v7021_v6 }
 0x27d   : > { %v1738_v60 = vrot.slane %v6894_v53, %v7027_v38  ;;  %v1695_v52 = vrot.slane %v6908_v35, %v7030_v26  ;;  %v1777_v53 = vrot.slane %v6914_v9, %v7027_v38  ;;  %v7075_v9 = vsub.s32 %v1712_v14, %v7013_v17 }
 0x27e   : > { %1269 = vxpose.xlu0.c.b16.cont [3/4] (short) (narrow) %v5971_v41, 64  ;;  %v1683_v32 = vsel %vm1682_vm1, %v1681_v3, %v1676_v47  ;;  %v1734_v35 = vsel %vm1682_vm1, %v1733_v49, %v1729_v45  ;;  %v1807_v62 = vrot.slane %v6916_v39, %v7024_v1  ;;  %v1816_v39 = vrot.slane %v6931_v11, %v7027_v38 }
 0x27f   : > { %v7009_v43 = vpop.permute.xlu1 %1651  ;;  %v7011_v57 = vpop.permute.xlu0 %1549  ;;  %1284 = vxpose.xlu1.c.b16.cont [2/4] (short) (narrow) %v5972_v4, 64  ;;  %v1855_v11 = vrot.slane %v6951_v55, %v7027_v38 }
 0x282   : > { %1270 = vxpose.xlu0.c.b16.end [4/4] (short) (narrow) %v5973_v24, 64  ;;  %v1698_v24 = vadd.s32 4294967264, %v1672_v18 }
 0x283   : > { %v7016_v50 = vpop.permute.xlu1 %1570  ;;  %v7018_v21 = vpop.permute.xlu0 %1591  ;;  %1285 = vxpose.xlu1.c.b16.cont [3/4] (short) (narrow) %v5974_v56, 64  ;;  %v1705_v56 = vadd.s32 4294967256, %v1672_v18 }
 0x284   : > { %v7063_v18 = vsub.s32 %v1698_v24, %v7013_v17  ;;  %v7078_v24 = vsub.s32 %v1719_v59, %v7013_v17 }
 0x285   : > { %v7066_v61 = vsub.s32 %v1705_v56, %v7013_v17  ;;  %v1773_v56 = vsel %vm1682_vm1, %v1772_v31, %v1768_v42  ;;  %v1850_v42 = vrot.slane %v6937_v23, %v7021_v6  ;;  %v1885_v23 = vrot.slane %v6955_v19, %v7024_v1 }
 0x286   : > { %v1778_v14 = vsel %vm1689_vm2, %v1777_v53, %v1773_v56  ;;  %v1702_v59 = vrot.slane %v6921_v0, %v7063_v18  ;;  %v1846_v0 = vrot.slane %v6933_v44, %v7024_v1  ;;  %v1716_v44 = vrot.slane %v6961_v12, %v7075_v9 }
 0x287   : > { %v7032_v41 = vpop.permute.xlu1 %1612  ;;  %v7034_v4 = vpop.permute.xlu0 %1633  ;;  %1286 = vxpose.xlu1.c.b16.end [4/4] (short) (narrow) %v5975_v33, 64  ;;  %v1688_v33 = vrot.slane %v6892_v15, %v7027_v38  ;;  %v1709_v31 = vrot.slane %v6939_v48, %v7066_v61  ;;  %v1889_v48 = vrot.slane %v6957_v20, %v7021_v6  ;;  %v1758_v19 = vrot.slane %v6963_v30, %v7075_v9 }
 0x288   : > { %8648 = vst [vmem:[#allocation22_spill] sm:$0xff] %v7034_v4  ;;  %v1851_v20 = vsel %vm1682_vm1, %v1850_v42, %v1846_v0  ;;  %v1792_v53 = vrot.slane %v6967_v40, %v7066_v61  ;;  %v1723_v56 = vrot.slane %v6985_v58, %v7078_v24  ;;  %v1860_v58 = vrot.slane %v6973_v5, %v7030_v26 }
 0x289   : > { %v1856_v30 = vsel %vm1689_vm2, %v1855_v11, %v1851_v20  ;;  %v1802_v42 = vrot.slane %v7011_v57, %v7078_v24  ;;  %v1831_v5 = vrot.slane %v6993_v10, %v7066_v61  ;;  %v1967_v57 = vrot.slane %v7009_v43, %v7021_v6 }
 0x28a   : > { %v1861_v10 = vsel %vm1696_vm3, %v1860_v58, %v1856_v30  ;;  %v1870_v43 = vrot.slane %v7018_v21, %v7066_v61 }
 0x28b   : > { %v7056_v4 = vpop.permute.xlu1 %1654  ;;  %v7058_v15 = vpop.permute.xlu0 %1573 }
 0x28c   : > { %8649 = vst [vmem:[#allocation23_spill] sm:$0xff] %v7056_v4  ;;  %8650 = vst [vmem:[#allocation24_spill] sm:$0xff] %v7058_v15  ;;  %v1690_v4 = vsel %vm1689_vm2, %v1688_v33, %v1683_v32  ;;  %v1739_v15 = vsel %vm1689_vm2, %v1738_v60, %v1734_v35  ;;  %v1748_v60 = vrot.slane %v6925_v63, %v7063_v18 }
 0x28d   : > { %v1697_v3 = vsel %vm1696_vm3, %v1695_v52, %v1690_v4  ;;  %v1744_v45 = vsel %vm1696_vm3, %v1743_v37, %v1739_v15  ;;  %v1782_v4 = vrot.slane %v6927_v34, %v7030_v26  ;;  %v1812_v33 = vsel %vm1682_vm1, %v1811_v28, %v1807_v62 }
 0x28e   : > { %v1753_v63 = vrot.slane %v6943_v36, %v7066_v61  ;;  %v1787_v34 = vrot.slane %v6945_v27, %v7063_v18  ;;  %v1821_v52 = vrot.slane %v6949_v13, %v7030_v26  ;;  %v1704_v27 = vsel %vm1703_vm4, %v1702_v59, %v1697_v3 }
 0x28f   : > { %v7085_v47 = vpop.permute.xlu1 %1594  ;;  %v7087_v49 = vpop.permute.xlu0 %1615  ;;  %v1749_v13 = vsel %vm1703_vm4, %v1748_v60, %v1744_v45  ;;  %v1783_v55 = vsel %vm1696_vm3, %v1782_v4, %v1778_v14  ;;  %v1817_v15 = vsel %vm1689_vm2, %v1816_v39, %v1812_v33  ;;  %v1711_v12 = vsel %vm1710_vm5, %v1709_v31, %v1704_v27 }
 0x290   : > { %v1754_v32 = vsel %vm1710_vm5, %v1753_v63, %v1749_v13  ;;  %v1788_v35 = vsel %vm1703_vm4, %v1787_v34, %v1783_v55  ;;  %v1822_v28 = vsel %vm1696_vm3, %v1821_v52, %v1817_v15  ;;  %v1890_v3 = vsel %vm1682_vm1, %v1889_v48, %v1885_v23  ;;  %v8651_v15 = vld [vmem:[#allocation22_spill] sm:$0xff] }
 0x291   : > { %v1718_v45 = vsel %vm1717_vm6, %v1716_v44, %v1711_v12  ;;  %v1763_v62 = vrot.slane %v6987_v46, %v7078_v24  ;;  %v1759_v59 = vsel %vm1717_vm6, %v1758_v19, %v1754_v32  ;;  %v1826_v60 = vrot.slane %v6969_v16, %v7063_v18 }
 0x292   : > { %v1797_v4 = vrot.slane %v6991_v7, %v7075_v9  ;;  %v1793_v33 = vsel %vm1710_vm5, %v1792_v53, %v1788_v35  ;;  %v1894_v46 = vrot.slane %v6975_v8, %v7027_v38  ;;  %v1924_v39 = vrot.slane %v6979_v29, %v7024_v1 }
 0x293   : > { %v7119_v36 = vpop.permute.xlu1 %1636  ;;  %v7121_v37 = vpop.permute.xlu0 %1657  ;;  %v1928_v16 = vrot.slane %v6981_v2, %v7021_v6  ;;  %v1725_v31 = vsel %vm1724_vm7, %v1723_v56, %v1718_v45  ;;  %v1865_v7 = vrot.slane %v6997_v22, %v7063_v18  ;;  %v1764_v0 = vsel %vm1724_vm7, %v1763_v62, %v1759_v59  ;;  %v8652_v12 = vld [vmem:[#allocation24_spill] sm:$0xff]  ;;  %v8653_v56 = vld [vmem:[#allocation23_spill] sm:$0xff] }
 0x294   : > { %v1899_v8 = vrot.slane %v6999_v51, %v7030_v26  ;;  %v1933_v29 = vrot.slane %v7003_v25, %v7027_v38  ;;  %v1827_v34 = vsel %vm1703_vm4, %v1826_v60, %v1822_v28  ;;  %v1798_v52 = vsel %vm1717_vm6, %v1797_v4, %v1793_v33 }
 0x295   : > { %v1836_v22 = vrot.slane %v7016_v50, %v7075_v9  ;;  %v1895_v51 = vsel %vm1689_vm2, %v1894_v46, %v1890_v3  ;;  %v1963_v25 = vrot.slane %v7005_v54, %v7024_v1  ;;  %v1803_v11 = vsel %vm1724_vm7, %v1802_v42, %v1798_v52 }
 0x296   : > { %v1929_v6 = vsel %vm1682_vm1, %v1928_v16, %v1924_v39  ;;  %v2000_v23 = vsel %vm1999_vm8, %v1764_v0, %v1725_v31  ;;  %v1832_v48 = vsel %vm1710_vm5, %v1831_v5, %v1827_v34  ;;  %v1866_v44 = vsel %vm1703_vm4, %v1865_v7, %v1861_v10 }
 0x297   : > { %v7143_v40 = vpop.permute.xlu1 %1597  ;;  %v7145_v14 = vpop.permute.xlu0 %1618  ;;  %v1900_v50 = vsel %vm1696_vm3, %v1899_v8, %v1895_v51  ;;  %v1934_v27 = vsel %vm1689_vm2, %v1933_v29, %v1929_v6  ;;  %v1968_v54 = vsel %vm1682_vm1, %v1967_v57, %v1963_v25  ;;  %v1904_v1 = vrot.slane %v7032_v41, %v7063_v18 }
 0x298   : > { %v2002_v55 = vsel %vm2001_vm9, %v1803_v11, %v2000_v23  ;;  %v1837_v19 = vsel %vm1717_vm6, %v1836_v22, %v1832_v48  ;;  %v1938_v20 = vrot.slane %v8651_v15, %v7030_v26  ;;  %v1841_v53 = vrot.slane %v8652_v12, %v7078_v24  ;;  %v8655_v48 = vld [vmem:[#allocation18_spill] sm:$0xff] }
 0x299   : > { %v1871_v32 = vsel %vm1710_vm5, %v1870_v43, %v1866_v44  ;;  %v1875_v35 = vrot.slane %v7085_v47, %v7075_v9  ;;  %v1909_v41 = vrot.slane %v7087_v49, %v7066_v61  ;;  %v1943_v28 = vrot.slane %v7119_v36, %v7063_v18 }
 0x29a   : > { %v1972_v30 = vrot.slane %v8653_v56, %v7027_v38  ;;  %v1880_v3 = vrot.slane %v7143_v40, %v7078_v24  ;;  %v1914_v45 = vrot.slane %v7145_v14, %v7075_v9  ;;  %v1905_v59 = vsel %vm1703_vm4, %v1904_v1, %v1900_v50 }
 0x29b   : > { %v1640_v2 = vpop.permute.xlu1 %1639  ;;  %v1661_v63 = vpop.permute.xlu0 %1660  ;;  %v1977_v47 = vrot.slane %v7121_v37, %v7030_v26  ;;  %v1939_v38 = vsel %vm1696_vm3, %v1938_v20, %v1934_v27  ;;  %v1842_v40 = vsel %vm1724_vm7, %v1841_v53, %v1837_v19  ;;  %v1876_v33 = vsel %vm1717_vm6, %v1875_v35, %v1871_v32  ;;  %v8657_v19 = vld [vmem:[#allocation20_spill] sm:$0xff]  ;;  %v7277_v35 = vld [vmem:[%s8547_s2 + $0x18] sm:$0xff]  }
 0x29c   : > { %v1948_v62 = vrot.slane %v1640_v2, %v7066_v61  ;;  %v1982_v4 = vrot.slane %v1661_v63, %v7063_v18  ;;  %v1910_v46 = vsel %vm1710_vm5, %v1909_v41, %v1905_v59  ;;  %v1944_v26 = vsel %vm1703_vm4, %v1943_v28, %v1939_v38 }
 0x29d   : > { %v1973_v39 = vsel %vm1689_vm2, %v1972_v30, %v1968_v54  ;;  %v1881_v42 = vsel %vm1724_vm7, %v1880_v3, %v1876_v33  ;;  %v1915_v16 = vsel %vm1717_vm6, %v1914_v45, %v1910_v46  ;;  %v2004_v18 = vsel %vm2003_vm10, %v1842_v40, %v2002_v55  ;;  %v8656_v54 = vld [vmem:[#allocation19_spill] sm:$0xff] }
 0x29e   : > { %v1949_v31 = vsel %vm1710_vm5, %v1948_v62, %v1944_v26  ;;  %v1978_v5 = vsel %vm1696_vm3, %v1977_v47, %v1973_v39  ;;  %v2006_v34 = vsel %vm2005_vm11, %v1881_v42, %v2004_v18  ;;  %vm3180_vm1 = vcmask 64512  }
 0x29f   : > { %v1622_v21 = vpop.permute.xlu1 %1621  ;;  %v1643_v13 = vpop.permute.xlu0 %1642  ;;  %vm3944_vm2 = vcmask 1043456  }
 0x2a0   : > { %v1919_v49 = vrot.slane %v1622_v21, %v7078_v24  ;;  %v1953_v36 = vrot.slane %v1643_v13, %v7075_v9  ;;  %v7262_v21 = vld [vmem:[%s8547_s2 + $0x8] sm:$0xff]   ;;  %v7267_v13 = vld [vmem:[%s8547_s2 + $0x10] sm:$0xff]  }
 0x2a2   : > { %v1920_v7 = vsel %vm1724_vm7, %v1919_v49, %v1915_v16  ;;  %v1954_v0 = vsel %vm1717_vm6, %v1953_v36, %v1949_v31 }
 0x2a3   : > { %v1664_v60 = vpop.permute.xlu1 %1663  ;;  %v1646_v58 = vpop.permute.xlu0 %1645  ;;  %v2008_v52 = vsel %vm2007_vm12, %v1920_v7, %v2006_v34 }
 0x2a4   : > { %v1958_v14 = vrot.slane %v1646_v58, %v7078_v24  ;;  %v1987_v37 = vrot.slane %v1664_v60, %v7066_v61  ;;  %v1983_v61 = vsel %vm1703_vm4, %v1982_v4, %v1978_v5 }
 0x2a6   : > { %v1959_v57 = vsel %vm1724_vm7, %v1958_v14, %v1954_v0  ;;  %v1988_v10 = vsel %vm1710_vm5, %v1987_v37, %v1983_v61 }
 0x2a7   : > { %v1667_v8 = vpop.permute.xlu1 %1666  ;;  %v1670_v29 = vpop.permute.xlu0 %1669  ;;  %v2010_v51 = vsel %vm2009_vm13, %v1959_v57, %v2008_v52 }
 0x2a8   : > { %v1992_v2 = vrot.slane %v1667_v8, %v7075_v9  ;;  %v1997_v63 = vrot.slane %v1670_v29, %v7078_v24  ;;  %v7250_v9 = vld [vmem:[%s8547_s2] sm:$0xff]   ;;  %v8654_v24 = vld [vmem:[#allocation17_spill] sm:$0xff] }
 0x2aa   : > { %v1993_v22 = vsel %vm1717_vm6, %v1992_v2, %v1988_v10 }
 0x2ab   : > { %v1998_v25 = vsel %vm1724_vm7, %v1997_v63, %v1993_v22 }
 0x2ac   : > { %v2012_v11 = vsel %vm2011_vm14, %v1998_v25, %v2010_v51  ;;  %v1195_v43 = vpop.trf.xlu0 }
 0x2ad   : > { %v2013_v6 = vpack.c.b16 %v2012_v11, %v2012_v11  ;;  %v1335_v30 = vadd.bf16 %v7250_v9, %v1195_v43 }
 0x2af   : > { %5133 = vmatmul.mubr.msk.bf16.vlgmr.msra.gmra.mrb[0].mxu0 %vm580_vm0, %v2013_v6 }
 0x2b0   : > { %5378 = vmatpush3.bf16.msra.mxu0 %v8654_v24  ;;  %v1196_v23 = vpop.trf.xlu0 }
 0x2b1   : > { %5379 = vmatprep.subr.bf16.mxu0 %v8655_v48  ;;  %v1179_v44 = vpop.trf.xlu1  ;;  %v1336_v36 = vadd.bf16 %v7262_v21, %v1196_v23 }
 0x2b2   : > { %v1331_v50 = vadd.bf16 %v7250_v9, %v1179_v44 }
 0x2b4   : > { %5380 = vmatpush3.bf16.msra.mxu0 %v8655_v48  ;;  %v1197_v27 = vpop.trf.xlu0  ;;  %5385 = vmatprep.mubr.msk.bf16.mxu0 %vm580_vm0, %v1331_v50 }
 0x2b5   : > { %5381 = vmatprep.subr.bf16.mxu0 %v8656_v54  ;;  %v1180_v1 = vpop.trf.xlu1  ;;  %v1337_v60 = vadd.bf16 %v7267_v13, %v1197_v27 }
 0x2b6   : > { %v1332_v20 = vadd.bf16 %v7262_v21, %v1180_v1  ;;  %v5773_v1 = vld [vmem:[%s8554_s9 + $0x8] sm:$0xff]  }
 0x2b8   : > { %5382 = vmatpush3.bf16.msra.mxu0 %v8656_v54  ;;  %v1198_v55 = vpop.trf.xlu0  ;;  %v5772_v54 = vld [vmem:[%s8554_s9] sm:$0xff]  }
 0x2b9   : > { %5383 = vmatprep.subr.bf16.mxu0 %v8657_v19  ;;  %v1181_v15 = vpop.trf.xlu1  ;;  %v1338_v14 = vadd.bf16 %v7277_v35, %v1198_v55  ;;  %v5775_v55 = vld [vmem:[%s8554_s9 + $0x18] sm:$0xff]  }
 0x2ba   : > { %v1333_v53 = vadd.bf16 %v7267_v13, %v1181_v15  ;;  %v7357_v15 = vsub.s32 0, %v7013_v17 }
 0x2bc   : > { %5384 = vmatpush3.bf16.msra.mxu0 %v8657_v19  ;;  %v1211_v12 = vpop.trf.xlu0  ;;  %v8570_v19 = vmov 0.0  }
 0x2bd   : > { %v1182_v32 = vpop.trf.xlu1  ;;  %v1339_v33 = vadd.bf16 %v7250_v9, %v1211_v12  ;;  %5449 = vmatprep.subr.bf16.mxu0 %v5772_v54  ;;  %5521 = vmatprep.subr.bf16.mxu1 %v8570_v19 }
 0x2be   : > { %v1334_v56 = vadd.bf16 %v7277_v35, %v1182_v32 }
 0x2bf   : > { %5386 = vmatmul.mubr.msk.bf16.vlgmr.msra.gmra.mrb[4].mxu0 %vm580_vm0, %v1332_v20  ;;  %v6177_v20 = vmov 1966171168  }
 0x2c0   : > { %v1212_v41 = vpop.trf.xlu0  ;;  %5389 = vmatprep.mubr.msk.bf16.mxu0 %vm580_vm0, %v1333_v53  ;;  %5450 = vmatpush3.bf16.msra.mxu0 %v5772_v54  ;;  %v2557_v12 = vunpack.c.l.s4 %v6177_v20  ;;  %v1371_v53 = vld [vmem:[%s8549_s4] sm:$0x3] }
 0x2c1   : > { %v1227_v28 = vpop.trf.xlu1  ;;  %v1340_v42 = vadd.bf16 %v7262_v21, %v1212_v41  ;;  %5451 = vmatprep.subr.bf16.mxu0 %v5773_v1  ;;  %v1376_v32 = vrot.slane %v1371_v53, %v7357_v15 }
 0x2c2   : > { %v1343_v59 = vadd.bf16 %v7250_v9, %v1227_v28 }
 0x2c4   : > { %v1213_v3 = vpop.trf.xlu0  ;;  %5452 = vmatpush3.bf16.msra.mxu0 %v5773_v1 }
 0x2c5   : > { %v1341_v45 = vadd.bf16 %v7267_v13, %v1213_v3  ;;  %v1228_v47 = vpop.trf.xlu1 }
 0x2c6   : > { %v1344_v38 = vadd.bf16 %v7262_v21, %v1228_v47 }
 0x2c7   : > { %5390 = vmatmul.mubr.msk.bf16.gmra.mrb[8].mxu0 %vm580_vm0, %v1334_v56  ;;  %5405 = vmatprep.mubr.msk.bf16.mxu1 %vm580_vm0, %v1341_v45 }
 0x2c8   : > { %v1214_v62 = vpop.trf.xlu0  ;;  %5393 = vmatprep.mubr.msk.bf16.mxu0 %vm580_vm0, %v1335_v30 }
 0x2c9   : > { %v1342_v49 = vadd.bf16 %v7277_v35, %v1214_v62  ;;  %v1229_v58 = vpop.trf.xlu1 }
 0x2ca   : > { %v1345_v40 = vadd.bf16 %v7267_v13, %v1229_v58 }
 0x2cb   : > { %5406 = vmatmul.mubr.msk.bf16.vlgmr.msra.gmra.mrb[0].mxu1 %vm580_vm0, %v1342_v49 }
 0x2cc   : > { %5409 = vmatprep.mubr.msk.bf16.mxu1 %vm580_vm0, %v1343_v59  ;;  %v1243_v4 = vpop.trf.xlu0  ;;  %5522 = vmatpush3.bf16.msra.mxu1 %v5772_v54 }
 0x2cd   : > { %v1230_v46 = vpop.trf.xlu1  ;;  %v1347_v37 = vadd.bf16 %v7250_v9, %v1243_v4  ;;  %5523 = vmatprep.subr.bf16.mxu1 %v8570_v19 }
 0x2ce   : > { %v1346_v26 = vadd.bf16 %v7277_v35, %v1230_v46 }
 0x2cf   : > { %5394 = vmatmul.mubr.msk.bf16.gmra.mrb[12].mxu0 %vm580_vm0, %v1336_v36 }
 0x2d0   : > { %5397 = vmatprep.mubr.msk.bf16.mxu0 %vm580_vm0, %v1337_v60  ;;  %v1244_v39 = vpop.trf.xlu0  ;;  %5524 = vmatpush3.bf16.msra.mxu1 %v5773_v1  ;;  %v7388_v60 = vld [vmem:[%s8551_s6] ss:$0 sm:$0xff] }
 0x2d1   : > { %v1348_v31 = vadd.bf16 %v7262_v21, %v1244_v39  ;;  %v1259_v5 = vpop.trf.xlu1  ;;  %5525 = vmatprep.subr.bf16.mxu1 %v8570_v19 }
 0x2d2   : > { %v1351_v8 = vadd.bf16 %v7250_v9, %v1259_v5 }
 0x2d3   : > { %5410 = vmatmul.mubr.msk.bf16.gmra.mrb[4].mxu1 %vm580_vm0, %v1344_v38 }
 0x2d4   : > { %5413 = vmatprep.mubr.msk.bf16.mxu1 %vm580_vm0, %v1345_v40  ;;  %v1245_v16 = vpop.trf.xlu0 }
 0x2d5   : > { %v1349_v18 = vadd.bf16 %v7267_v13, %v1245_v16  ;;  %v1260_v29 = vpop.trf.xlu1 }
 0x2d6   : > { %v1352_v57 = vadd.bf16 %v7262_v21, %v1260_v29 }
 0x2d7   : > { %5398 = vmatmul.mubr.msk.bf16.gmra.mrb[16].mxu0 %vm580_vm0, %v1338_v14 }
 0x2d8   : > { %5401 = vmatprep.mubr.msk.bf16.mxu0 %vm580_vm0, %v1339_v33  ;;  %v1246_v7 = vpop.trf.xlu0 }
 0x2d9   : > { %v1350_v0 = vadd.bf16 %v7277_v35, %v1246_v7  ;;  %v1261_v61 = vpop.trf.xlu1 }
 0x2da   : > { %v1353_v2 = vadd.bf16 %v7267_v13, %v1261_v61 }
 0x2db   : > { %5414 = vmatmul.mubr.msk.bf16.gmra.mrb[8].mxu1 %vm580_vm0, %v1346_v26 }
 0x2dc   : > { %5417 = vmatprep.mubr.msk.bf16.mxu1 %vm580_vm0, %v1347_v37  ;;  %v1275_v63 = vpop.trf.xlu0 }
 0x2dd   : > { %v1262_v34 = vpop.trf.xlu1  ;;  %v1355_v52 = vadd.bf16 %v7250_v9, %v1275_v63 }
 0x2de   : > { %v1354_v10 = vadd.bf16 %v7277_v35, %v1262_v34 }
 0x2df   : > { %5402 = vmatmul.mubr.msk.bf16.gmra.mrb[20].mxu0 %vm580_vm0, %v1340_v42 }
 0x2e0   : > { %v1276_v22 = vpop.trf.xlu0 }
 0x2e1   : > { %v1356_v25 = vadd.bf16 %v7262_v21, %v1276_v22  ;;  %v1291_v43 = vpop.trf.xlu1 }
 0x2e2   : > { %v1359_v23 = vadd.bf16 %v7250_v9, %v1291_v43 }
 0x2e3   : > { %5418 = vmatmul.mubr.msk.bf16.gmra.mrb[12].mxu1 %vm580_vm0, %v1348_v31 }
 0x2e4   : > { %5421 = vmatprep.mubr.msk.bf16.mxu1 %vm580_vm0, %v1349_v18  ;;  %v1277_v51 = vpop.trf.xlu0 }
 0x2e5   : > { %v1357_v11 = vadd.bf16 %v7267_v13, %v1277_v51  ;;  %v1292_v48 = vpop.trf.xlu1 }
 0x2e6   : > { %v1360_v50 = vadd.bf16 %v7262_v21, %v1292_v48 }
 0x2e8   : > { %v1278_v6 = vpop.trf.xlu0 }
 0x2e9   : > { %v1358_v24 = vadd.bf16 %v7277_v35, %v1278_v6  ;;  %v1293_v44 = vpop.trf.xlu1 }
 0x2ea   : > { %v1361_v27 = vadd.bf16 %v7267_v13, %v1293_v44  ;;  %v5774_v13 = vld [vmem:[%s8554_s9 + $0x10] sm:$0xff]  }
 0x2eb   : > { %5422 = vmatmul.mubr.msk.bf16.gmra.mrb[16].mxu1 %vm580_vm0, %v1350_v0  ;;  %5453 = vmatprep.subr.bf16.mxu0 %v5774_v13 }
 0x2ec   : > { %5425 = vmatprep.mubr.msk.bf16.mxu1 %vm580_vm0, %v1351_v8  ;;  %5454 = vmatpush3.bf16.msra.mxu0 %v5774_v13 }
 0x2ed   : > { %v1294_v9 = vpop.trf.xlu1  ;;  %5455 = vmatprep.subr.bf16.mxu0 %v5775_v55  ;;  %5526 = vmatpush3.bf16.msra.mxu1 %v5774_v13 }
 0x2ee   : > { %v1362_v21 = vadd.bf16 %v7277_v35, %v1294_v9  ;;  %5527 = vmatprep.subr.bf16.mxu1 %v8570_v19  ;;  %v2558_v35 = vunpack.c.0.s8 %v2557_v12 }
 0x2f0   : > { %5456 = vmatpush3.bf16.msra.mxu0 %v5775_v55  ;;  %v7366_v56 = vsub.s32 %v2558_v35, %v7013_v17 }
 0x2f1   : > { %5599 = vmatprep.subr.bf16.mxu0 %v8570_v19  ;;  %5528 = vmatpush3.bf16.msra.mxu1 %v5775_v55 }
 0x2f3   : > { %5426 = vmatmul.mubr.msk.bf16.gmra.mrb[20].mxu1 %vm580_vm0, %v1352_v57 }
 0x2f4   : > { %5429 = vmatprep.mubr.msk.bf16.mxu1 %vm580_vm0, %v1353_v2 }
 0x2fb   : > { %5430 = vmatmul.mubr.msk.bf16.gmra.mrb[24].mxu1 %vm580_vm0, %v1354_v10 }
 0x2fc   : > { %5433 = vmatprep.mubr.msk.bf16.mxu1 %vm580_vm0, %v1355_v52 }
 0x303   : > { %5434 = vmatmul.mubr.msk.bf16.gmra.mrb[28].mxu1 %vm580_vm0, %v1356_v25 }
 0x304   : > { %5437 = vmatprep.mubr.msk.bf16.mxu1 %vm580_vm0, %v1357_v11 }
 0x30b   : > { %5438 = vmatmul.mubr.msk.bf16.gmra.mrb[32].mxu1 %vm580_vm0, %v1358_v24 }
 0x30c   : > { %5441 = vmatprep.mubr.msk.bf16.mxu1 %vm580_vm0, %v1359_v23 }
 0x313   : > { %5442 = vmatmul.mubr.msk.bf16.gmra.mrb[36].mxu1 %vm580_vm0, %v1360_v50 }
 0x314   : > { %5445 = vmatprep.mubr.msk.bf16.mxu1 %vm580_vm0, %v1361_v27 }
 0x31b   : > { %5446 = vmatmul.mubr.msk.bf16.gmra.mrb[40].mxu1 %vm580_vm0, %v1362_v21 }
 0x31c   : > { %5529 = vmatprep.mubr.msk.bf16.mxu1 %vm6178_vm15, %v8570_v19 }
 0x382   : > { %v2091_v41 = vpop.f32.mrb[0].mxu0 }
 0x383   : > { %v2092_v28 = vadd.f32 %v2091_v41, %v1376_v32  ;;  %v7368_v30 = vpop.f32.mrb[1].mxu0 }
 0x384   : > { %8658 = vst [vmem:[#allocation25_spill] sm:$0xff] %v7368_v30  ;;  %v2095_v3 = vpop.f32.mrb[2].mxu0 }
 0x385   : > { %v7370_v45 = vpack.c.bf16 %v2092_v28, %v2092_v28  ;;  %v2096_v62 = vpop.f32.mrb[3].mxu0 }
 0x387   : > { %v7374_v59 = vrot.slane %v7370_v45, %v7366_v56  ;;  %3133 = vrot.lane.b32.xlu0 %v7370_v45, %s6179_s30 }
 0x389   : > { %v7380_v47 = vrot.slane %v7374_v59, %v7366_v56  ;;  %v2563_v21 = vcombine.high %v7374_v59, %v7374_v59 }
 0x38b   : > { %v5171_v49 = vpack.i.b16 %v7380_v47, %v7380_v47  ;;  %v2581_v42 = vunpack.i.h.s16 %v7380_v47  ;;  %v7435_v59 = vrot.slane %v2563_v21, %v7366_v56 }
 0x38d   : > { %v2599_v36 = vrot.slane %v5171_v49, %v7357_v15  ;;  %v2589_v29 = vpack.i.b16 %v2581_v42, %v2581_v42 }
 0x38f   : > { %v2629_v33 = vpack.i.b16 %v2599_v36, %v2599_v36  ;;  %v2603_v25 = vrot.slane %v2589_v29, %v7357_v15 }
 0x391   : > { %v2634_v16 = vrot.slane %v2629_v33, %v7357_v15  ;;  %v2636_v12 = vpack.i.b16 %v2603_v25, %v2603_v25 }
 0x392   : > { %v5387_v58 = vpop.f32.mrb[4].mxu0 }
 0x393   : > { %v2276_v38 = vadd.f32 %v5387_v58, %v7388_v60  ;;  %v2267_v40 = vpop.f32.mrb[5].mxu0  ;;  %v2641_v49 = vrot.slane %v2636_v12, %v7357_v15 }
 0x394   : > { %v2268_v4 = vadd.f32 %v7388_v60, %v2267_v40  ;;  %v5388_v14 = vpop.f32.mrb[6].mxu0 }
 0x395   : > { %v2279_v46 = vadd.f32 %v5388_v14, %v7388_v60  ;;  %v2270_v26 = vpop.f32.mrb[7].mxu0 }
 0x396   : > { %v2271_v37 = vadd.f32 %v7388_v60, %v2270_v26 }
 0x397   : > { %v7394_v39 = vpack.c.bf16 %v2279_v46, %v2276_v38 }
 0x398   : > { %v7398_v31 = vpack.c.bf16 %v2271_v37, %v2268_v4 }
 0x399   : > { %v2685_v7 = vmul.bf16 %v2634_v16, %v7394_v39 }
 0x39a   : > { %v2684_v18 = vmul.bf16 %v2634_v16, %v7398_v31  ;;  %v5391_v5 = vpop.f32.mrb[8].mxu0 }
 0x39b   : > { %v2292_v0 = vadd.f32 %v5391_v5, %v7388_v60  ;;  %v2283_v8 = vpop.f32.mrb[9].mxu0 }
 0x39c   : > { %v2284_v61 = vadd.f32 %v7388_v60, %v2283_v8  ;;  %v5392_v57 = vpop.f32.mrb[10].mxu0  ;;  %5457 = vmatprep.mubr.msk.bf16.mxu0 %vm580_vm0, %v2684_v18 }
 0x39d   : > { %v2295_v2 = vadd.f32 %v5392_v57, %v7388_v60  ;;  %v2286_v63 = vpop.f32.mrb[11].mxu0  ;;  %5458 = vmatmul.mubr.msk.bf16.vlgmr.msra.gmra.mrb[24].mxu0 %vm580_vm0, %v2685_v7 }
 0x39e   : > { %v2287_v34 = vadd.f32 %v7388_v60, %v2286_v63  ;;  %v5407_v10 = vpop.f32.mrb[0].mxu1 }
 0x39f   : > { %v7408_v52 = vpack.c.bf16 %v2295_v2, %v2292_v0  ;;  %v2356_v22 = vadd.f32 %v5407_v10, %v7388_v60  ;;  %v2347_v51 = vpop.f32.mrb[1].mxu1 }
 0x3a0   : > { %v7412_v11 = vpack.c.bf16 %v2287_v34, %v2284_v61  ;;  %v2348_v43 = vadd.f32 %v7388_v60, %v2347_v51  ;;  %v5408_v6 = vpop.f32.mrb[2].mxu1 }
 0x3a1   : > { %v2359_v24 = vadd.f32 %v5408_v6, %v7388_v60  ;;  %v2350_v23 = vpop.f32.mrb[3].mxu1  ;;  %v2687_v27 = vmul.bf16 %v2634_v16, %v7408_v52  ;;  %v2583_v6 = vunpack.i.h.s16 %v7435_v59 }
 0x3a2   : > { %v2686_v48 = vmul.bf16 %v2634_v16, %v7412_v11  ;;  %v5395_v44 = vpop.f32.mrb[12].mxu0  ;;  %v2351_v50 = vadd.f32 %v7388_v60, %v2350_v23  ;;  %v5172_v16 = vpack.i.b16 %v7435_v59, %v7435_v59 }
 0x3a3   : > { %v7419_v54 = vpack.c.bf16 %v2359_v24, %v2356_v22  ;;  %v2308_v1 = vadd.f32 %v5395_v44, %v7388_v60  ;;  %v2299_v9 = vpop.f32.mrb[13].mxu0 }
 0x3a4   : > { %v7424_v13 = vpack.c.bf16 %v2351_v50, %v2348_v43  ;;  %v2300_v55 = vadd.f32 %v7388_v60, %v2299_v9  ;;  %v5396_v20 = vpop.f32.mrb[14].mxu0  ;;  %5461 = vmatprep.mubr.msk.bf16.mxu0 %vm580_vm0, %v2686_v48  ;;  %v2607_v34 = vrot.slane %v5172_v16, %v7357_v15 }
 0x3a5   : > { %v2311_v53 = vadd.f32 %v5396_v20, %v7388_v60  ;;  %v2302_v32 = vpop.f32.mrb[15].mxu0  ;;  %5462 = vmatmul.mubr.msk.bf16.gmra.mrb[28].mxu0 %vm580_vm0, %v2687_v27 }
 0x3a6   : > { %v2303_v35 = vadd.f32 %v7388_v60, %v2302_v32  ;;  %v5411_v41 = vpop.f32.mrb[4].mxu1  ;;  %v2643_v9 = vpack.i.b16 %v2607_v34, %v2607_v34  ;;  %v2591_v32 = vpack.i.b16 %v2583_v6, %v2583_v6 }
 0x3a7   : > { %v7431_v28 = vpack.c.bf16 %v2311_v53, %v2308_v1  ;;  %v2372_v3 = vadd.f32 %v5411_v41, %v7388_v60  ;;  %v2363_v62 = vpop.f32.mrb[5].mxu1 }
 0x3a8   : > { %v7438_v36 = vpack.c.bf16 %v2303_v35, %v2300_v55  ;;  %v2364_v58 = vadd.f32 %v7388_v60, %v2363_v62  ;;  %v5412_v38 = vpop.f32.mrb[6].mxu1 }
 0x3a9   : > { %v2375_v40 = vadd.f32 %v5412_v38, %v7388_v60  ;;  %v2366_v4 = vpop.f32.mrb[7].mxu1  ;;  %v2689_v26 = vmul.bf16 %v2641_v49, %v7431_v28 }
 0x3aa   : > { %v2688_v14 = vmul.bf16 %v2641_v49, %v7438_v36  ;;  %v5399_v33 = vpop.f32.mrb[16].mxu0  ;;  %v2367_v46 = vadd.f32 %v7388_v60, %v2366_v4 }
 0x3ab   : > { %v7445_v37 = vpack.c.bf16 %v2375_v40, %v2372_v3  ;;  %v2324_v56 = vadd.f32 %v5399_v33, %v7388_v60  ;;  %v2315_v42 = vpop.f32.mrb[17].mxu0 }
 0x3ac   : > { %v7450_v18 = vpack.c.bf16 %v2367_v46, %v2364_v58  ;;  %v2316_v5 = vadd.f32 %v7388_v60, %v2315_v42  ;;  %v5400_v7 = vpop.f32.mrb[18].mxu0  ;;  %5465 = vmatprep.mubr.msk.bf16.mxu0 %vm580_vm0, %v2688_v14  ;;  %v2648_v58 = vrot.slane %v2643_v9, %v7357_v15  ;;  %v2611_v46 = vrot.slane %v2591_v32, %v7357_v15 }
 0x3ad   : > { %v2327_v0 = vadd.f32 %v5400_v7, %v7388_v60  ;;  %v2318_v8 = vpop.f32.mrb[19].mxu0  ;;  %5466 = vmatmul.mubr.msk.bf16.gmra.mrb[32].mxu0 %vm580_vm0, %v2689_v26 }
 0x3ae   : > { %v2319_v29 = vadd.f32 %v7388_v60, %v2318_v8  ;;  %v5415_v61 = vpop.f32.mrb[8].mxu1  ;;  %4369 = vrot.lane.b32.xlu0 %v7450_v18, %s6179_s30  ;;  %v2695_v6 = vmul.bf16 %v2648_v58, %v7419_v54 }
 0x3af   : > { %v7459_v57 = vpack.c.bf16 %v2327_v0, %v2324_v56  ;;  %v2388_v2 = vadd.f32 %v5415_v61, %v7388_v60  ;;  %v2379_v63 = vpop.f32.mrb[9].mxu1  ;;  %v2650_v0 = vpack.i.b16 %v2611_v46, %v2611_v46 }
 0x3b0   : > { %v7463_v10 = vpack.c.bf16 %v2319_v29, %v2316_v5  ;;  %v2380_v22 = vadd.f32 %v7388_v60, %v2379_v63  ;;  %v5416_v51 = vpop.f32.mrb[10].mxu1  ;;  %v2694_v5 = vmul.bf16 %v2648_v58, %v7424_v13 }
 0x3b1   : > { %v2391_v25 = vadd.f32 %v5416_v51, %v7388_v60  ;;  %v2382_v43 = vpop.f32.mrb[11].mxu1  ;;  %v2691_v44 = vmul.bf16 %v2641_v49, %v7459_v57  ;;  %v2578_v51 = vcombine.high %v7380_v47, %v7380_v47 }
 0x3b2   : > { %v2690_v24 = vmul.bf16 %v2641_v49, %v7463_v10  ;;  %v5403_v23 = vpop.f32.mrb[20].mxu0  ;;  %v2383_v48 = vadd.f32 %v7388_v60, %v2382_v43 }
 0x3b3   : > { %v7471_v50 = vpack.c.bf16 %v2391_v25, %v2388_v2  ;;  %v2340_v27 = vadd.f32 %v5403_v23, %v7388_v60  ;;  %v2331_v1 = vpop.f32.mrb[21].mxu0  ;;  %v2655_v25 = vrot.slane %v2650_v0, %v7357_v15 }
 0x3b4   : > { %v7474_v21 = vpack.c.bf16 %v2383_v48, %v2380_v22  ;;  %v2332_v55 = vadd.f32 %v7388_v60, %v2331_v1  ;;  %v5404_v20 = vpop.f32.mrb[22].mxu0  ;;  %5469 = vmatprep.mubr.msk.bf16.mxu0 %vm580_vm0, %v2690_v24 }
 0x3b5   : > { %v2343_v12 = vadd.f32 %v5404_v20, %v7388_v60  ;;  %v2334_v53 = vpop.f32.mrb[23].mxu0  ;;  %5470 = vmatmul.mubr.msk.bf16.gmra.mrb[36].mxu0 %vm580_vm0, %v2691_v44  ;;  %v2696_v23 = vmul.bf16 %v2655_v25, %v7450_v18  ;;  %v5173_v44 = vpack.i.b16 %v2578_v51, %v2578_v51  ;;  %v2697_v32 = vmul.bf16 %v2655_v25, %v7445_v37 }
 0x3b6   : > { %v2335_v35 = vadd.f32 %v7388_v60, %v2334_v53  ;;  %v5419_v41 = vpop.f32.mrb[12].mxu1 }
 0x3b7   : > { %v7481_v3 = vpack.c.bf16 %v2343_v12, %v2340_v27  ;;  %v2404_v62 = vadd.f32 %v5419_v41, %v7388_v60  ;;  %v2395_v49 = vpop.f32.mrb[13].mxu1  ;;  %v2615_v12 = vrot.slane %v5173_v44, %v7357_v15  ;;  %v2698_v41 = vmul.bf16 %v2655_v25, %v7474_v21 }
 0x3b8   : > { %v7485_v38 = vpack.c.bf16 %v2335_v35, %v2332_v55  ;;  %v2396_v40 = vadd.f32 %v7388_v60, %v2395_v49  ;;  %v5420_v4 = vpop.f32.mrb[14].mxu1 }
 0x3b9   : > { %v2407_v14 = vadd.f32 %v5420_v4, %v7388_v60  ;;  %v2398_v33 = vpop.f32.mrb[15].mxu1  ;;  %v2693_v42 = vmul.bf16 %v2648_v58, %v7481_v3  ;;  %v2657_v49 = vpack.i.b16 %v2615_v12, %v2615_v12 }
 0x3ba   : > { %v2692_v26 = vmul.bf16 %v2648_v58, %v7485_v38  ;;  %v2399_v56 = vadd.f32 %v7388_v60, %v2398_v33 }
 0x3bb   : > { %v7493_v16 = vpack.c.bf16 %v2407_v14, %v2404_v62 }
 0x3bc   : > { %v2538_v7 = vpack.c.bf16 %v2399_v56, %v2396_v40  ;;  %5473 = vmatprep.mubr.msk.bf16.mxu0 %vm580_vm0, %v2692_v26  ;;  %v2585_v26 = vunpack.i.h.s16 %v2578_v51  ;;  %v2662_v56 = vrot.slane %v2657_v49, %v7357_v15 }
 0x3bd   : > { %5474 = vmatmul.mubr.msk.bf16.gmra.mrb[40].mxu0 %vm580_vm0, %v2693_v42 }
 0x3be   : > { %5477 = vmatprep.mubr.msk.bf16.mxu0 %vm580_vm0, %v2694_v5  ;;  %v5423_v8 = vpop.f32.mrb[16].mxu1  ;;  %4377 = vrot.lane.b32.xlu0 %v2538_v7, %s6179_s30  ;;  %v2699_v5 = vmul.bf16 %v2655_v25, %v7471_v50 }
 0x3bf   : > { %v2420_v29 = vadd.f32 %v5423_v8, %v7388_v60  ;;  %v2411_v61 = vpop.f32.mrb[17].mxu1  ;;  %v2700_v8 = vmul.bf16 %v2662_v56, %v2538_v7 }
 0x3c0   : > { %v2412_v2 = vadd.f32 %v7388_v60, %v2411_v61  ;;  %v5424_v63 = vpop.f32.mrb[18].mxu1  ;;  %v2593_v61 = vpack.i.b16 %v2585_v26, %v2585_v26 }
 0x3c1   : > { %v2423_v34 = vadd.f32 %v5424_v63, %v7388_v60  ;;  %v2414_v22 = vpop.f32.mrb[19].mxu1 }
 0x3c2   : > { %v2415_v43 = vadd.f32 %v7388_v60, %v2414_v22  ;;  %4371 = vrot.lane.b32.xlu0 %v7445_v37, %s6179_s30 }
 0x3c3   : > { %v7510_v24 = vpack.c.bf16 %v2423_v34, %v2420_v29 }
 0x3c4   : > { %v7513_v48 = vpack.c.bf16 %v2415_v43, %v2412_v2 }
 0x3c5   : > { %5478 = vmatmul.mubr.msk.bf16.gmra.mrb[44].mxu0 %vm580_vm0, %v2695_v6  ;;  %v2619_v6 = vrot.slane %v2593_v61, %v7357_v15 }
 0x3c6   : > { %5481 = vmatprep.mubr.msk.bf16.mxu0 %vm580_vm0, %v2696_v23  ;;  %v5427_v47 = vpop.f32.mrb[20].mxu1  ;;  %4379 = vrot.lane.b32.xlu0 %v7493_v16, %s6179_s30  ;;  %v2701_v23 = vmul.bf16 %v2662_v56, %v7493_v16 }
 0x3c7   : > { %v2436_v27 = vadd.f32 %v5427_v47, %v7388_v60  ;;  %v2427_v1 = vpop.f32.mrb[21].mxu1  ;;  %v2702_v47 = vmul.bf16 %v2662_v56, %v7513_v48 }
 0x3c8   : > { %v2428_v9 = vadd.f32 %v7388_v60, %v2427_v1  ;;  %v5428_v55 = vpop.f32.mrb[22].mxu1  ;;  %v2664_v1 = vpack.i.b16 %v2619_v6, %v2619_v6 }
 0x3c9   : > { %v2439_v20 = vadd.f32 %v5428_v55, %v7388_v60  ;;  %v2430_v18 = vpop.f32.mrb[23].mxu1 }
 0x3ca   : > { %v2431_v53 = vadd.f32 %v7388_v60, %v2430_v18 }
 0x3cb   : > { %v7525_v35 = vpack.c.bf16 %v2439_v20, %v2436_v27 }
 0x3cc   : > { %v2542_v62 = vpack.c.bf16 %v2431_v53, %v2428_v9 }
 0x3cd   : > { %5482 = vmatmul.mubr.msk.bf16.gmra.mrb[48].mxu0 %vm580_vm0, %v2697_v32  ;;  %v2579_v32 = vcombine.high %v7435_v59, %v7435_v59 }
 0x3ce   : > { %5485 = vmatprep.mubr.msk.bf16.mxu0 %vm580_vm0, %v2698_v41  ;;  %v5431_v58 = vpop.f32.mrb[24].mxu1  ;;  %4385 = vrot.lane.b32.xlu1 %v2542_v62, %s6179_s30  ;;  %v2669_v41 = vrot.slane %v2664_v1, %v7357_v15 }
 0x3cf   : > { %v2452_v40 = vadd.f32 %v5431_v58, %v7388_v60  ;;  %v2443_v4 = vpop.f32.mrb[25].mxu1  ;;  %v2703_v58 = vmul.bf16 %v2662_v56, %v7510_v24 }
 0x3d0   : > { %v2444_v14 = vadd.f32 %v7388_v60, %v2443_v4  ;;  %v5432_v33 = vpop.f32.mrb[26].mxu1  ;;  %v2704_v4 = vmul.bf16 %v2669_v41, %v2542_v62  ;;  %v2705_v61 = vmul.bf16 %v2669_v41, %v7525_v35 }
 0x3d1   : > { %v2455_v37 = vadd.f32 %v5432_v33, %v7388_v60  ;;  %v2446_v46 = vpop.f32.mrb[27].mxu1  ;;  %v5174_v33 = vpack.i.b16 %v2579_v32, %v2579_v32 }
 0x3d2   : > { %v2447_v42 = vadd.f32 %v7388_v60, %v2446_v46 }
 0x3d3   : > { %v7537_v0 = vpack.c.bf16 %v2455_v37, %v2452_v40  ;;  %v2623_v62 = vrot.slane %v5174_v33, %v7357_v15 }
 0x3d4   : > { %v7539_v29 = vpack.c.bf16 %v2447_v42, %v2444_v14 }
 0x3d5   : > { %5486 = vmatmul.mubr.msk.bf16.gmra.mrb[52].mxu0 %vm580_vm0, %v2699_v5 }
 0x3d6   : > { %5489 = vmatprep.mubr.msk.bf16.mxu0 %vm580_vm0, %v2700_v8  ;;  %v5435_v2 = vpop.f32.mrb[28].mxu1 }
 0x3d7   : > { %v2468_v63 = vadd.f32 %v5435_v2, %v7388_v60  ;;  %v2459_v34 = vpop.f32.mrb[29].mxu1 }
 0x3d8   : > { %v2460_v22 = vadd.f32 %v7388_v60, %v2459_v34  ;;  %v5436_v51 = vpop.f32.mrb[30].mxu1 }
 0x3d9   : > { %v2471_v43 = vadd.f32 %v5436_v51, %v7388_v60  ;;  %v2462_v25 = vpop.f32.mrb[31].mxu1 }
 0x3da   : > { %v2463_v7 = vadd.f32 %v7388_v60, %v2462_v25 }
 0x3db   : > { %v7549_v44 = vpack.c.bf16 %v2471_v43, %v2468_v63  ;;  %v2706_v63 = vmul.bf16 %v2669_v41, %v7539_v29 }
 0x3dc   : > { %v2546_v27 = vpack.c.bf16 %v2463_v7, %v2460_v22 }
 0x3dd   : > { %5490 = vmatmul.mubr.msk.bf16.gmra.mrb[56].mxu0 %vm580_vm0, %v2701_v23  ;;  %v2587_v23 = vunpack.i.h.s16 %v2579_v32 }
 0x3de   : > { %5493 = vmatprep.mubr.msk.bf16.mxu0 %vm580_vm0, %v2702_v47  ;;  %v5439_v9 = vpop.f32.mrb[32].mxu1  ;;  %4393 = vrot.lane.b32.xlu1 %v2546_v27, %s6179_s30 }
 0x3df   : > { %v2484_v55 = vadd.f32 %v5439_v9, %v7388_v60  ;;  %v2475_v20 = vpop.f32.mrb[33].mxu1  ;;  %v2707_v9 = vmul.bf16 %v2669_v41, %v7537_v0 }
 0x3e0   : > { %v2476_v18 = vadd.f32 %v7388_v60, %v2475_v20  ;;  %v5440_v12 = vpop.f32.mrb[34].mxu1 }
 0x3e1   : > { %v2487_v16 = vadd.f32 %v5440_v12, %v7388_v60  ;;  %v2478_v53 = vpop.f32.mrb[35].mxu1 }
 0x3e2   : > { %v2479_v49 = vadd.f32 %v7388_v60, %v2478_v53  ;;  %4387 = vrot.lane.b32.xlu1 %v7525_v35, %s6179_s30 }
 0x3e3   : > { %v7565_v40 = vpack.c.bf16 %v2487_v16, %v2484_v55 }
 0x3e4   : > { %v2548_v14 = vpack.c.bf16 %v2479_v49, %v2476_v18 }
 0x3e5   : > { %5494 = vmatmul.mubr.msk.bf16.gmra.mrb[60].mxu0 %vm580_vm0, %v2703_v58 }
 0x3e6   : > { %5497 = vmatprep.mubr.msk.bf16.mxu0 %vm580_vm0, %v2704_v4  ;;  %v5443_v37 = vpop.f32.mrb[36].mxu1  ;;  %4365 = vrot.lane.b32.xlu1 %v7424_v13, %s6179_s30  ;;  %v2671_v13 = vpack.i.b16 %v2623_v62, %v2623_v62 }
 0x3e7   : > { %v2500_v59 = vadd.f32 %v5443_v37, %v7388_v60  ;;  %v2491_v46 = vpop.f32.mrb[37].mxu1 }
 0x3e8   : > { %v2492_v26 = vadd.f32 %v7388_v60, %v2491_v46  ;;  %v5444_v42 = vpop.f32.mrb[38].mxu1  ;;  %v2676_v47 = vrot.slane %v2671_v13, %v7357_v15  ;;  %v3847_v46 = vld [vmem:[%s8659_s28] sm:$0xf]  ;;  %s6180_s28 = smov [#allocation10]  }
 0x3e9   : > { %v2503_v56 = vadd.f32 %v5444_v42, %v7388_v60  ;;  %v2494_v5 = vpop.f32.mrb[39].mxu1  ;;  %5631 = vmatprep.subr.msk.bf16.mxu1 %vm3944_vm2, %v3847_v46  ;;  %s6095_s16 = sshll.u32 %s6180_s28, 4  ;;  %s6096_s16 = int_to_ptr.vmem [resolvable:$false] %s6095_s16 }
 0x3ea   : > { %v2495_v8 = vadd.f32 %v7388_v60, %v2494_v5  ;;  %v2708_v20 = vmul.bf16 %v2676_v47, %v2546_v27  ;;  %v2709_v16 = vmul.bf16 %v2676_v47, %v7549_v44  ;;  %s6097_s26 = scalar_lea.vmem %s6096_s16, 256  ;;  %p6098_p12 = scmp.lt.s32.totalorder %s8503_s14, %s6096_s16 }
 0x3eb   : > { %v2551_v2 = vpack.c.bf16 %v2503_v56, %v2500_v59  ;;  %v7683_v56 = vsel %vm3944_vm2, %v3847_v46, 0  ;;  %p6099_p2 = scmp.lt.s32.totalorder %s6097_s26, %s6091_s21 }
 0x3ec   : > { %v2550_v34 = vpack.c.bf16 %v2495_v8, %v2492_v26  ;;  %8660 = vst [vmem:[#allocation26_spill] sm:$0xff] %v7683_v56  ;;  %5600 = vmatpush3.bf16.msra.mxu0 %v7683_v56 }
 0x3ed   : > { %5498 = vmatmul.mubr.msk.bf16.gmra.mrb[64].mxu0 %vm580_vm0, %v2705_v61  ;;  %4403 = vrot.lane.b32.xlu1 %v2551_v2, %s6179_s30  ;;  %p6100_p1 = por %p6099_p2, %p6098_p12 }
 0x3ee   : > { %5501 = vmatprep.mubr.msk.bf16.mxu0 %vm580_vm0, %v2706_v63  ;;  %v5447_v22 = vpop.f32.mrb[40].mxu1  ;;  %4401 = vrot.lane.b32.xlu0 %v2550_v34, %s6179_s30 }
 0x3ef   : > { %v2516_v51 = vadd.f32 %v5447_v22, %v7388_v60  ;;  %v2507_v43 = vpop.f32.mrb[41].mxu1  ;;  %5605 = vmatprep.subr.bf16.mxu0 %v8570_v19  ;;  %p6101_p4 = pnand %p6100_p1, %p6094_p7 }
 0x3f0   : > { %v2508_v25 = vadd.f32 %v7388_v60, %v2507_v43  ;;  %v5448_v35 = vpop.f32.mrb[42].mxu1 }
 0x3f1   : > { %v2519_v6 = vadd.f32 %v5448_v35, %v7388_v60  ;;  %4367 = vrot.lane.b32.xlu1 %v7419_v54, %s6179_s30  ;;  %v2510_v7 = vpop.f32.mrb[43].mxu1  ;;  %v2595_v54 = vpack.i.b16 %v2587_v23, %v2587_v23 }
 0x3f2   : > { %v2511_v1 = vadd.f32 %v7388_v60, %v2510_v7  ;;  %4395 = vrot.lane.b32.xlu0 %v7549_v44, %s6179_s30 }
 0x3f3   : > { %v2553_v55 = vpack.c.bf16 %v2519_v6, %v2516_v51  ;;  %v2627_v12 = vrot.slane %v2595_v54, %v7357_v15 }
 0x3f4   : > { %v2552_v18 = vpack.c.bf16 %v2511_v1, %v2508_v25 }
 0x3f5   : > { %5502 = vmatmul.mubr.msk.bf16.gmra.mrb[68].mxu0 %vm580_vm0, %v2707_v9  ;;  %4347 = vrot.lane.b32.xlu1 %v7394_v39, %s6179_s30  ;;  %v2710_v39 = vmul.bf16 %v2676_v47, %v2548_v14 }
 0x3f6   : > { %5505 = vmatprep.mubr.msk.bf16.mxu0 %vm580_vm0, %v2708_v20  ;;  %4373 = vrot.lane.b32.xlu0 %v7474_v21, %s6179_s30  ;;  %v2678_v21 = vpack.i.b16 %v2627_v12, %v2627_v12 }
 0x3f9   : > { %4349 = vrot.lane.b32.xlu1 %v7412_v11, %s6179_s30  ;;  %v3134_v60 = vpop.permute.xlu0 %3133  ;;  %v2711_v11 = vmul.bf16 %v2676_v47, %v7565_v40 }
 0x3fa   : > { %v3136_v27 = vmul.bf16 %v3134_v60, %v7370_v45  ;;  %4381 = vrot.lane.b32.xlu0 %v7513_v48, %s6179_s30  ;;  %v2683_v45 = vrot.slane %v2678_v21, %v7357_v15 }
 0x3fc   : > { %5530 = vmatmul.mubr.msk.bf16.vlgmr.msra.gmra.mrb[44].mxu1 %vm580_vm0, %v3136_v27  ;;  %v2712_v48 = vmul.bf16 %v2683_v45, %v2550_v34 }
 0x3fd   : > { %5506 = vmatmul.mubr.msk.bf16.gmra.mrb[72].mxu0 %vm580_vm0, %v2709_v16  ;;  %4355 = vrot.lane.b32.xlu1 %v7431_v28, %s6179_s30  ;;  %v2713_v28 = vmul.bf16 %v2683_v45, %v2551_v2 }
 0x3fe   : > { %5509 = vmatprep.mubr.msk.bf16.mxu0 %vm580_vm0, %v2710_v39  ;;  %4389 = vrot.lane.b32.xlu0 %v7539_v29, %s6179_s30 }
 0x3ff   : > { %5534 = vmatpush3.bf16.msra.mxu1 %v7683_v56 }
 0x401   : > { %4353 = vrot.lane.b32.xlu1 %v7438_v36, %s6179_s30  ;;  %v2714_v36 = vmul.bf16 %v2683_v45, %v2552_v18 }
 0x402   : > { %4397 = vrot.lane.b32.xlu0 %v2548_v14, %s6179_s30 }
 0x405   : > { %5510 = vmatmul.mubr.msk.bf16.gmra.mrb[76].mxu0 %vm580_vm0, %v2711_v11  ;;  %4359 = vrot.lane.b32.xlu1 %v7459_v57, %s6179_s30 }
 0x406   : > { %5513 = vmatprep.mubr.msk.bf16.mxu0 %vm580_vm0, %v2712_v48  ;;  %4345 = vrot.lane.b32.xlu0 %v7398_v31, %s6179_s30  ;;  %v2715_v31 = vmul.bf16 %v2683_v45, %v2553_v55 }
 0x409   : > { %4363 = vrot.lane.b32.xlu1 %v7481_v3, %s6179_s30 }
 0x40a   : > { %4357 = vrot.lane.b32.xlu0 %v7463_v10, %s6179_s30 }
 0x40d   : > { %5514 = vmatmul.mubr.msk.bf16.gmra.mrb[80].mxu0 %vm580_vm0, %v2713_v28  ;;  %4361 = vrot.lane.b32.xlu1 %v7485_v38, %s6179_s30 }
 0x40e   : > { %5517 = vmatprep.mubr.msk.bf16.mxu0 %vm580_vm0, %v2714_v36  ;;  %4375 = vrot.lane.b32.xlu0 %v7471_v50, %s6179_s30 }
 0x411   : > { %4351 = vrot.lane.b32.xlu1 %v7408_v52, %s6179_s30 }
 0x412   : > { %4383 = vrot.lane.b32.xlu0 %v7510_v24, %s6179_s30 }
 0x415   : > { %5518 = vmatmul.mubr.msk.bf16.gmra.mrb[84].mxu0 %vm580_vm0, %v2715_v31  ;;  %4405 = vrot.lane.b32.xlu1 %v2552_v18, %s6179_s30 }
 0x416   : > { %4399 = vrot.lane.b32.xlu0 %v7565_v40, %s6179_s30  ;;  %5601 = vmatprep.mubr.msk.bf16.mxu0 %vm6178_vm15, %v8570_v19 }
 0x419   : > { %4391 = vrot.lane.b32.xlu1 %v7537_v0, %s6179_s30 }
 0x41d   : > { %4407 = vrot.lane.b32.xlu1 %v2553_v55, %s6179_s30 }
 0x470   : > { %v7646_v52 = vpop.f32.mrb[24].mxu0 }
 0x471   : > { %v7648_v57 = vpop.f32.mrb[25].mxu0  ;;  %v3184_v0 = vsel %vm3180_vm1, %v7646_v52, -inf }
 0x472   : > { %v7650_v10 = vpop.f32.mrb[26].mxu0  ;;  %v3181_v3 = vsel %vm3180_vm1, %v7648_v57, -inf }
 0x473   : > { %v7652_v50 = vpop.f32.mrb[27].mxu0  ;;  %v3186_v44 = vsel %vm3180_vm1, %v7650_v10, -inf }
 0x474   : > { %v3182_v38 = vsel %vm3180_vm1, %v7652_v50, -inf }
 0x475   : > { %v3183_v24 = vmax.f32 %v3181_v3, %v3182_v38 }
 0x477   : > { %v3185_v29 = vmax.f32 %v3183_v24, %v3184_v0 }
 0x478   : > { %v7662_v53 = vpop.f32.mrb[28].mxu0 }
 0x479   : > { %v7664_v32 = vpop.f32.mrb[29].mxu0  ;;  %v3187_v41 = vmax.f32 %v3185_v29, %v3186_v44  ;;  %v3192_v37 = vsel %vm3180_vm1, %v7662_v53, -inf }
 0x47a   : > { %v3188_v49 = vsel %vm3180_vm1, %v7664_v32, -inf  ;;  %v7668_v58 = vpop.f32.mrb[30].mxu0 }
 0x47b   : > { %v3189_v40 = vmax.f32 %v3187_v41, %v3188_v49  ;;  %v7670_v4 = vpop.f32.mrb[31].mxu0  ;;  %v3194_v26 = vsel %vm3180_vm1, %v7668_v58, -inf }
 0x47c   : > { %v3190_v14 = vsel %vm3180_vm1, %v7670_v4, -inf }
 0x47d   : > { %v3191_v33 = vmax.f32 %v3189_v40, %v3190_v14 }
 0x47f   : > { %v3193_v59 = vmax.f32 %v3191_v33, %v3192_v37 }
 0x480   : > { %v7681_v42 = vpop.f32.mrb[32].mxu0 }
 0x481   : > { %v7685_v5 = vmax.f32 %v3193_v59, %v3194_v26  ;;  %v7687_v62 = vpop.f32.mrb[33].mxu0  ;;  %v3205_v13 = vsel %vm3180_vm1, %v7681_v42, -inf }
 0x482   : > { %v7691_v8 = vpop.f32.mrb[34].mxu0  ;;  %v3202_v2 = vsel %vm3180_vm1, %v7687_v62, -inf }
 0x483   : > { %v7694_v61 = vpop.f32.mrb[35].mxu0  ;;  %v3207_v51 = vsel %vm3180_vm1, %v7691_v8, -inf }
 0x484   : > { %v3203_v63 = vsel %vm3180_vm1, %v7694_v61, -inf }
 0x485   : > { %v3204_v34 = vmax.f32 %v3202_v2, %v3203_v63 }
 0x487   : > { %v3206_v22 = vmax.f32 %v3204_v34, %v3205_v13 }
 0x488   : > { %v7704_v43 = vpop.f32.mrb[36].mxu0 }
 0x489   : > { %v7706_v25 = vpop.f32.mrb[37].mxu0  ;;  %v3208_v35 = vmax.f32 %v3206_v22, %v3207_v51  ;;  %v3213_v55 = vsel %vm3180_vm1, %v7704_v43, -inf }
 0x48a   : > { %v3209_v6 = vsel %vm3180_vm1, %v7706_v25, -inf  ;;  %v7710_v7 = vpop.f32.mrb[38].mxu0 }
 0x48b   : > { %v3210_v23 = vmax.f32 %v3208_v35, %v3209_v6  ;;  %v7712_v47 = vpop.f32.mrb[39].mxu0  ;;  %v3215_v18 = vsel %vm3180_vm1, %v7710_v7, -inf }
 0x48c   : > { %v3211_v1 = vsel %vm3180_vm1, %v7712_v47, -inf }
 0x48d   : > { %v3212_v9 = vmax.f32 %v3210_v23, %v3211_v1 }
 0x48f   : > { %v3214_v20 = vmax.f32 %v3212_v9, %v3213_v55 }
 0x490   : > { %v7720_v54 = vpop.f32.mrb[40].mxu0 }
 0x491   : > { %v7722_v60 = vmax.f32 %v3214_v20, %v3215_v18  ;;  %v7724_v12 = vpop.f32.mrb[41].mxu0  ;;  %v3226_v11 = vsel %vm3180_vm1, %v7720_v54, -inf }
 0x492   : > { %v7726_v27 = vpop.f32.mrb[42].mxu0  ;;  %v3223_v39 = vsel %vm3180_vm1, %v7724_v12, -inf }
 0x493   : > { %v7728_v16 = vpop.f32.mrb[43].mxu0  ;;  %v3228_v28 = vsel %vm3180_vm1, %v7726_v27, -inf }
 0x494   : > { %v3224_v21 = vsel %vm3180_vm1, %v7728_v16, -inf }
 0x495   : > { %v3225_v45 = vmax.f32 %v3223_v39, %v3224_v21 }
 0x497   : > { %v3227_v48 = vmax.f32 %v3225_v45, %v3226_v11 }
 0x498   : > { %v7738_v36 = vpop.f32.mrb[44].mxu0 }
 0x499   : > { %v7740_v31 = vpop.f32.mrb[45].mxu0  ;;  %v3229_v3 = vmax.f32 %v3227_v48, %v3228_v28  ;;  %v3234_v49 = vsel %vm3180_vm1, %v7738_v36, -inf }
 0x49a   : > { %v3230_v38 = vsel %vm3180_vm1, %v7740_v31, -inf  ;;  %v7744_v24 = vpop.f32.mrb[46].mxu0 }
 0x49b   : > { %v3231_v0 = vmax.f32 %v3229_v3, %v3230_v38  ;;  %v7746_v29 = vpop.f32.mrb[47].mxu0  ;;  %v3236_v14 = vsel %vm3180_vm1, %v7744_v24, -inf }
 0x49c   : > { %v3232_v44 = vsel %vm3180_vm1, %v7746_v29, -inf }
 0x49d   : > { %v3233_v41 = vmax.f32 %v3231_v0, %v3232_v44 }
 0x49f   : > { %v3235_v40 = vmax.f32 %v3233_v41, %v3234_v49 }
 0x4a0   : > { %v7754_v33 = vpop.f32.mrb[48].mxu0 }
 0x4a1   : > { %v3237_v37 = vmax.f32 %v3235_v40, %v3236_v14  ;;  %v7756_v59 = vpop.f32.mrb[49].mxu0  ;;  %v3247_v13 = vsel %vm3180_vm1, %v7754_v33, -inf }
 0x4a2   : > { %v7758_v46 = vpop.f32.mrb[50].mxu0  ;;  %v3244_v2 = vsel %vm3180_vm1, %v7756_v59, -inf }
 0x4a3   : > { %v7760_v26 = vpop.f32.mrb[51].mxu0  ;;  %v3249_v51 = vsel %vm3180_vm1, %v7758_v46, -inf }
 0x4a4   : > { %v3245_v63 = vsel %vm3180_vm1, %v7760_v26, -inf }
 0x4a5   : > { %v3246_v34 = vmax.f32 %v3244_v2, %v3245_v63 }
 0x4a7   : > { %v3248_v22 = vmax.f32 %v3246_v34, %v3247_v13 }
 0x4a8   : > { %v7770_v35 = vpop.f32.mrb[52].mxu0 }
 0x4a9   : > { %8661 = vst [vmem:[#allocation27_spill] sm:$0xff] %v7770_v35  ;;  %v7772_v6 = vpop.f32.mrb[53].mxu0  ;;  %v3250_v23 = vmax.f32 %v3248_v22, %v3249_v51  ;;  %v3255_v21 = vsel %vm3180_vm1, %v7770_v35, -inf  ;;  %v3196_v22 = vrot.slane %v7685_v5, 4  ;;  %v3217_v51 = vrot.slane %v7722_v60, 4 }
 0x4aa   : > { %v3251_v1 = vsel %vm3180_vm1, %v7772_v6, -inf  ;;  %v7776_v9 = vpop.f32.mrb[54].mxu0 }
 0x4ab   : > { %8662 = vst [vmem:[#allocation28_spill] sm:$0xff] %v7776_v9  ;;  %v3252_v55 = vmax.f32 %v3250_v23, %v3251_v1  ;;  %v7778_v20 = vpop.f32.mrb[55].mxu0  ;;  %v3257_v11 = vsel %vm3180_vm1, %v7776_v9, -inf  ;;  %v3238_v23 = vrot.slane %v3237_v37, 4 }
 0x4ac   : > { %8663 = vst [vmem:[#allocation29_spill] sm:$0xff] %v7778_v20  ;;  %v3253_v18 = vsel %vm3180_vm1, %v7778_v20, -inf }
 0x4ad   : > { %v3254_v39 = vmax.f32 %v3252_v55, %v3253_v18 }
 0x4af   : > { %v3256_v45 = vmax.f32 %v3254_v39, %v3255_v21 }
 0x4b0   : > { %v7786_v48 = vpop.f32.mrb[56].mxu0 }
 0x4b1   : > { %8664 = vst [vmem:[#allocation30_spill] sm:$0xff] %v7786_v48  ;;  %v3258_v28 = vmax.f32 %v3256_v45, %v3257_v11  ;;  %v7788_v3 = vpop.f32.mrb[57].mxu0  ;;  %v3268_v40 = vsel %vm3180_vm1, %v7786_v48, -inf }
 0x4b2   : > { %8665 = vst [vmem:[#allocation22_spill] sm:$0xff] %v7788_v3  ;;  %v7790_v38 = vpop.f32.mrb[58].mxu0  ;;  %v3265_v44 = vsel %vm3180_vm1, %v7788_v3, -inf }
 0x4b3   : > { %8666 = vst [vmem:[#allocation24_spill] sm:$0xff] %v7790_v38  ;;  %v7792_v0 = vpop.f32.mrb[59].mxu0  ;;  %v3270_v2 = vsel %vm3180_vm1, %v7790_v38, -inf  ;;  %v3259_v18 = vrot.slane %v3258_v28, 4 }
 0x4b4   : > { %8667 = vst [vmem:[#allocation23_spill] sm:$0xff] %v7792_v0  ;;  %v3266_v41 = vsel %vm3180_vm1, %v7792_v0, -inf }
 0x4b5   : > { %v3267_v49 = vmax.f32 %v3265_v44, %v3266_v41  ;;  %v3197_v44 = vmax.f32 %v7685_v5, %v3196_v22  ;;  %v3218_v41 = vmax.f32 %v7722_v60, %v3217_v51 }
 0x4b7   : > { %v3269_v14 = vmax.f32 %v3267_v49, %v3268_v40  ;;  %v3239_v49 = vmax.f32 %v3237_v37, %v3238_v23  ;;  %v3198_v17 = vrot.slane %v3197_v44, 2 }
 0x4b8   : > { %v7802_v63 = vpop.f32.mrb[60].mxu0 }
 0x4b9   : > { %8668 = vst [vmem:[#allocation17_spill] sm:$0xff] %v7802_v63  ;;  %v7804_v34 = vpop.f32.mrb[61].mxu0  ;;  %v3271_v13 = vmax.f32 %v3269_v14, %v3270_v2  ;;  %v3276_v40 = vsel %vm3180_vm1, %v7802_v63, -inf  ;;  %v3260_v14 = vmax.f32 %v3258_v28, %v3259_v18 }
 0x4ba   : > { %8669 = vst [vmem:[#allocation18_spill] sm:$0xff] %v7804_v34  ;;  %v3272_v1 = vsel %vm3180_vm1, %v7804_v34, -inf  ;;  %v7810_v55 = vpop.f32.mrb[62].mxu0 }
 0x4bb   : > { %8670 = vst [vmem:[#allocation19_spill] sm:$0xff] %v7810_v55  ;;  %v3273_v39 = vmax.f32 %v3271_v13, %v3272_v1  ;;  %v7812_v21 = vpop.f32.mrb[63].mxu0  ;;  %v3278_v19 = vsel %vm3180_vm1, %v7810_v55, -inf  ;;  %v3261_v60 = vrot.slane %v3260_v14, 2 }
 0x4bc   : > { %8671 = vst [vmem:[#allocation20_spill] sm:$0xff] %v7812_v21  ;;  %v3274_v45 = vsel %vm3180_vm1, %v7812_v21, -inf }
 0x4bd   : > { %v3275_v11 = vmax.f32 %v3273_v39, %v3274_v45  ;;  %v3219_v39 = vrot.slane %v3218_v41, 2  ;;  %v3240_v45 = vrot.slane %v3239_v49, 2  ;;  %v3262_v55 = vmax.f32 %v3260_v14, %v3261_v60 }
 0x4bf   : > { %v3277_v2 = vmax.f32 %v3275_v11, %v3276_v40  ;;  %v3220_v11 = vmax.f32 %v3218_v41, %v3219_v39  ;;  %v3241_v40 = vmax.f32 %v3239_v49, %v3240_v45  ;;  %v3263_v49 = vrot.slane %v3262_v55, 1 }
 0x4c0   : > { %v7822_v13 = vpop.f32.mrb[64].mxu0 }
 0x4c1   : > { %8672 = vst [vmem:[#allocation31_spill] sm:$0xff] %v7822_v13  ;;  %v3279_v1 = vmax.f32 %v3277_v2, %v3278_v19  ;;  %v7824_v30 = vpop.f32.mrb[65].mxu0  ;;  %v3199_v19 = vmax.f32 %v3197_v44, %v3198_v17  ;;  %v3289_v2 = vsel %vm3180_vm1, %v7822_v13, -inf  ;;  %v3242_v17 = vrot.slane %v3241_v40, 1 }
 0x4c2   : > { %8673 = vst [vmem:[#allocation32_spill] sm:$0xff] %v7824_v30  ;;  %v7826_v5 = vpop.f32.mrb[66].mxu0  ;;  %v3286_v28 = vsel %vm3180_vm1, %v7824_v30, -inf }
 0x4c3   : > { %8674 = vst [vmem:[#allocation33_spill] sm:$0xff] %v7826_v5  ;;  %v3280_v37 = vrot.slane %v3279_v1, 4  ;;  %v7828_v22 = vpop.f32.mrb[67].mxu0  ;;  %v3291_v34 = vsel %vm3180_vm1, %v7826_v5, -inf }
 0x4c4   : > { %8675 = vst [vmem:[#allocation34_spill] sm:$0xff] %v7828_v22  ;;  %v3287_v51 = vsel %vm3180_vm1, %v7828_v22, -inf }
 0x4c5   : > { %v3281_v23 = vmax.f32 %v3279_v1, %v3280_v37  ;;  %v3288_v18 = vmax.f32 %v3286_v28, %v3287_v51  ;;  %v3200_v1 = vrot.slane %v3199_v19, 1  ;;  %v3221_v37 = vrot.slane %v3220_v11, 1 }
 0x4c7   : > { %v3282_v63 = vrot.slane %v3281_v23, 2  ;;  %v3290_v21 = vmax.f32 %v3288_v18, %v3289_v2  ;;  %v3201_v28 = vmax.f32 %v3199_v19, %v3200_v1  ;;  %v3222_v51 = vmax.f32 %v3220_v11, %v3221_v37 }
 0x4c8   : > { %v7838_v38 = vpop.f32.mrb[68].mxu0 }
 0x4c9   : > { %8676 = vst [vmem:[#allocation35_spill] sm:$0xff] %v7838_v38  ;;  %v3283_v30 = vmax.f32 %v3281_v23, %v3282_v63  ;;  %v7840_v48 = vpop.f32.mrb[69].mxu0  ;;  %v3292_v22 = vmax.f32 %v3290_v21, %v3291_v34  ;;  %v3243_v34 = vmax.f32 %v3241_v40, %v3242_v17  ;;  %v3297_v21 = vsel %vm3180_vm1, %v7838_v38, -inf }
 0x4ca   : > { %8677 = vst [vmem:[#allocation36_spill] sm:$0xff] %v7840_v48  ;;  %v3293_v44 = vsel %vm3180_vm1, %v7840_v48, -inf  ;;  %v7844_v41 = vpop.f32.mrb[70].mxu0  ;;  %v3264_v23 = vmax.f32 %v3262_v55, %v3263_v49 }
 0x4cb   : > { %8678 = vst [vmem:[#allocation37_spill] sm:$0xff] %v7844_v41  ;;  %v3284_v14 = vrot.slane %v3283_v30, 1  ;;  %v3294_v39 = vmax.f32 %v3292_v22, %v3293_v44  ;;  %v7846_v45 = vpop.f32.mrb[71].mxu0  ;;  %v3299_v2 = vsel %vm3180_vm1, %v7844_v41, -inf }
 0x4cc   : > { %8679 = vst [vmem:[#allocation38_spill] sm:$0xff] %v7846_v45  ;;  %v3295_v60 = vsel %vm3180_vm1, %v7846_v45, -inf }
 0x4cd   : > { %v3296_v63 = vmax.f32 %v3294_v39, %v3295_v60  ;;  %v3285_v18 = vmax.f32 %v3283_v30, %v3284_v14 }
 0x4cf   : > { %v3298_v48 = vmax.f32 %v3296_v63, %v3297_v21  ;;  %v7854_v5 = vpop.f32.mrb[44].mxu1 }
 0x4d0   : > { %v7856_v22 = vpop.f32.mrb[72].mxu0  ;;  %v3350_v44 = vrot.slane %v7854_v5, 1  ;;  %v3351_v39 = vrot.slane %v7854_v5, 2  ;;  %v3352_v19 = vrot.slane %v7854_v5, 3  ;;  %v3353_v11 = vrot.slane %v7854_v5, 4  ;;  %v5531_v40 = vpop.f32.mrb[45].mxu1 }
 0x4d1   : > { %v3300_v1 = vmax.f32 %v3298_v48, %v3299_v2  ;;  %v3365_v30 = vmax.f32 %v3201_v28, %v7854_v5  ;;  %v7863_v55 = vpop.f32.mrb[73].mxu0  ;;  %v3177_v37 = vpop.f32.mrb[46].mxu1  ;;  %v3310_v38 = vsel %vm3180_vm1, %v7856_v22, -inf  ;;  %v3354_v45 = vrot.slane %v7854_v5, 5 }
 0x4d2   : > { %v3366_v17 = vmax.f32 %v3222_v51, %v3350_v44  ;;  %v3367_v49 = vmax.f32 %v3243_v34, %v3351_v39  ;;  %v3368_v14 = vmax.f32 %v3264_v23, %v3352_v19  ;;  %v3369_v60 = vmax.f32 %v3285_v18, %v3353_v11  ;;  %v7865_v63 = vpop.f32.mrb[74].mxu0  ;;  %v5532_v21 = vpop.f32.mrb[47].mxu1 }
 0x4d3   : > { %v3301_v41 = vrot.slane %v3300_v1, 4  ;;  %v7871_v48 = vrot.slane %v3365_v30, %v7357_v15  ;;  %v7873_v28 = vpop.f32.mrb[75].mxu0  ;;  %v3307_v34 = vsel %vm3180_vm1, %v7863_v55, -inf  ;;  %v3312_v23 = vsel %vm3180_vm1, %v7865_v63, -inf }
 0x4d4   : > { %v7876_v2 = vrot.slane %v3366_v17, %v7357_v15  ;;  %v7879_v51 = vrot.slane %v3367_v49, %v7357_v15  ;;  %v7886_v44 = vrot.slane %v3368_v14, %v7357_v15  ;;  %v3605_v39 = vrot.slane %v3366_v17, 7 }
 0x4d5   : > { %v3302_v18 = vmax.f32 %v3300_v1, %v3301_v41  ;;  %v3607_v19 = vrot.slane %v3367_v49, 6  ;;  %v3609_v11 = vrot.slane %v3368_v14, 5  ;;  %v3611_v40 = vrot.slane %v3369_v60, 4 }
 0x4d6   : > { %v3308_v37 = vsel %vm3180_vm1, %v7873_v28, -inf  ;;  %v3405_v21 = vsub.f32 %v7648_v57, %v7871_v48  ;;  %v3606_v56 = vsel %vm1999_vm8, %v3605_v39, %v3365_v30  ;;  %v3406_v41 = vsub.f32 %v7652_v50, %v7871_v48 }
 0x4d7   : > { %v3303_v13 = vrot.slane %v3302_v18, 2  ;;  %v3309_v0 = vmax.f32 %v3307_v34, %v3308_v37  ;;  %v3608_v17 = vsel %vm2001_vm9, %v3607_v19, %v3606_v56  ;;  %v3407_v14 = vsub.f32 %v7646_v52, %v7871_v48 }
 0x4d8   : > { %v7895_v1 = vpop.f32.mrb[76].mxu0  ;;  %v3469_v49 = vmul.f32 1.442695, %v3405_v21  ;;  %v3408_v3 = vsub.f32 %v7650_v10, %v7871_v48  ;;  %v7903_v57 = vrot.slane %v3369_v60, %v7357_v15  ;;  %v3610_v50 = vsel %vm2003_vm10, %v3609_v11, %v3608_v17 }
 0x4d9   : > { %v3304_v9 = vmax.f32 %v3302_v18, %v3303_v13  ;;  %v3311_v30 = vmax.f32 %v3309_v0, %v3310_v38  ;;  %v7905_v34 = vpop.f32.mrb[77].mxu0  ;;  %v3612_v19 = vsel %vm2005_vm11, %v3611_v40, %v3610_v50  ;;  %v3471_v52 = vmul.f32 1.442695, %v3406_v41 }
 0x4da   : > { %8680 = vst [vmem:[#allocation39_spill] sm:$0xff] %v7903_v57  ;;  %v3314_v39 = vsel %vm3180_vm1, %v7905_v34, -inf  ;;  %v7910_v56 = vpop.f32.mrb[78].mxu0  ;;  %5812 = vpow2.f32 %v3469_v49  ;;  %v3473_v38 = vmul.f32 1.442695, %v3407_v14  ;;  %v3409_v11 = vsub.f32 %v7664_v32, %v7871_v48 }
 0x4db   : > { %v3305_v37 = vrot.slane %v3304_v9, 1  ;;  %v3313_v10 = vmax.f32 %v3311_v30, %v3312_v23  ;;  %v7913_v13 = vpop.f32.mrb[79].mxu0  ;;  %5814 = vpow2.f32 %v3471_v52  ;;  %v3475_v18 = vmul.f32 1.442695, %v3408_v3 }
 0x4dc   : > { %v3316_v0 = vsel %vm3180_vm1, %v7913_v13, -inf  ;;  %5816 = vpow2.f32 %v3473_v38  ;;  %v3410_v40 = vsub.f32 %v7670_v4, %v7871_v48  ;;  %v3318_v23 = vsel %vm3180_vm1, %v7895_v1, -inf }
 0x4dd   : > { %v3306_v21 = vmax.f32 %v3304_v9, %v3305_v37  ;;  %v3315_v17 = vmax.f32 %v3313_v10, %v3314_v39  ;;  %5818 = vpow2.f32 %v3475_v18  ;;  %v3477_v41 = vmul.f32 1.442695, %v3409_v11 }
 0x4de   : > { %v3411_v49 = vsub.f32 %v7662_v53, %v7871_v48  ;;  %v3479_v30 = vmul.f32 1.442695, %v3410_v40  ;;  %v3412_v32 = vsub.f32 %v7668_v58, %v7871_v48  ;;  %v3413_v4 = vsub.f32 %v7687_v62, %v7876_v2 }
 0x4df   : > { %v7926_v14 = vmax.f32 %v3306_v21, %v3354_v45  ;;  %v3317_v3 = vmax.f32 %v3315_v17, %v3316_v0  ;;  %5820 = vpow2.f32 %v3477_v41  ;;  %v3414_v39 = vsub.f32 %v7694_v61, %v7876_v2 }
 0x4e0   : > { %v7930_v9 = vpop.f32.mrb[80].mxu0  ;;  %v3481_v50 = vmul.f32 1.442695, %v3411_v49  ;;  %v3320_v53 = vsel %vm3180_vm1, %v7910_v56, -inf  ;;  %5822 = vpow2.f32 %v3479_v30  ;;  %v3483_v62 = vmul.f32 1.442695, %v3412_v32 }
 0x4e1   : > { %v3319_v45 = vmax.f32 %v3317_v3, %v3318_v23  ;;  %v3613_v52 = vrot.slane %v7926_v14, 3  ;;  %v7939_v37 = vpop.f32.mrb[81].mxu0  ;;  %v3331_v48 = vsel %vm3180_vm1, %v7930_v9, -inf  ;;  %v3485_v38 = vmul.f32 1.442695, %v3413_v4 }
 0x4e2   : > { %v7944_v10 = vpop.f32.mrb[82].mxu0  ;;  %v3328_v18 = vsel %vm3180_vm1, %v7939_v37, -inf  ;;  %5824 = vpow2.f32 %v3481_v50  ;;  %v3487_v40 = vmul.f32 1.442695, %v3414_v39  ;;  %v3415_v23 = vsub.f32 %v7681_v42, %v7876_v2 }
 0x4e3   : > { %v3321_v0 = vmax.f32 %v3319_v45, %v3320_v53  ;;  %v7947_v61 = vsel %vm2007_vm12, %v3613_v52, %v3612_v19  ;;  %v7951_v11 = vpop.f32.mrb[83].mxu0  ;;  %5826 = vpow2.f32 %v3483_v62  ;;  %v3416_v30 = vsub.f32 %v7691_v8, %v7876_v2 }
 0x4e4   : > { %v5813_v21 = vpop.eup %5812  ;;  %v3329_v17 = vsel %vm3180_vm1, %v7951_v11, -inf  ;;  %5828 = vpow2.f32 %v3485_v38  ;;  %v3489_v32 = vmul.f32 1.442695, %v3415_v23  ;;  %v3417_v50 = vsub.f32 %v7706_v25, %v7876_v2 }
 0x4e5   : > { %v3322_v41 = vrot.slane %v3321_v0, 4  ;;  %v3330_v49 = vmax.f32 %v3328_v18, %v3329_v17  ;;  %v3623_v19 = vsel %vm3180_vm1, %v5813_v21, 0.0  ;;  %v5815_v3 = vpop.eup %5814  ;;  %5830 = vpow2.f32 %v3487_v40 }
 0x4e6   : > { %v5817_v4 = vpop.eup %5816  ;;  %v3624_v45 = vsel %vm3180_vm1, %v5815_v3, 0.0  ;;  %v3815_v42 = vpack.c.bf16 %v5815_v3, %v5813_v21  ;;  %v3333_v62 = vsel %vm3180_vm1, %v7944_v10, -inf  ;;  %5832 = vpow2.f32 %v3489_v32 }
 0x4e7   : > { %v3323_v53 = vmax.f32 %v3321_v0, %v3322_v41  ;;  %v3332_v39 = vmax.f32 %v3330_v49, %v3331_v48  ;;  %v5819_v52 = vpop.eup %5818  ;;  %v3625_v38 = vadd.f32 %v3624_v45, %v3623_v19  ;;  %v3491_v17 = vmul.f32 1.442695, %v3416_v30 }
 0x4e8   : > { %v7965_v18 = vpop.f32.mrb[84].mxu0  ;;  %5535 = vmatprep.mubr.msk.bf16.mxu1 %vm3180_vm1, %v3815_v42  ;;  %v3626_v25 = vsel %vm3180_vm1, %v5817_v4, 0.0  ;;  %v3816_v40 = vpack.c.bf16 %v5819_v52, %v5817_v4  ;;  %v3628_v41 = vsel %vm3180_vm1, %v5819_v52, 0.0  ;;  %v3418_v45 = vsub.f32 %v7712_v47, %v7876_v2 }
 0x4e9   : > { %v3324_v8 = vrot.slane %v3323_v53, 2  ;;  %v3339_v48 = vsel %vm3180_vm1, %v7965_v18, -inf  ;;  %v7971_v0 = vpop.f32.mrb[85].mxu0  ;;  %v5821_v21 = vpop.eup %5820  ;;  %v3627_v23 = vadd.f32 %v3626_v25, %v3625_v38  ;;  %v3334_v49 = vmax.f32 %v3332_v39, %v3333_v62 }
 0x4ea   : > { %v3335_v19 = vsel %vm3180_vm1, %v7971_v0, -inf  ;;  %v7976_v3 = vpop.f32.mrb[86].mxu0  ;;  %5536 = vmatmul.mubr.msk.bf16.vlgmr.msra.gmra.mrb[48].mxu1 %vm3180_vm1, %v3816_v40  ;;  %v3630_v32 = vsel %vm3180_vm1, %v5821_v21, 0.0  ;;  %5834 = vpow2.f32 %v3491_v17  ;;  %v5823_v42 = vpop.eup %5822  ;;  %v3493_v62 = vmul.f32 1.442695, %v3417_v50 }
 0x4eb   : > { %v3325_v30 = vmax.f32 %v3323_v53, %v3324_v8  ;;  %v7980_v4 = vpop.f32.mrb[87].mxu0  ;;  %v3629_v38 = vadd.f32 %v3628_v41, %v3627_v23  ;;  %v3336_v52 = vmax.f32 %v3334_v49, %v3335_v19  ;;  %v3817_v53 = vpack.c.bf16 %v5823_v42, %v5821_v21 }
 0x4ec   : > { %v3337_v39 = vsel %vm3180_vm1, %v7980_v4, -inf  ;;  %v5825_v25 = vpop.eup %5824  ;;  %v3341_v8 = vsel %vm3180_vm1, %v7976_v3, -inf  ;;  %v3495_v40 = vmul.f32 1.442695, %v3418_v45  ;;  %v3632_v17 = vsel %vm3180_vm1, %v5823_v42, 0.0 }
 0x4ed   : > { %v3326_v58 = vrot.slane %v3325_v30, 1  ;;  %v5827_v60 = vpop.eup %5826  ;;  %v3631_v57 = vadd.f32 %v3630_v32, %v3629_v38  ;;  %v3338_v35 = vmax.f32 %v3336_v52, %v3337_v39  ;;  %5836 = vpow2.f32 %v3493_v62  ;;  %5539 = vmatprep.mubr.msk.bf16.mxu1 %vm3180_vm1, %v3817_v53 }
 0x4ee   : > { %v5829_v47 = vpop.eup %5828  ;;  %v3634_v41 = vsel %vm3180_vm1, %v5825_v25, 0.0  ;;  %v3818_v50 = vpack.c.bf16 %v5827_v60, %v5825_v25  ;;  %5838 = vpow2.f32 %v3495_v40  ;;  %v3419_v32 = vsub.f32 %v7704_v43, %v7876_v2 }
 0x4ef   : > { %v3327_v23 = vmax.f32 %v3325_v30, %v3326_v58  ;;  %v5831_v49 = vpop.eup %5830  ;;  %v3633_v21 = vadd.f32 %v3632_v17, %v3631_v57  ;;  %v3340_v19 = vmax.f32 %v3338_v35, %v3339_v48  ;;  %v3644_v20 = vsel %vm3180_vm1, %v5829_v47, 0.0 }
 0x4f0   : > { %v8681_v45 = vrot.slane %v7854_v5, 6  ;;  %v3645_v38 = vsel %vm3180_vm1, %v5831_v49, 0.0  ;;  %v3819_v58 = vpack.c.bf16 %v5831_v49, %v5829_v47  ;;  %v3420_v30 = vsub.f32 %v7710_v7, %v7876_v2  ;;  %v5833_v52 = vpop.eup %5832 }
 0x4f1   : > { %v3342_v39 = vmax.f32 %v3340_v19, %v3341_v8  ;;  %v3635_v62 = vadd.f32 %v3634_v41, %v3633_v21  ;;  %v3646_v25 = vadd.f32 %v3645_v38, %v3644_v20  ;;  %v3497_v57 = vmul.f32 1.442695, %v3419_v32 }
 0x4f2   : > { %v3371_v42 = vmax.f32 %v3327_v23, %v8681_v45  ;;  %v3636_v53 = vsel %vm3180_vm1, %v5827_v60, 0.0  ;;  %5540 = vmatmul.mubr.msk.bf16.gmra.mrb[52].mxu1 %vm3180_vm1, %v3818_v50  ;;  %v3647_v43 = vsel %vm3180_vm1, %v5833_v52, 0.0 }
 0x4f3   : > { %v3343_v40 = vrot.slane %v3342_v39, 4  ;;  %v3637_v17 = vadd.f32 %v3636_v53, %v3635_v62  ;;  %5543 = vmatprep.mubr.msk.bf16.mxu1 %vm3180_vm1, %v3819_v58  ;;  %v3648_v47 = vadd.f32 %v3647_v43, %v3646_v25  ;;  %5840 = vpow2.f32 %v3497_v57 }
 0x4f4   : > { %v3400_v35 = vrot.slane %v3371_v42, %v7357_v15  ;;  %v3615_v48 = vrot.slane %v3371_v42, 2  ;;  %v5835_v7 = vpop.eup %5834  ;;  %v3421_v43 = vsub.f32 %v7724_v12, %v7879_v51 }
 0x4f5   : > { %v3344_v42 = vmax.f32 %v3342_v39, %v3343_v40  ;;  %v3638_v58 = vrot.slane %v3637_v17, 4  ;;  %v3820_v62 = vpack.c.bf16 %v5835_v7, %v5833_v52 }
 0x4f6   : > { %v3453_v2 = vsub.f32 %v7863_v55, %v3400_v35  ;;  %v3454_v20 = vsub.f32 %v7873_v28, %v3400_v35  ;;  %v3455_v8 = vsub.f32 %v7856_v22, %v3400_v35  ;;  %v3456_v23 = vsub.f32 %v7865_v63, %v3400_v35 }
 0x4f7   : > { %v3457_v60 = vsub.f32 %v7905_v34, %v3400_v35  ;;  %v3458_v41 = vsub.f32 %v7913_v13, %v3400_v35  ;;  %v3459_v50 = vsub.f32 %v7895_v1, %v3400_v35  ;;  %v3460_v49 = vsub.f32 %v7910_v56, %v3400_v35  ;;  %v5837_v28 = vpop.eup %5836 }
 0x4f8   : > { %v3565_v21 = vmul.f32 1.442695, %v3453_v2  ;;  %v3567_v19 = vmul.f32 1.442695, %v3454_v20  ;;  %v3569_v32 = vmul.f32 1.442695, %v3455_v8  ;;  %v8014_v55 = vsel %vm2009_vm13, %v3615_v48, %v7947_v61  ;;  %v5839_v38 = vpop.eup %5838 }
 0x4f9   : > { %v3571_v45 = vmul.f32 1.442695, %v3456_v23  ;;  %v3573_v22 = vmul.f32 1.442695, %v3457_v60  ;;  %v3499_v63 = vmul.f32 1.442695, %v3420_v30  ;;  %v8017_v57 = vadd.f32 %v3638_v58, %v3637_v17 }
 0x4fa   : > { %5842 = vpow2.f32 %v3565_v21  ;;  %v3575_v34 = vmul.f32 1.442695, %v3458_v41  ;;  %v3577_v13 = vmul.f32 1.442695, %v3459_v50  ;;  %v3345_v1 = vrot.slane %v3344_v42, 2  ;;  %5544 = vmatmul.mubr.msk.bf16.gmra.mrb[56].mxu1 %vm3180_vm1, %v3820_v62 }
 0x4fb   : > { %5844 = vpow2.f32 %v3567_v19  ;;  %v3649_v56 = vsel %vm3180_vm1, %v5835_v7, 0.0  ;;  %v3579_v25 = vmul.f32 1.442695, %v3460_v49  ;;  %v3651_v30 = vsel %vm3180_vm1, %v5837_v28, 0.0 }
 0x4fc   : > { %5846 = vpow2.f32 %v3569_v32  ;;  %v3650_v61 = vadd.f32 %v3649_v56, %v3648_v47  ;;  %v3346_v35 = vmax.f32 %v3344_v42, %v3345_v1  ;;  %v3821_v39 = vpack.c.bf16 %v5839_v38, %v5837_v28 }
 0x4fd   : > { %5848 = vpow2.f32 %v3571_v45  ;;  %v3653_v53 = vsel %vm3180_vm1, %v5839_v38, 0.0  ;;  %v8024_v52 = vpop.eup %5840  ;;  %v3422_v17 = vsub.f32 %v7728_v16, %v7879_v51  ;;  %v3423_v47 = vsub.f32 %v7720_v54, %v7879_v51 }
 0x4fe   : > { %5850 = vpow2.f32 %v3573_v22  ;;  %v3652_v48 = vadd.f32 %v3651_v30, %v3650_v61  ;;  %v3347_v40 = vrot.slane %v3346_v35, 1  ;;  %5547 = vmatprep.mubr.msk.bf16.mxu1 %vm3180_vm1, %v3821_v39  ;;  %v3640_v7 = vrot.slane %v8017_v57, 2 }
 0x4ff   : > { %5852 = vpow2.f32 %v3575_v34  ;;  %v3655_v20 = vsel %vm3180_vm1, %v8024_v52, 0.0  ;;  %v3501_v8 = vmul.f32 1.442695, %v3421_v43  ;;  %v3503_v23 = vmul.f32 1.442695, %v3422_v17 }
 0x500   : > { %5854 = vpow2.f32 %v3577_v13  ;;  %v3654_v2 = vadd.f32 %v3653_v53, %v3652_v48  ;;  %v3348_v12 = vmax.f32 %v3346_v35, %v3347_v40  ;;  %v3424_v16 = vsub.f32 %v7726_v27, %v7879_v51 }
 0x501   : > { %5856 = vpow2.f32 %v3579_v25  ;;  %v3505_v41 = vmul.f32 1.442695, %v3423_v47  ;;  %v8682_v54 = vrot.slane %v7854_v5, 7  ;;  %v3425_v49 = vsub.f32 %v7740_v31, %v7879_v51 }
 0x502   : > { %5858 = vpow2.f32 %v3499_v63  ;;  %v8034_v60 = vadd.f32 %v3655_v20, %v3654_v2  ;;  %v3426_v21 = vsub.f32 %v7746_v29, %v7879_v51  ;;  %v3507_v32 = vmul.f32 1.442695, %v3424_v16 }
 0x503   : > { %v3372_v50 = vmax.f32 %v3348_v12, %v8682_v54  ;;  %5860 = vpow2.f32 %v3501_v8  ;;  %v3427_v28 = vsub.f32 %v7738_v36, %v7879_v51  ;;  %v3428_v27 = vsub.f32 %v7744_v24, %v7879_v51 }
 0x504   : > { %v8044_v19 = vpop.eup %5842  ;;  %5862 = vpow2.f32 %v3503_v23  ;;  %v8059_v38 = vmul.f32 1.442695, %v3425_v49  ;;  %v8061_v34 = vmul.f32 1.442695, %v3426_v21  ;;  %v3430_v36 = vsub.f32 %v7760_v26, %v7886_v44 }
 0x505   : > { %v8050_v45 = vpop.eup %5844  ;;  %v3749_v22 = vsel %vm3180_vm1, %v8044_v19, 0.0  ;;  %v3404_v31 = vrot.slane %v3372_v50, %v7357_v15  ;;  %v3617_v42 = vrot.slane %v3372_v50, 1  ;;  %5864 = vpow2.f32 %v3505_v41 }
 0x506   : > { %v8055_v29 = vpop.eup %5846  ;;  %v3750_v63 = vsel %vm3180_vm1, %v8050_v45, 0.0  ;;  %5866 = vpow2.f32 %v3507_v32  ;;  %v8125_v51 = vrot.slane %v7926_v14, %v7357_v15  ;;  %v3519_v15 = vmul.f32 1.442695, %v3430_v36 }
 0x507   : > { %v8063_v13 = vpop.eup %5848  ;;  %v3751_v58 = vadd.f32 %v3750_v63, %v3749_v22  ;;  %v3752_v1 = vsel %vm3180_vm1, %v8055_v29, 0.0  ;;  %v3461_v56 = vsub.f32 %v7939_v37, %v3404_v31  ;;  %v3462_v62 = vsub.f32 %v7951_v11, %v3404_v31 }
 0x508   : > { %v8069_v25 = vpop.eup %5850  ;;  %v3754_v61 = vsel %vm3180_vm1, %v8063_v13, 0.0  ;;  %v3463_v35 = vsub.f32 %v7930_v9, %v3404_v31  ;;  %v3464_v30 = vsub.f32 %v7944_v10, %v3404_v31  ;;  %v3465_v39 = vsub.f32 %v7971_v0, %v3404_v31 }
 0x509   : > { %v8076_v48 = vpop.eup %5852  ;;  %v3753_v53 = vadd.f32 %v3752_v1, %v3751_v58  ;;  %v3756_v43 = vsel %vm3180_vm1, %v8069_v25, 0.0  ;;  %v3466_v37 = vsub.f32 %v7980_v4, %v3404_v31  ;;  %v3467_v11 = vsub.f32 %v7965_v18, %v3404_v31 }
 0x50a   : > { %v8082_v40 = vpop.eup %5854  ;;  %v3758_v17 = vsel %vm3180_vm1, %v8076_v48, 0.0  ;;  %v3468_v9 = vsub.f32 %v7976_v3, %v3404_v31  ;;  %v3581_v10 = vmul.f32 1.442695, %v3461_v56  ;;  %v3583_v47 = vmul.f32 1.442695, %v3462_v62 }
 0x50b   : > { %v8087_v0 = vpop.eup %5856  ;;  %v3755_v2 = vadd.f32 %v3754_v61, %v3753_v53  ;;  %v3760_v20 = vsel %vm3180_vm1, %v8082_v40, 0.0  ;;  %v3585_v12 = vmul.f32 1.442695, %v3463_v35  ;;  %v3587_v8 = vmul.f32 1.442695, %v3464_v30 }
 0x50c   : > { %v5859_v4 = vpop.eup %5858  ;;  %v3762_v18 = vsel %vm3180_vm1, %v8087_v0, 0.0  ;;  %5868 = vpow2.f32 %v3581_v10  ;;  %v3589_v23 = vmul.f32 1.442695, %v3465_v39  ;;  %v3591_v16 = vmul.f32 1.442695, %v3466_v37 }
 0x50d   : > { %v5861_v41 = vpop.eup %5860  ;;  %v3757_v54 = vadd.f32 %v3756_v43, %v3755_v2  ;;  %5870 = vpow2.f32 %v3583_v47  ;;  %v3593_v3 = vmul.f32 1.442695, %v3467_v11  ;;  %v3595_v50 = vmul.f32 1.442695, %v3468_v9 }
 0x50e   : > { %v5863_v49 = vpop.eup %5862  ;;  %5872 = vpow2.f32 %v3585_v12  ;;  %v3618_v21 = vsel %vm2011_vm14, %v3617_v42, %v8014_v55  ;;  %v3657_v32 = vsel %vm3180_vm1, %v5859_v4, 0.0  ;;  %v3822_v22 = vpack.c.bf16 %v5859_v4, %v8024_v52 }
 0x50f   : > { %v5865_v31 = vpop.eup %5864  ;;  %v3759_v63 = vadd.f32 %v3758_v17, %v3757_v54  ;;  %5874 = vpow2.f32 %v3587_v8  ;;  %v3620_v58 = vsub.f32 %v7854_v5, %v3618_v21  ;;  %v3658_v1 = vadd.f32 %v3657_v32, %v8034_v60  ;;  %v8683_v21 = vld [vmem:[#allocation29_spill] sm:$0xff] }
 0x510   : > { %v5867_v56 = vpop.eup %5866  ;;  %5876 = vpow2.f32 %v3589_v23  ;;  %5548 = vmatmul.mubr.msk.bf16.gmra.mrb[60].mxu1 %vm3180_vm1, %v3822_v22  ;;  %v3665_v62 = vsel %vm3180_vm1, %v5861_v41, 0.0  ;;  %v3666_v61 = vsel %vm3180_vm1, %v5863_v49, 0.0  ;;  %v3823_v55 = vpack.c.bf16 %v5863_v49, %v5861_v41 }
 0x511   : > { %v3761_v42 = vadd.f32 %v3760_v20, %v3759_v63  ;;  %5878 = vpow2.f32 %v3591_v16  ;;  %v3621_v35 = vmul.f32 1.442695, %v3620_v58  ;;  %v3659_v52 = vrot.slane %v3658_v1, 4  ;;  %v8684_v58 = vld [vmem:[#allocation27_spill] sm:$0xff] }
 0x512   : > { %5880 = vpow2.f32 %v3593_v3  ;;  %v3667_v30 = vadd.f32 %v3666_v61, %v3665_v62  ;;  %5551 = vmatprep.mubr.msk.bf16.mxu1 %vm3180_vm1, %v3823_v55  ;;  %v3668_v5 = vsel %vm3180_vm1, %v5865_v31, 0.0  ;;  %v3670_v60 = vsel %vm3180_vm1, %v5867_v56, 0.0  ;;  %v8685_v55 = vld [vmem:[#allocation28_spill] sm:$0xff] }
 0x513   : > { %v3763_v39 = vadd.f32 %v3762_v18, %v3761_v42  ;;  %5882 = vpow2.f32 %v3595_v50  ;;  %v3660_v53 = vadd.f32 %v3659_v52, %v3658_v1  ;;  %v3824_v43 = vpack.c.bf16 %v5867_v56, %v5865_v31 }
 0x514   : > { %5884 = vpow2.f32 %v3621_v35  ;;  %v3669_v37 = vadd.f32 %v3668_v5, %v3667_v30  ;;  %v3513_v11 = vmul.f32 1.442695, %v3427_v28  ;;  %v3515_v17 = vmul.f32 1.442695, %v3428_v27 }
 0x515   : > { %v3764_v9 = vrot.slane %v3763_v39, 4  ;;  %v3661_v10 = vrot.slane %v3660_v53, 2  ;;  %5886 = vpow2.f32 %v8059_v38  ;;  %v3429_v47 = vsub.f32 %v7756_v59, %v7886_v44 }
 0x516   : > { %v8114_v2 = vpop.eup %5868  ;;  %v3671_v20 = vadd.f32 %v3670_v60, %v3669_v37  ;;  %5888 = vpow2.f32 %v8061_v34  ;;  %v3431_v28 = vsub.f32 %v7754_v33, %v7886_v44  ;;  %v8132_v27 = vadd.f32 %v3640_v7, %v8017_v57  ;;  %v8687_v37 = vld [vmem:[#allocation22_spill] sm:$0xff] }
 0x517   : > { %v8121_v24 = vpop.eup %5870  ;;  %v3770_v59 = vsel %vm3180_vm1, %v8114_v2, 0.0  ;;  %5890 = vpow2.f32 %v3513_v11  ;;  %v3517_v26 = vmul.f32 1.442695, %v3429_v47  ;;  %v8141_v34 = vadd.f32 %v3764_v9, %v3763_v39 }
 0x518   : > { %v8134_v38 = vpop.eup %5872  ;;  %v3771_v33 = vsel %vm3180_vm1, %v8121_v24, 0.0  ;;  %5552 = vmatmul.mubr.msk.bf16.gmra.mrb[64].mxu1 %vm3180_vm1, %v3824_v43  ;;  %5892 = vpow2.f32 %v3515_v17  ;;  %v8143_v8 = vadd.f32 %v3661_v10, %v3660_v53  ;;  %v3432_v57 = vsub.f32 %v7758_v46, %v7886_v44  ;;  %v8686_v43 = vld [vmem:[#allocation39_spill] sm:$0xff] }
 0x519   : > { %v8139_v14 = vpop.eup %5874  ;;  %v3772_v12 = vadd.f32 %v3771_v33, %v3770_v59  ;;  %v3773_v4 = vsel %vm3180_vm1, %v8134_v38, 0.0  ;;  %5894 = vpow2.f32 %v3517_v26  ;;  %v3521_v18 = vmul.f32 1.442695, %v3431_v28  ;;  %v8688_v59 = vld [vmem:[#allocation23_spill] sm:$0xff] }
 0x51a   : > { %v8147_v7 = vpop.eup %5876  ;;  %v3433_v23 = vsub.f32 %v7772_v6, %v7886_v44  ;;  %v3775_v54 = vsel %vm3180_vm1, %v8139_v14, 0.0  ;;  %5896 = vpow2.f32 %v3519_v15  ;;  %v3523_v49 = vmul.f32 1.442695, %v3432_v57  ;;  %v8689_v15 = vld [vmem:[#allocation26_spill] sm:$0xff] }
 0x51b   : > { %v8153_v16 = vpop.eup %5878  ;;  %v3774_v41 = vadd.f32 %v3773_v4, %v3772_v12  ;;  %v3777_v3 = vsel %vm3180_vm1, %v8147_v7, 0.0  ;;  %5898 = vpow2.f32 %v3521_v18  ;;  %v3434_v6 = vsub.f32 %v8683_v21, %v7886_v44 }
 0x51c   : > { %v8159_v46 = vpop.eup %5880  ;;  %v3779_v50 = vsel %vm3180_vm1, %v8153_v16, 0.0  ;;  %v3525_v63 = vmul.f32 1.442695, %v3433_v23  ;;  %v3435_v1 = vsub.f32 %v8684_v58, %v7886_v44  ;;  %5900 = vpow2.f32 %v3523_v49 }
 0x51d   : > { %v8165_v32 = vpop.eup %5882  ;;  %v3776_v22 = vadd.f32 %v3775_v54, %v3774_v41  ;;  %v3781_v31 = vsel %vm3180_vm1, %v8159_v46, 0.0  ;;  %v3527_v61 = vmul.f32 1.442695, %v3434_v6  ;;  %v3436_v42 = vsub.f32 %v8685_v55, %v7886_v44  ;;  %v8691_v54 = vld [vmem:[#allocation30_spill] sm:$0xff] }
 0x51e   : > { %v8171_v56 = vpop.eup %5884  ;;  %v3783_v62 = vsel %vm3180_vm1, %v8165_v32, 0.0  ;;  %5902 = vpow2.f32 %v3525_v63  ;;  %v3529_v5 = vmul.f32 1.442695, %v3435_v1  ;;  %v3437_v11 = vsub.f32 %v8687_v37, %v8686_v43 }
 0x51f   : > { %v5887_v35 = vpop.eup %5886  ;;  %v3778_v52 = vadd.f32 %v3777_v3, %v3776_v22  ;;  %v4269_v30 = vpack.c.bf16 %v8171_v56, %v8171_v56  ;;  %5904 = vpow2.f32 %v3527_v61  ;;  %v3531_v53 = vmul.f32 1.442695, %v3436_v42 }
 0x520   : > { %v5889_v60 = vpop.eup %5888  ;;  %v3672_v39 = vsel %vm3180_vm1, %v5887_v35, 0.0  ;;  %5906 = vpow2.f32 %v3529_v5  ;;  %v3438_v33 = vsub.f32 %v8688_v59, %v8686_v43  ;;  %v3533_v26 = vmul.f32 1.442695, %v3437_v11  ;;  %v8693_v5 = vld [vmem:[#allocation18_spill] sm:$0xff] }
 0x521   : > { %v5891_v17 = vpop.eup %5890  ;;  %v3780_v9 = vadd.f32 %v3779_v50, %v3778_v52  ;;  %v3673_v10 = vadd.f32 %v3672_v39, %v3671_v20  ;;  %v3674_v44 = vsel %vm3180_vm1, %v5889_v60, 0.0  ;;  %v3825_v47 = vpack.c.bf16 %v5889_v60, %v5887_v35  ;;  %5602 = vmatmul.mubr.msk.bf16.vlgmr.msra.gmra.mrb[88].mxu0 %vm3180_vm1, %v4269_v30  ;;  %v8692_v50 = vld [vmem:[#allocation24_spill] sm:$0xff] }
 0x522   : > { %v5893_v36 = vpop.eup %5892  ;;  %v3676_v28 = vsel %vm3180_vm1, %v5891_v17, 0.0  ;;  %5606 = vmatpush3.bf16.msra.mxu0 %v8689_v15  ;;  %v8690_v12 = vmov 0.0   ;;  %5908 = vpow2.f32 %v3531_v53  ;;  %v3535_v41 = vmul.f32 1.442695, %v3438_v33  ;;  %v8694_v39 = vld [vmem:[#allocation20_spill] sm:$0xff] }
 0x523   : > { %5607 = vmatprep.mubr.msk.bf16.mxu0 %vm6178_vm15, %v8690_v12  ;;  %v3782_v57 = vadd.f32 %v3781_v31, %v3780_v9  ;;  %v3675_v20 = vadd.f32 %v3674_v44, %v3673_v10  ;;  %5555 = vmatprep.mubr.msk.bf16.mxu1 %vm3180_vm1, %v3825_v47  ;;  %v3678_v4 = vsel %vm3180_vm1, %v5893_v36, 0.0  ;;  %v3826_v18 = vpack.c.bf16 %v5893_v36, %v5891_v17  ;;  %v5895_v23 = vpop.eup %5894 }
 0x524   : > { %5611 = vmatprep.subr.bf16.mxu0 %v8690_v12  ;;  %v3439_v3 = vsub.f32 %v8691_v54, %v8686_v43  ;;  %v3440_v49 = vsub.f32 %v8692_v50, %v8686_v43  ;;  %v5897_v21 = vpop.eup %5896  ;;  %v3686_v31 = vsel %vm3180_vm1, %v5895_v23, 0.0  ;;  %5910 = vpow2.f32 %v3533_v26  ;;  %v8696_v50 = vld [vmem:[#allocation19_spill] sm:$0xff] }
 0x525   : > { %v3784_v6 = vadd.f32 %v3783_v62, %v3782_v57  ;;  %v3677_v22 = vadd.f32 %v3676_v28, %v3675_v20  ;;  %5556 = vmatmul.mubr.msk.bf16.gmra.mrb[68].mxu1 %vm3180_vm1, %v3826_v18  ;;  %v5899_v63 = vpop.eup %5898  ;;  %v3687_v58 = vsel %vm3180_vm1, %v5897_v21, 0.0  ;;  %v3827_v1 = vpack.c.bf16 %v5897_v21, %v5895_v23  ;;  %v8695_v18 = vld [vmem:[#allocation17_spill] sm:$0xff] }
 0x526   : > { %5912 = vpow2.f32 %v3535_v41  ;;  %v3537_v61 = vmul.f32 1.442695, %v3439_v3  ;;  %v3688_v35 = vadd.f32 %v3687_v58, %v3686_v31  ;;  %v3689_v52 = vsel %vm3180_vm1, %v5899_v63, 0.0  ;;  %v5901_v30 = vpop.eup %5900 }
 0x527   : > { %v3785_v55 = vrot.slane %v3784_v6, 4  ;;  %v3679_v42 = vadd.f32 %v3678_v4, %v3677_v22  ;;  %5559 = vmatprep.mubr.msk.bf16.mxu1 %vm3180_vm1, %v3827_v1  ;;  %v3539_v62 = vmul.f32 1.442695, %v3440_v49  ;;  %v3441_v60 = vsub.f32 %v8693_v5, %v8686_v43  ;;  %v8697_v22 = vld [vmem:[#allocation32_spill] sm:$0xff] }
 0x528   : > { %5914 = vpow2.f32 %v3537_v61  ;;  %v3442_v53 = vsub.f32 %v8694_v39, %v8686_v43  ;;  %v5903_v37 = vpop.eup %5902  ;;  %v3766_v11 = vrot.slane %v8141_v34, 2  ;;  %v3690_v10 = vadd.f32 %v3689_v52, %v3688_v35 }
 0x529   : > { %v8207_v17 = vadd.f32 %v3785_v55, %v3784_v6  ;;  %v3680_v9 = vrot.slane %v3679_v42, 4  ;;  %v5905_v44 = vpop.eup %5904  ;;  %v3691_v47 = vsel %vm3180_vm1, %v5901_v30, 0.0  ;;  %v3828_v36 = vpack.c.bf16 %v5901_v30, %v5899_v63  ;;  %v8698_v63 = vld [vmem:[#allocation34_spill] sm:$0xff] }
 0x52a   : > { %5916 = vpow2.f32 %v3539_v62  ;;  %v3541_v28 = vmul.f32 1.442695, %v3441_v60  ;;  %v3692_v33 = vadd.f32 %v3691_v47, %v3690_v10  ;;  %v3693_v26 = vsel %vm3180_vm1, %v5903_v37, 0.0  ;;  %v5907_v57 = vpop.eup %5906 }
 0x52b   : > { %v8210_v59 = vadd.f32 %v3680_v9, %v3679_v42  ;;  %v3695_v15 = vsel %vm3180_vm1, %v5905_v44, 0.0  ;;  %v3829_v20 = vpack.c.bf16 %v5905_v44, %v5903_v37  ;;  %v3543_v4 = vmul.f32 1.442695, %v3442_v53  ;;  %v8699_v9 = vld [vmem:[#allocation31_spill] sm:$0xff]  ;;  %v8700_v44 = vld [vmem:[#allocation33_spill] sm:$0xff] }
 0x52c   : > { %5918 = vpow2.f32 %v3541_v28  ;;  %v3443_v23 = vsub.f32 %v8695_v18, %v8686_v43  ;;  %v3694_v54 = vadd.f32 %v3693_v26, %v3692_v33  ;;  %v3697_v3 = vsel %vm3180_vm1, %v5907_v57, 0.0  ;;  %v5909_v21 = vpop.eup %5908  ;;  %v8701_v33 = vld [vmem:[#allocation36_spill] sm:$0xff]  ;;  %v8702_v18 = vld [vmem:[#allocation38_spill] sm:$0xff] }
 0x52d   : > { %v3682_v41 = vrot.slane %v8210_v59, 2  ;;  %5560 = vmatmul.mubr.msk.bf16.gmra.mrb[72].mxu1 %vm3180_vm1, %v3828_v36  ;;  %v3444_v49 = vsub.f32 %v8696_v50, %v8686_v43  ;;  %5920 = vpow2.f32 %v3543_v4  ;;  %v3445_v31 = vsub.f32 %v8697_v22, %v8125_v51 }
 0x52e   : > { %5563 = vmatprep.mubr.msk.bf16.mxu1 %vm3180_vm1, %v3829_v20  ;;  %v3545_v6 = vmul.f32 1.442695, %v3443_v23  ;;  %v3446_v58 = vsub.f32 %v8698_v63, %v8125_v51  ;;  %v5911_v1 = vpop.eup %5910  ;;  %v3696_v61 = vadd.f32 %v3695_v15, %v3694_v54  ;;  %v3699_v55 = vsel %vm3180_vm1, %v5909_v21, 0.0 }
 0x52f   : > { %v3830_v42 = vpack.c.bf16 %v5909_v21, %v5907_v57  ;;  %v3547_v35 = vmul.f32 1.442695, %v3444_v49  ;;  %v3707_v43 = vsel %vm3180_vm1, %v5911_v1, 0.0  ;;  %v3549_v30 = vmul.f32 1.442695, %v3445_v31  ;;  %v8703_v49 = vld [vmem:[#allocation35_spill] sm:$0xff] }
 0x530   : > { %v5913_v52 = vpop.eup %5912  ;;  %5922 = vpow2.f32 %v3545_v6  ;;  %v3551_v62 = vmul.f32 1.442695, %v3446_v58  ;;  %v3698_v5 = vadd.f32 %v3697_v3, %v3696_v61  ;;  %v3447_v10 = vsub.f32 %v8699_v9, %v8125_v51 }
 0x531   : > { %v3708_v60 = vsel %vm3180_vm1, %v5913_v52, 0.0  ;;  %v3831_v39 = vpack.c.bf16 %v5913_v52, %v5911_v1  ;;  %5924 = vpow2.f32 %v3547_v35  ;;  %v3448_v47 = vsub.f32 %v8700_v44, %v8125_v51  ;;  %v8704_v52 = vld [vmem:[#allocation37_spill] sm:$0xff] }
 0x532   : > { %v5915_v53 = vpop.eup %5914  ;;  %v3709_v37 = vadd.f32 %v3708_v60, %v3707_v43  ;;  %5926 = vpow2.f32 %v3549_v30  ;;  %v3700_v36 = vadd.f32 %v3699_v55, %v3698_v5  ;;  %v3449_v26 = vsub.f32 %v8701_v33, %v8125_v51 }
 0x533   : > { %v3710_v28 = vsel %vm3180_vm1, %v5915_v53, 0.0  ;;  %5928 = vpow2.f32 %v3551_v62  ;;  %v3553_v20 = vmul.f32 1.442695, %v3447_v10  ;;  %v3555_v4 = vmul.f32 1.442695, %v3448_v47 }
 0x534   : > { %v5917_v15 = vpop.eup %5916  ;;  %v3711_v57 = vadd.f32 %v3710_v28, %v3709_v37  ;;  %v3450_v23 = vsub.f32 %v8702_v18, %v8125_v51  ;;  %v3701_v54 = vrot.slane %v3700_v36, 4  ;;  %v3451_v21 = vsub.f32 %v8703_v49, %v8125_v51 }
 0x535   : > { %5564 = vmatmul.mubr.msk.bf16.gmra.mrb[76].mxu1 %vm3180_vm1, %v3830_v42  ;;  %v3712_v3 = vsel %vm3180_vm1, %v5917_v15, 0.0  ;;  %v3832_v50 = vpack.c.bf16 %v5917_v15, %v5915_v53  ;;  %5930 = vpow2.f32 %v3553_v20  ;;  %v3557_v31 = vmul.f32 1.442695, %v3449_v26 }
 0x536   : > { %v5919_v6 = vpop.eup %5918  ;;  %5567 = vmatprep.mubr.msk.bf16.mxu1 %vm3180_vm1, %v3831_v39  ;;  %v3713_v22 = vadd.f32 %v3712_v3, %v3711_v57  ;;  %v3559_v63 = vmul.f32 1.442695, %v3450_v23  ;;  %v3702_v58 = vadd.f32 %v3701_v54, %v3700_v36  ;;  %5932 = vpow2.f32 %v3555_v4 }
 0x537   : > { %v3714_v1 = vsel %vm3180_vm1, %v5919_v6, 0.0  ;;  %v3561_v61 = vmul.f32 1.442695, %v3451_v21  ;;  %v5921_v55 = vpop.eup %5920  ;;  %v3767_v42 = vadd.f32 %v3766_v11, %v8141_v34  ;;  %5934 = vpow2.f32 %v3557_v31 }
 0x538   : > { %v3715_v35 = vadd.f32 %v3714_v1, %v3713_v22  ;;  %v3452_v43 = vsub.f32 %v8704_v52, %v8125_v51  ;;  %v3787_v30 = vrot.slane %v8207_v17, 2  ;;  %v3716_v62 = vsel %vm3180_vm1, %v5921_v55, 0.0 }
 0x539   : > { %v3833_v5 = vpack.c.bf16 %v5921_v55, %v5919_v6  ;;  %5936 = vpow2.f32 %v3559_v63  ;;  %v3642_v37 = vrot.slane %v8132_v27, 1  ;;  %v3663_v9 = vrot.slane %v8143_v8, 1 }
 0x53a   : > { %v5923_v60 = vpop.eup %5922  ;;  %v3717_v39 = vadd.f32 %v3716_v62, %v3715_v35  ;;  %v3563_v53 = vmul.f32 1.442695, %v3452_v43  ;;  %5938 = vpow2.f32 %v3561_v61  ;;  %v3683_v51 = vadd.f32 %v3682_v41, %v8210_v59 }
 0x53b   : > { %v5925_v10 = vpop.eup %5924  ;;  %v3718_v34 = vsel %vm3180_vm1, %v5923_v60, 0.0  ;;  %v3703_v11 = vrot.slane %v3702_v58, 2  ;;  %v3768_v20 = vrot.slane %v3767_v42, 1  ;;  %v3788_v18 = vadd.f32 %v3787_v30, %v8207_v17 }
 0x53c   : > { %v5927_v44 = vpop.eup %5926  ;;  %v3719_v47 = vadd.f32 %v3718_v34, %v3717_v39  ;;  %v3720_v36 = vsel %vm3180_vm1, %v5925_v10, 0.0  ;;  %v3834_v28 = vpack.c.bf16 %v5925_v10, %v5923_v60  ;;  %5940 = vpow2.f32 %v3563_v53 }
 0x53d   : > { %v5929_v33 = vpop.eup %5928  ;;  %5568 = vmatmul.mubr.msk.bf16.gmra.mrb[80].mxu1 %vm3180_vm1, %v3832_v50  ;;  %v3728_v26 = vsel %vm3180_vm1, %v5927_v44, 0.0  ;;  %v3684_v15 = vrot.slane %v3683_v51, 1  ;;  %v3704_v57 = vadd.f32 %v3703_v11, %v3702_v58  ;;  %v3643_v54 = vadd.f32 %v3642_v37, %v8132_v27 }
 0x53e   : > { %5571 = vmatprep.mubr.msk.bf16.mxu1 %vm3180_vm1, %v3833_v5  ;;  %v3721_v4 = vadd.f32 %v3720_v36, %v3719_v47  ;;  %v3729_v59 = vsel %vm3180_vm1, %v5929_v33, 0.0  ;;  %v3835_v41 = vpack.c.bf16 %v5929_v33, %v5927_v44  ;;  %v3664_v50 = vadd.f32 %v3663_v9, %v8143_v8 }
 0x53f   : > { %v3730_v23 = vadd.f32 %v3729_v59, %v3728_v26  ;;  %v3705_v3 = vrot.slane %v3704_v57, 1  ;;  %v5931_v49 = vpop.eup %5930  ;;  %v3685_v6 = vadd.f32 %v3684_v15, %v3683_v51  ;;  %v3789_v22 = vrot.slane %v3788_v18, 1 }
 0x540   : > { %v3722_v21 = vrot.slane %v3721_v4, 4  ;;  %v5933_v31 = vpop.eup %5932  ;;  %v3731_v63 = vsel %vm3180_vm1, %v5931_v49, 0.0  ;;  %v3769_v58 = vadd.f32 %v3768_v20, %v3767_v42  ;;  %v3792_v1 = vrot.slane %v8171_v56, 1 }
 0x541   : > { %v3793_v61 = vrot.slane %v8171_v56, 2  ;;  %v5935_v55 = vpop.eup %5934  ;;  %v3732_v17 = vadd.f32 %v3731_v63, %v3730_v23  ;;  %v3836_v35 = vpack.c.bf16 %v5933_v31, %v5931_v49  ;;  %v3794_v27 = vrot.slane %v8171_v56, 3 }
 0x542   : > { %v3723_v52 = vadd.f32 %v3722_v21, %v3721_v4  ;;  %v3733_v30 = vsel %vm3180_vm1, %v5933_v31, 0.0  ;;  %v3706_v8 = vadd.f32 %v3705_v3, %v3704_v57  ;;  %v3790_v62 = vadd.f32 %v3789_v22, %v3788_v18 }
 0x543   : > { %v5937_v43 = vpop.eup %5936  ;;  %v3795_v5 = vrot.slane %v8171_v56, 4  ;;  %v3734_v60 = vadd.f32 %v3733_v30, %v3732_v17  ;;  %v3735_v42 = vsel %vm3180_vm1, %v5935_v55, 0.0  ;;  %v3797_v9 = vrot.slane %v8171_v56, 6 }
 0x544   : > { %v3837_v39 = vpack.c.bf16 %v5937_v43, %v5935_v55  ;;  %v3724_v53 = vrot.slane %v3723_v52, 2  ;;  %v5939_v37 = vpop.eup %5938  ;;  %v3798_v10 = vrot.slane %v8171_v56, 7  ;;  %v3807_v34 = vadd.f32 %v8171_v56, %v3643_v54 }
 0x545   : > { %5572 = vmatmul.mubr.msk.bf16.gmra.mrb[84].mxu1 %vm3180_vm1, %v3834_v28  ;;  %v3808_v51 = vadd.f32 %v3792_v1, %v3664_v50  ;;  %v3736_v44 = vadd.f32 %v3735_v42, %v3734_v60  ;;  %v3809_v36 = vadd.f32 %v3793_v61, %v3685_v6  ;;  %v3810_v33 = vadd.f32 %v3794_v27, %v3706_v8 }
 0x546   : > { %v5941_v11 = vpop.eup %5940  ;;  %5575 = vmatprep.mubr.msk.bf16.mxu1 %vm3180_vm1, %v3835_v41  ;;  %v3725_v47 = vadd.f32 %v3724_v53, %v3723_v52  ;;  %v3737_v26 = vsel %vm3180_vm1, %v5937_v43, 0.0  ;;  %v3813_v15 = vadd.f32 %v3797_v9, %v3769_v58  ;;  %v3814_v57 = vadd.f32 %v3798_v10, %v3790_v62 }
 0x547   : > { %v4730_v20 = vpack.c.bf16 %v3807_v34, %v3807_v34  ;;  %v3738_v28 = vadd.f32 %v3737_v26, %v3736_v44  ;;  %v4731_v59 = vpack.c.bf16 %v3808_v51, %v3808_v51  ;;  %v4732_v18 = vpack.c.bf16 %v3809_v36, %v3809_v36  ;;  %v8318_v44 = vpop.permute.xlu1 %4385  ;;  %v8322_v36 = vpop.permute.xlu0 %4369 }
 0x548   : > { %v3726_v4 = vrot.slane %v3725_v47, 1  ;;  %v3739_v23 = vsel %vm3180_vm1, %v5939_v37, 0.0  ;;  %v4733_v54 = vpack.c.bf16 %v3810_v33, %v3810_v33  ;;  %v3741_v50 = vsel %vm3180_vm1, %v5941_v11, 0.0 }
 0x549   : > { %v3740_v3 = vadd.f32 %v3739_v23, %v3738_v28  ;;  %v4747_v21 = vunpack.c.l.b16 %v4731_v59  ;;  %v4748_v41 = vunpack.c.l.b16 %v4732_v18  ;;  %v4746_v6 = vunpack.c.l.b16 %v4730_v20 }
 0x54a   : > { %v3727_v49 = vadd.f32 %v3726_v4, %v3725_v47  ;;  %v4749_v22 = vunpack.c.l.b16 %v4733_v54  ;;  %v3838_v31 = vpack.c.bf16 %v5941_v11, %v5939_v37  ;;  %v3839_v17 = vpack.c.bf16 %v8050_v45, %v8044_v19 }
 0x54b   : > { %v3742_v63 = vadd.f32 %v3741_v50, %v3740_v3  ;;  %v4754_v1 = vrot.slane %v4747_v21, 7  ;;  %v4756_v61 = vrot.slane %v4748_v41, 6  ;;  %v3840_v30 = vpack.c.bf16 %v8063_v13, %v8055_v29  ;;  %v8320_v47 = vpop.permute.xlu1 %4393  ;;  %v8326_v26 = vpop.permute.xlu0 %4377 }
 0x54c   : > { %v3811_v58 = vadd.f32 %v3795_v5, %v3727_v49  ;;  %v4758_v55 = vrot.slane %v4749_v22, 5  ;;  %v3841_v62 = vpack.c.bf16 %v8076_v48, %v8069_v25  ;;  %v3843_v19 = vpack.c.bf16 %v8121_v24, %v8114_v2 }
 0x54d   : > { %5576 = vmatmul.mubr.msk.bf16.gmra.mrb[88].mxu1 %vm3180_vm1, %v3836_v35  ;;  %v3743_v52 = vrot.slane %v3742_v63, 4  ;;  %v4755_v43 = vsel %vm1999_vm8, %v4754_v1, %v4746_v6  ;;  %v3842_v35 = vpack.c.bf16 %v8087_v0, %v8082_v40  ;;  %v3844_v42 = vpack.c.bf16 %v8139_v14, %v8134_v38 }
 0x54e   : > { %5579 = vmatprep.mubr.msk.bf16.mxu1 %vm3180_vm1, %v3837_v39  ;;  %v4734_v27 = vpack.c.bf16 %v3811_v58, %v3811_v58  ;;  %v4757_v8 = vsel %vm2001_vm9, %v4756_v61, %v4755_v43  ;;  %v3845_v29 = vpack.c.bf16 %v8153_v16, %v8147_v7  ;;  %v3846_v13 = vpack.c.bf16 %v8165_v32, %v8159_v46 }
 0x54f   : > { %v3744_v45 = vadd.f32 %v3743_v52, %v3742_v63  ;;  %v4759_v60 = vsel %vm2003_vm10, %v4758_v55, %v4757_v8  ;;  %v3796_v2 = vrot.slane %v8171_v56, 5  ;;  %v4736_v24 = vpack.c.bf16 %v3813_v15, %v3813_v15  ;;  %v8324_v33 = vpop.permute.xlu1 %4387 }
 0x550   : > { %v4750_v5 = vunpack.c.l.b16 %v4734_v27  ;;  %v4737_v14 = vpack.c.bf16 %v3814_v57, %v3814_v57  ;;  %v8330_v57 = vpop.permute.xlu0 %4371 }
 0x551   : > { %v3745_v25 = vrot.slane %v3744_v45, 2  ;;  %v4752_v7 = vunpack.c.l.b16 %v4736_v24 }
 0x552   : > { %v4760_v48 = vrot.slane %v4750_v5, 4  ;;  %v4753_v37 = vunpack.c.l.b16 %v4737_v14 }
 0x553   : > { %v3746_v39 = vadd.f32 %v3745_v25, %v3744_v45  ;;  %v4764_v32 = vrot.slane %v4752_v7, 2  ;;  %v8328_v15 = vpop.permute.xlu1 %4365 }
 0x554   : > { %v4761_v40 = vsel %vm2005_vm11, %v4760_v48, %v4759_v60  ;;  %v4766_v10 = vrot.slane %v4753_v37, 1  ;;  %v8334_v28 = vpop.permute.xlu0 %4379 }
 0x555   : > { %5580 = vmatmul.mubr.msk.bf16.gmra.mrb[92].mxu1 %vm3180_vm1, %v3838_v31  ;;  %v3747_v0 = vrot.slane %v3746_v39, 1 }
 0x556   : > { %5583 = vmatprep.mubr.msk.bf16.mxu1 %vm3180_vm1, %v3839_v17 }
 0x557   : > { %v3748_v38 = vadd.f32 %v3747_v0, %v3746_v39  ;;  %v8332_v20 = vpop.permute.xlu1 %4403 }
 0x558   : > { %v8338_v59 = vpop.permute.xlu0 %4401 }
 0x559   : > { %v3812_v53 = vadd.f32 %v3796_v2, %v3748_v38 }
 0x55b   : > { %v4735_v16 = vpack.c.bf16 %v3812_v53, %v3812_v53  ;;  %v8336_v4 = vpop.permute.xlu1 %4367 }
 0x55c   : > { %v8340_v23 = vpop.permute.xlu0 %4395 }
 0x55d   : > { %5584 = vmatmul.mubr.msk.bf16.gmra.mrb[96].mxu1 %vm3180_vm1, %v3840_v30  ;;  %v4751_v46 = vunpack.c.l.b16 %v4735_v16 }
 0x55e   : > { %5587 = vmatprep.mubr.msk.bf16.mxu1 %vm3180_vm1, %v3841_v62 }
 0x55f   : > { %v4762_v9 = vrot.slane %v4751_v46, 3  ;;  %v4348_v18 = vpop.permute.xlu1 %4347 }
 0x560   : > { %v8342_v3 = vpop.permute.xlu0 %4373 }
 0x561   : > { %v4763_v34 = vsel %vm2007_vm12, %v4762_v9, %v4761_v40 }
 0x562   : > { %v4765_v56 = vsel %vm2009_vm13, %v4764_v32, %v4763_v34 }
 0x563   : > { %v4767_v51 = vsel %vm2011_vm14, %v4766_v10, %v4765_v56  ;;  %v4350_v54 = vpop.permute.xlu1 %4349 }
 0x564   : > { %v4768_v11 = vpack.c.b16 %v4767_v51, %v4767_v51  ;;  %v8344_v21 = vpop.permute.xlu0 %4381 }
 0x565   : > { %5588 = vmatmul.mubr.msk.bf16.gmra.mrb[100].mxu1 %vm3180_vm1, %v3842_v35 }
 0x566   : > { %5591 = vmatprep.mubr.msk.bf16.mxu1 %vm3180_vm1, %v3843_v19  ;;  %5608 = vmatmul.mubr.msk.bf16.vlgmr.msra.gmra.mrb[92].mxu0 %vm3180_vm1, %v4768_v11 }
 0x567   : > { %5619 = vmatprep.mubr.msk.bf16.mxu0 %vm6178_vm15, %v8690_v12  ;;  %v4356_v49 = vpop.permute.xlu1 %4355 }
 0x568   : > { %v8346_v50 = vpop.permute.xlu0 %4389 }
 0x56b   : > { %v4354_v41 = vpop.permute.xlu1 %4353 }
 0x56c   : > { %v8350_v22 = vpop.permute.xlu0 %4397 }
 0x56d   : > { %5592 = vmatmul.mubr.msk.bf16.gmra.mrb[104].mxu1 %vm3180_vm1, %v3844_v42 }
 0x56e   : > { %5595 = vmatprep.mubr.msk.bf16.mxu1 %vm3180_vm1, %v3845_v29 }
 0x56f   : > { %v8348_v6 = vpop.permute.xlu1 %4359 }
 0x570   : > { %v4346_v52 = vpop.permute.xlu0 %4345 }
 0x573   : > { %v8352_v63 = vpop.permute.xlu1 %4363 }
 0x575   : > { %5596 = vmatmul.mubr.msk.bf16.gmra.mrb[108].mxu1 %vm3180_vm1, %v3846_v13 }
 0x577   : > { %v8354_v30 = vpop.permute.xlu1 %4361 }
 0x57b   : > { %v4352_v0 = vpop.permute.xlu1 %4351 }
 0x5bd   : > { %v5537_v31 = vpop.f32.mrb[48].mxu1 }
 0x5be   : > { %v3982_v58 = vpop.f32.mrb[49].mxu1 }
 0x5bf   : > { %v5538_v1 = vpop.f32.mrb[50].mxu1 }
 0x5c0   : > { %v4238_v61 = vpack.c.bf16 %v5538_v1, %v5537_v31  ;;  %v3985_v55 = vpop.f32.mrb[51].mxu1 }
 0x5c1   : > { %v4237_v17 = vpack.c.bf16 %v3985_v55, %v3982_v58 }
 0x5c2   : > { %v4442_v27 = vmul.bf16 %v4348_v18, %v4238_v61 }
 0x5c3   : > { %v4441_v43 = vmul.bf16 %v4346_v52, %v4237_v17 }
 0x5c4   : > { %v4475_v8 = vunpack.c.l.bf16 %v4442_v27  ;;  %v4476_v5 = vunpack.c.h.bf16 %v4442_v27 }
 0x5c5   : > { %v4473_v62 = vunpack.c.l.bf16 %v4441_v43  ;;  %v4474_v35 = vunpack.c.h.bf16 %v4441_v43  ;;  %v5541_v19 = vpop.f32.mrb[52].mxu1 }
 0x5c6   : > { %v3998_v45 = vpop.f32.mrb[53].mxu1  ;;  %v4540_v39 = vsel %vm580_vm0, %v4475_v8, 0.0  ;;  %v4542_v24 = vsel %vm580_vm0, %v4476_v5, 0.0 }
 0x5c7   : > { %v4537_v60 = vsel %vm580_vm0, %v4473_v62, 0.0  ;;  %v4538_v42 = vsel %vm580_vm0, %v4474_v35, 0.0  ;;  %v5542_v29 = vpop.f32.mrb[54].mxu1 }
 0x5c8   : > { %v4539_v13 = vadd.f32 %v4538_v42, %v4537_v60  ;;  %v4240_v25 = vpack.c.bf16 %v5542_v29, %v5541_v19  ;;  %v4001_v48 = vpop.f32.mrb[55].mxu1 }
 0x5c9   : > { %v4239_v40 = vpack.c.bf16 %v4001_v48, %v3998_v45 }
 0x5ca   : > { %v4541_v2 = vadd.f32 %v4540_v39, %v4539_v13  ;;  %v4444_v38 = vmul.bf16 %v4352_v0, %v4240_v25 }
 0x5cb   : > { %v4443_v14 = vmul.bf16 %v4350_v54, %v4239_v40 }
 0x5cc   : > { %v4543_v53 = vadd.f32 %v4542_v24, %v4541_v2  ;;  %v4479_v46 = vunpack.c.l.bf16 %v4444_v38  ;;  %v4480_v56 = vunpack.c.h.bf16 %v4444_v38  ;;  %v5776_v2 = vld [vmem:[#allocation8] sm:$0xff]   ;;  %v4358_v24 = vpop.permute.xlu0 %4357 }
 0x5cd   : > { %v4477_v7 = vunpack.c.l.bf16 %v4443_v14  ;;  %v4478_v16 = vunpack.c.h.bf16 %v4443_v14  ;;  %v5545_v37 = vpop.f32.mrb[56].mxu1  ;;  %5612 = vmatpush3.bf16.msra.mxu0 %v5776_v2 }
 0x5ce   : > { %v4014_v9 = vpop.f32.mrb[57].mxu1  ;;  %v4548_v1 = vsel %vm580_vm0, %v4479_v46, 0.0  ;;  %v4550_v17 = vsel %vm580_vm0, %v4480_v56, 0.0  ;;  %5613 = vmatprep.subr.bf16.mxu0 %v8690_v12 }
 0x5cf   : > { %v4544_v32 = vsel %vm580_vm0, %v4477_v7, 0.0  ;;  %v5546_v34 = vpop.f32.mrb[58].mxu1  ;;  %v4546_v51 = vsel %vm580_vm0, %v4478_v16, 0.0  ;;  %v5777_v7 = vld [vmem:[#allocation8 + $0x8] sm:$0xff]   ;;  %v8705_v16 = vld [vmem:[#allocation21_spill] sm:$0xff] }
 0x5d0   : > { %v4545_v10 = vadd.f32 %v4544_v32, %v4543_v53  ;;  %v4242_v11 = vpack.c.bf16 %v5546_v34, %v5545_v37  ;;  %v4017_v18 = vpop.f32.mrb[59].mxu1  ;;  %v1379_v37 = vsub.s32 1, %v8705_v16 }
 0x5d1   : > { %v4241_v58 = vpack.c.bf16 %v4017_v18, %v4014_v9  ;;  %5614 = vmatpush3.bf16.msra.mxu0 %v5777_v7  ;;  %v5778_v18 = vld [vmem:[#allocation8 + $0x10] sm:$0xff]  }
 0x5d2   : > { %v4547_v31 = vadd.f32 %v4546_v51, %v4545_v10  ;;  %v4446_v54 = vmul.bf16 %v4356_v49, %v4242_v11  ;;  %5615 = vmatprep.subr.bf16.mxu0 %v8690_v12 }
 0x5d3   : > { %v4445_v55 = vmul.bf16 %v4354_v41, %v4241_v58 }
 0x5d4   : > { %v4549_v61 = vadd.f32 %v4548_v1, %v4547_v31  ;;  %v4483_v27 = vunpack.c.l.bf16 %v4446_v54  ;;  %v4484_v62 = vunpack.c.h.bf16 %v4446_v54 }
 0x5d5   : > { %v4481_v43 = vunpack.c.l.bf16 %v4445_v55  ;;  %v4482_v8 = vunpack.c.h.bf16 %v4445_v55  ;;  %5616 = vmatpush3.bf16.msra.mxu0 %v5778_v18 }
 0x5d6   : > { %v4551_v52 = vadd.f32 %v4550_v17, %v4549_v61  ;;  %v4561_v5 = vsel %vm580_vm0, %v4483_v27, 0.0  ;;  %v4563_v42 = vsel %vm580_vm0, %v4484_v62, 0.0  ;;  %5617 = vmatprep.subr.bf16.mxu0 %v8690_v12 }
 0x5d7   : > { %v4558_v35 = vsel %vm580_vm0, %v4481_v43, 0.0  ;;  %v4559_v19 = vsel %vm580_vm0, %v4482_v8, 0.0 }
 0x5d8   : > { %v4560_v45 = vadd.f32 %v4559_v19, %v4558_v35  ;;  %v4552_v29 = vrot.slane %v4551_v52, 4  ;;  %v5779_v35 = vld [vmem:[#allocation8 + $0x18] sm:$0xff]   ;;  %v8706_v19 = vld [vmem:[#allocation25_spill] sm:$0xff] }
 0x5d9   : > { %5618 = vmatpush3.bf16.msra.mxu0 %v5779_v35 }
 0x5da   : > { %v4562_v60 = vadd.f32 %v4561_v5, %v4560_v45  ;;  %v4553_v13 = vadd.f32 %v4552_v29, %v4551_v52 }
 0x5dc   : > { %v4564_v49 = vadd.f32 %v4563_v42, %v4562_v60  ;;  %v4554_v38 = vrot.slane %v4553_v13, 2 }
 0x5de   : > { %v4555_v10 = vadd.f32 %v4554_v38, %v4553_v13 }
 0x5e0   : > { %v4556_v52 = vrot.slane %v4555_v10, 1 }
 0x5e3   : > { %v5549_v41 = vpop.f32.mrb[60].mxu1 }
 0x5e4   : > { %v4030_v25 = vpop.f32.mrb[61].mxu1 }
 0x5e5   : > { %v5550_v48 = vpop.f32.mrb[62].mxu1 }
 0x5e6   : > { %v4244_v39 = vpack.c.bf16 %v5550_v48, %v5549_v41  ;;  %v4033_v40 = vpop.f32.mrb[63].mxu1  ;;  %v4557_v41 = vadd.f32 %v4556_v52, %v4555_v10 }
 0x5e7   : > { %v4243_v0 = vpack.c.bf16 %v4033_v40, %v4030_v25 }
 0x5e8   : > { %v4448_v14 = vmul.bf16 %v8348_v6, %v4244_v39  ;;  %v5976_v6 = vld [vmem:[%s8549_s4] sm:$0x3] }
 0x5e9   : > { %v4447_v53 = vmul.bf16 %v4358_v24, %v4243_v0  ;;  %v1380_v31 = vrot.slane %v5976_v6, %v1379_v37 }
 0x5ea   : > { %v4487_v56 = vunpack.c.l.bf16 %v4448_v14  ;;  %v4488_v61 = vunpack.c.h.bf16 %v4448_v14 }
 0x5eb   : > { %v4485_v46 = vunpack.c.l.bf16 %v4447_v53  ;;  %v4486_v32 = vunpack.c.h.bf16 %v4447_v53  ;;  %v5553_v9 = vpop.f32.mrb[64].mxu1  ;;  %v2094_v45 = vadd.f32 %v8706_v19, %v1380_v31 }
 0x5ec   : > { %v4046_v34 = vpop.f32.mrb[65].mxu1  ;;  %v4569_v8 = vsel %vm580_vm0, %v4487_v56, 0.0  ;;  %v4571_v60 = vsel %vm580_vm0, %v4488_v61, 0.0 }
 0x5ed   : > { %v4565_v51 = vsel %vm580_vm0, %v4485_v46, 0.0  ;;  %v5554_v11 = vpop.f32.mrb[66].mxu1  ;;  %v4567_v55 = vsel %vm580_vm0, %v4486_v32, 0.0 }
 0x5ee   : > { %v4566_v58 = vadd.f32 %v4565_v51, %v4564_v49  ;;  %v4246_v1 = vpack.c.bf16 %v5554_v11, %v5553_v9  ;;  %v4049_v54 = vpop.f32.mrb[67].mxu1 }
 0x5ef   : > { %v4245_v17 = vpack.c.bf16 %v4049_v54, %v4046_v34 }
 0x5f0   : > { %v4568_v27 = vadd.f32 %v4567_v55, %v4566_v58  ;;  %v4450_v43 = vmul.bf16 %v8352_v63, %v4246_v1 }
 0x5f1   : > { %v4449_v62 = vmul.bf16 %v8354_v30, %v4245_v17 }
 0x5f2   : > { %v4570_v5 = vadd.f32 %v4569_v8, %v4568_v27  ;;  %v4491_v42 = vunpack.c.l.bf16 %v4450_v43  ;;  %v4492_v63 = vunpack.c.h.bf16 %v4450_v43 }
 0x5f3   : > { %v4489_v49 = vunpack.c.l.bf16 %v4449_v62  ;;  %v4490_v29 = vunpack.c.h.bf16 %v4449_v62 }
 0x5f4   : > { %v4572_v13 = vadd.f32 %v4571_v60, %v4570_v5  ;;  %v4307_v25 = vpop.f32.mrb[88].mxu0  ;;  %v4582_v24 = vsel %vm580_vm0, %v4491_v42, 0.0  ;;  %v4584_v37 = vsel %vm580_vm0, %v4492_v63, 0.0 }
 0x5f5   : > { %v4579_v48 = vsel %vm580_vm0, %v4489_v49, 0.0  ;;  %v4580_v30 = vsel %vm580_vm0, %v4490_v29, 0.0  ;;  %v8385_v39 = vmul.f32 %v4307_v25, %v2094_v45  ;;  %v5603_v40 = vpop.f32.mrb[89].mxu0 }
 0x5f6   : > { %v4573_v0 = vrot.slane %v4572_v13, 4  ;;  %v4581_v2 = vadd.f32 %v4580_v30, %v4579_v48  ;;  %v4310_v12 = vpop.f32.mrb[90].mxu0 }
 0x5f7   : > { %v8389_v38 = vadd.f32 %v8385_v39, %v4557_v41  ;;  %v5604_v14 = vpop.f32.mrb[91].mxu0  ;;  %v4707_v61 = vrot.slane %v8385_v39, 1 }
 0x5f8   : > { %v4574_v53 = vadd.f32 %v4573_v0, %v4572_v13  ;;  %v4583_v7 = vadd.f32 %v4582_v24, %v4581_v2  ;;  %v5557_v16 = vpop.f32.mrb[68].mxu1 }
 0x5f9   : > { %v4062_v46 = vpop.f32.mrb[69].mxu1 }
 0x5fa   : > { %v4575_v32 = vrot.slane %v4574_v53, 2  ;;  %v5558_v9 = vpop.f32.mrb[70].mxu1  ;;  %v4585_v10 = vadd.f32 %v4584_v37, %v4583_v7  ;;  %v4376_v37 = vpop.permute.xlu0 %4375 }
 0x5fb   : > { %v4248_v34 = vpack.c.bf16 %v5558_v9, %v5557_v16  ;;  %v4065_v56 = vpop.f32.mrb[71].mxu1 }
 0x5fc   : > { %v4576_v51 = vadd.f32 %v4575_v32, %v4574_v53  ;;  %v4247_v11 = vpack.c.bf16 %v4065_v56, %v4062_v46 }
 0x5fd   : > { %v4452_v6 = vmul.bf16 %v8336_v4, %v4248_v34 }
 0x5fe   : > { %v4577_v18 = vrot.slane %v4576_v51, 1  ;;  %v4451_v31 = vmul.bf16 %v8328_v15, %v4247_v11 }
 0x5ff   : > { %v4495_v52 = vunpack.c.l.bf16 %v4452_v6  ;;  %v4496_v45 = vunpack.c.h.bf16 %v4452_v6 }
 0x600   : > { %v4578_v58 = vadd.f32 %v4577_v18, %v4576_v51  ;;  %v4493_v1 = vunpack.c.l.bf16 %v4451_v31  ;;  %v4494_v54 = vunpack.c.h.bf16 %v4451_v31  ;;  %v5561_v55 = vpop.f32.mrb[72].mxu1 }
 0x601   : > { %v4078_v17 = vpop.f32.mrb[73].mxu1  ;;  %v4590_v42 = vsel %vm580_vm0, %v4495_v52, 0.0  ;;  %v4592_v41 = vsel %vm580_vm0, %v4496_v45, 0.0 }
 0x602   : > { %v4586_v27 = vsel %vm580_vm0, %v4493_v1, 0.0  ;;  %v5562_v43 = vpop.f32.mrb[74].mxu1  ;;  %v8396_v8 = vadd.f32 %v4707_v61, %v4578_v58  ;;  %v4588_v4 = vsel %vm580_vm0, %v4494_v54, 0.0 }
 0x603   : > { %v4587_v62 = vadd.f32 %v4586_v27, %v4585_v10  ;;  %v4250_v35 = vpack.c.bf16 %v5562_v43, %v5561_v55  ;;  %v4081_v19 = vpop.f32.mrb[75].mxu1 }
 0x604   : > { %v4249_v15 = vpack.c.bf16 %v4081_v19, %v4078_v17  ;;  %v4708_v19 = vrot.slane %v8385_v39, 2 }
 0x605   : > { %v4589_v5 = vadd.f32 %v4588_v4, %v4587_v62  ;;  %v4454_v60 = vmul.bf16 %v8330_v57, %v4250_v35 }
 0x606   : > { %v4453_v49 = vmul.bf16 %v8322_v36, %v4249_v15 }
 0x607   : > { %v4591_v29 = vadd.f32 %v4590_v42, %v4589_v5  ;;  %v4499_v13 = vunpack.c.l.bf16 %v4454_v60  ;;  %v4500_v0 = vunpack.c.h.bf16 %v4454_v60 }
 0x608   : > { %v4497_v25 = vunpack.c.l.bf16 %v4453_v49  ;;  %v4498_v63 = vunpack.c.h.bf16 %v4453_v49  ;;  %v5565_v48 = vpop.f32.mrb[76].mxu1 }
 0x609   : > { %v4593_v30 = vadd.f32 %v4592_v41, %v4591_v29  ;;  %v4094_v40 = vpop.f32.mrb[77].mxu1  ;;  %v4603_v36 = vsel %vm580_vm0, %v4499_v13, 0.0  ;;  %v4605_v9 = vsel %vm580_vm0, %v4500_v0, 0.0 }
 0x60a   : > { %v4600_v2 = vsel %vm580_vm0, %v4497_v25, 0.0  ;;  %v4601_v12 = vsel %vm580_vm0, %v4498_v63, 0.0  ;;  %v5566_v24 = vpop.f32.mrb[78].mxu1 }
 0x60b   : > { %v4594_v57 = vrot.slane %v4593_v30, 4  ;;  %v4602_v14 = vadd.f32 %v4601_v12, %v4600_v2  ;;  %v4252_v53 = vpack.c.bf16 %v5566_v24, %v5565_v48  ;;  %v4097_v7 = vpop.f32.mrb[79].mxu1 }
 0x60c   : > { %v4251_v16 = vpack.c.bf16 %v4097_v7, %v4094_v40 }
 0x60d   : > { %v4595_v46 = vadd.f32 %v4594_v57, %v4593_v30  ;;  %v4604_v32 = vadd.f32 %v4603_v36, %v4602_v14  ;;  %v4456_v10 = vmul.bf16 %v4376_v37, %v4252_v53  ;;  %v4384_v53 = vpop.permute.xlu0 %4383 }
 0x60e   : > { %v4455_v34 = vmul.bf16 %v8342_v3, %v4251_v16 }
 0x60f   : > { %v4596_v56 = vrot.slane %v4595_v46, 2  ;;  %v4606_v51 = vadd.f32 %v4605_v9, %v4604_v32  ;;  %v4503_v1 = vunpack.c.l.bf16 %v4456_v10  ;;  %v4504_v43 = vunpack.c.h.bf16 %v4456_v10 }
 0x610   : > { %v4501_v11 = vunpack.c.l.bf16 %v4455_v34  ;;  %v4502_v18 = vunpack.c.h.bf16 %v4455_v34  ;;  %v5569_v6 = vpop.f32.mrb[80].mxu1 }
 0x611   : > { %v4597_v31 = vadd.f32 %v4596_v56, %v4595_v46  ;;  %v4110_v58 = vpop.f32.mrb[81].mxu1  ;;  %v4611_v15 = vsel %vm580_vm0, %v4503_v1, 0.0  ;;  %v4613_v49 = vsel %vm580_vm0, %v4504_v43, 0.0 }
 0x612   : > { %v4607_v54 = vsel %vm580_vm0, %v4501_v11, 0.0  ;;  %v5570_v61 = vpop.f32.mrb[82].mxu1  ;;  %v4609_v62 = vsel %vm580_vm0, %v4502_v18, 0.0 }
 0x613   : > { %v4598_v55 = vrot.slane %v4597_v31, 1  ;;  %v4608_v17 = vadd.f32 %v4607_v54, %v4606_v51  ;;  %v4254_v52 = vpack.c.bf16 %v5570_v61, %v5569_v6  ;;  %v4113_v27 = vpop.f32.mrb[83].mxu1 }
 0x614   : > { %v4253_v35 = vpack.c.bf16 %v4113_v27, %v4110_v58  ;;  %v4709_v27 = vrot.slane %v8385_v39, 3 }
 0x615   : > { %v4599_v3 = vadd.f32 %v4598_v55, %v4597_v31  ;;  %v4610_v45 = vadd.f32 %v4609_v62, %v4608_v17  ;;  %v4458_v4 = vmul.bf16 %v8334_v28, %v4254_v52 }
 0x616   : > { %v4457_v5 = vmul.bf16 %v8326_v26, %v4253_v35 }
 0x617   : > { %v4612_v60 = vadd.f32 %v4611_v15, %v4610_v45  ;;  %v8414_v42 = vadd.f32 %v4708_v19, %v4599_v3  ;;  %v4507_v29 = vunpack.c.l.bf16 %v4458_v4  ;;  %v4508_v30 = vunpack.c.h.bf16 %v4458_v4  ;;  %v8428_v19 = vpop.permute.xlu1 %4405 }
 0x618   : > { %v4505_v41 = vunpack.c.l.bf16 %v4457_v5  ;;  %v4506_v13 = vunpack.c.h.bf16 %v4457_v5  ;;  %v5573_v25 = vpop.f32.mrb[84].mxu1 }
 0x619   : > { %v4614_v63 = vadd.f32 %v4613_v49, %v4612_v60  ;;  %v4126_v48 = vpop.f32.mrb[85].mxu1  ;;  %v4624_v57 = vsel %vm580_vm0, %v4507_v29, 0.0  ;;  %v4626_v16 = vsel %vm580_vm0, %v4508_v30, 0.0 }
 0x61a   : > { %v4621_v40 = vsel %vm580_vm0, %v4505_v41, 0.0  ;;  %v4622_v28 = vsel %vm580_vm0, %v4506_v13, 0.0  ;;  %v5574_v0 = vpop.f32.mrb[86].mxu1 }
 0x61b   : > { %v4615_v2 = vrot.slane %v4614_v63, 4  ;;  %v4623_v12 = vadd.f32 %v4622_v28, %v4621_v40  ;;  %v4256_v26 = vpack.c.bf16 %v5574_v0, %v5573_v25  ;;  %v4129_v24 = vpop.f32.mrb[87].mxu1 }
 0x61c   : > { %v4255_v14 = vpack.c.bf16 %v4129_v24, %v4126_v48 }
 0x61d   : > { %v4616_v7 = vadd.f32 %v4615_v2, %v4614_v63  ;;  %v4625_v36 = vadd.f32 %v4624_v57, %v4623_v12  ;;  %v4460_v37 = vmul.bf16 %v4384_v53, %v4256_v26  ;;  %v4392_v12 = vpop.permute.xlu1 %4391 }
 0x61e   : > { %v4459_v46 = vmul.bf16 %v8344_v21, %v4255_v14 }
 0x61f   : > { %v4617_v32 = vrot.slane %v4616_v7, 2  ;;  %v4627_v9 = vadd.f32 %v4626_v16, %v4625_v36  ;;  %v4511_v18 = vunpack.c.l.bf16 %v4460_v37  ;;  %v4512_v55 = vunpack.c.h.bf16 %v4460_v37 }
 0x620   : > { %v4509_v10 = vunpack.c.l.bf16 %v4459_v46  ;;  %v4510_v34 = vunpack.c.h.bf16 %v4459_v46  ;;  %v5577_v56 = vpop.f32.mrb[88].mxu1 }
 0x621   : > { %v4618_v51 = vadd.f32 %v4617_v32, %v4616_v7  ;;  %v4142_v11 = vpop.f32.mrb[89].mxu1  ;;  %v4632_v35 = vsel %vm580_vm0, %v4511_v18, 0.0  ;;  %v4634_v15 = vsel %vm580_vm0, %v4512_v55, 0.0 }
 0x622   : > { %v4628_v6 = vsel %vm580_vm0, %v4509_v10, 0.0  ;;  %v5578_v31 = vpop.f32.mrb[90].mxu1  ;;  %v4630_v17 = vsel %vm580_vm0, %v4510_v34, 0.0 }
 0x623   : > { %v4619_v58 = vrot.slane %v4618_v51, 1  ;;  %v4629_v1 = vadd.f32 %v4628_v6, %v4627_v9  ;;  %v4258_v54 = vpack.c.bf16 %v5578_v31, %v5577_v56  ;;  %v4145_v61 = vpop.f32.mrb[91].mxu1 }
 0x624   : > { %v4257_v52 = vpack.c.bf16 %v4145_v61, %v4142_v11 }
 0x625   : > { %v4620_v21 = vadd.f32 %v4619_v58, %v4618_v51  ;;  %v4631_v43 = vadd.f32 %v4630_v17, %v4629_v1  ;;  %v4462_v62 = vmul.bf16 %v8324_v33, %v4258_v54  ;;  %v4710_v54 = vrot.slane %v8385_v39, 4 }
 0x626   : > { %v4461_v3 = vmul.bf16 %v8318_v44, %v4257_v52 }
 0x627   : > { %v8430_v45 = vadd.f32 %v4709_v27, %v4620_v21  ;;  %v4633_v4 = vadd.f32 %v4632_v35, %v4631_v43  ;;  %v4515_v5 = vunpack.c.l.bf16 %v4462_v62  ;;  %v4516_v25 = vunpack.c.h.bf16 %v4462_v62 }
 0x628   : > { %v4513_v60 = vunpack.c.l.bf16 %v4461_v3  ;;  %v4514_v49 = vunpack.c.h.bf16 %v4461_v3  ;;  %v5581_v29 = vpop.f32.mrb[92].mxu1 }
 0x629   : > { %v4635_v41 = vadd.f32 %v4634_v15, %v4633_v4  ;;  %v4158_v13 = vpop.f32.mrb[93].mxu1  ;;  %v4645_v0 = vsel %vm580_vm0, %v4515_v5, 0.0  ;;  %v4647_v57 = vsel %vm580_vm0, %v4516_v25, 0.0 }
 0x62a   : > { %v4642_v33 = vsel %vm580_vm0, %v4513_v60, 0.0  ;;  %v4643_v63 = vsel %vm580_vm0, %v4514_v49, 0.0  ;;  %v5582_v48 = vpop.f32.mrb[94].mxu1 }
 0x62b   : > { %v4636_v44 = vrot.slane %v4635_v41, 4  ;;  %v4644_v30 = vadd.f32 %v4643_v63, %v4642_v33  ;;  %v4260_v40 = vpack.c.bf16 %v5582_v48, %v5581_v29  ;;  %v4161_v28 = vpop.f32.mrb[95].mxu1 }
 0x62c   : > { %v4259_v2 = vpack.c.bf16 %v4161_v28, %v4158_v13 }
 0x62d   : > { %v4637_v26 = vadd.f32 %v4636_v44, %v4635_v41  ;;  %v4646_v24 = vadd.f32 %v4645_v0, %v4644_v30  ;;  %v4464_v14 = vmul.bf16 %v4392_v12, %v4260_v40  ;;  %v4400_v40 = vpop.permute.xlu0 %4399 }
 0x62e   : > { %v4463_v53 = vmul.bf16 %v8346_v50, %v4259_v2 }
 0x62f   : > { %v4638_v7 = vrot.slane %v4637_v26, 2  ;;  %v4648_v36 = vadd.f32 %v4647_v57, %v4646_v24  ;;  %v4519_v10 = vunpack.c.l.bf16 %v4464_v14  ;;  %v4520_v31 = vunpack.c.h.bf16 %v4464_v14 }
 0x630   : > { %v4517_v16 = vunpack.c.l.bf16 %v4463_v53  ;;  %v4518_v37 = vunpack.c.h.bf16 %v4463_v53  ;;  %v5585_v46 = vpop.f32.mrb[96].mxu1 }
 0x631   : > { %v4639_v32 = vadd.f32 %v4638_v7, %v4637_v26  ;;  %v4174_v9 = vpop.f32.mrb[97].mxu1  ;;  %v4653_v17 = vsel %vm580_vm0, %v4519_v10, 0.0  ;;  %v4655_v43 = vsel %vm580_vm0, %v4520_v31, 0.0 }
 0x632   : > { %v4649_v34 = vsel %vm580_vm0, %v4517_v16, 0.0  ;;  %v5586_v56 = vpop.f32.mrb[98].mxu1  ;;  %v4651_v58 = vsel %vm580_vm0, %v4518_v37, 0.0 }
 0x633   : > { %v4640_v51 = vrot.slane %v4639_v32, 1  ;;  %v4650_v11 = vadd.f32 %v4649_v34, %v4648_v36  ;;  %v4262_v18 = vpack.c.bf16 %v5586_v56, %v5585_v46  ;;  %v4177_v6 = vpop.f32.mrb[99].mxu1 }
 0x634   : > { %v4261_v1 = vpack.c.bf16 %v4177_v6, %v4174_v9 }
 0x635   : > { %v4641_v50 = vadd.f32 %v4640_v51, %v4639_v32  ;;  %v4652_v61 = vadd.f32 %v4651_v58, %v4650_v11  ;;  %v4466_v55 = vmul.bf16 %v8340_v23, %v4262_v18  ;;  %v4711_v58 = vrot.slane %v8385_v39, 5 }
 0x636   : > { %v4465_v52 = vmul.bf16 %v8320_v47, %v4261_v1 }
 0x637   : > { %v8444_v21 = vadd.f32 %v4710_v54, %v4641_v50  ;;  %v4654_v27 = vadd.f32 %v4653_v17, %v4652_v61  ;;  %v4523_v62 = vunpack.c.l.bf16 %v4466_v55  ;;  %v4524_v49 = vunpack.c.h.bf16 %v4466_v55 }
 0x638   : > { %v4521_v35 = vunpack.c.l.bf16 %v4465_v52  ;;  %v4522_v3 = vunpack.c.h.bf16 %v4465_v52  ;;  %v5589_v4 = vpop.f32.mrb[100].mxu1 }
 0x639   : > { %v4656_v15 = vadd.f32 %v4655_v43, %v4654_v27  ;;  %v4190_v5 = vpop.f32.mrb[101].mxu1  ;;  %v4806_v60 = vpop.f32.mrb[92].mxu0  ;;  %v4666_v44 = vsel %vm580_vm0, %v4523_v62, 0.0  ;;  %v4668_v12 = vsel %vm580_vm0, %v4524_v49, 0.0 }
 0x63a   : > { %v4663_v29 = vsel %vm580_vm0, %v4521_v35, 0.0  ;;  %v4664_v23 = vsel %vm580_vm0, %v4522_v3, 0.0  ;;  %v5590_v41 = vpop.f32.mrb[102].mxu1  ;;  %5942 = vrcp.f32 %v4806_v60  ;;  %v5609_v47 = vpop.f32.mrb[93].mxu0 }
 0x63b   : > { %v4657_v13 = vrot.slane %v4656_v15, 4  ;;  %v4665_v25 = vadd.f32 %v4664_v23, %v4663_v29  ;;  %v4264_v33 = vpack.c.bf16 %v5590_v41, %v5589_v4  ;;  %v4193_v63 = vpop.f32.mrb[103].mxu1  ;;  %v4809_v48 = vpop.f32.mrb[94].mxu0 }
 0x63c   : > { %v4263_v30 = vpack.c.bf16 %v4193_v63, %v4190_v5  ;;  %v5610_v28 = vpop.f32.mrb[95].mxu0 }
 0x63d   : > { %v4658_v0 = vadd.f32 %v4657_v13, %v4656_v15  ;;  %v4667_v2 = vadd.f32 %v4666_v44, %v4665_v25  ;;  %v4468_v26 = vmul.bf16 %v4400_v40, %v4264_v33  ;;  %v4408_v44 = vpop.permute.xlu1 %4407 }
 0x63e   : > { %v4467_v24 = vmul.bf16 %v8350_v22, %v4263_v30 }
 0x63f   : > { %v4659_v57 = vrot.slane %v4658_v0, 2  ;;  %v4669_v14 = vadd.f32 %v4668_v12, %v4667_v2  ;;  %v4527_v46 = vunpack.c.l.bf16 %v4468_v26  ;;  %v4528_v32 = vunpack.c.h.bf16 %v4468_v26 }
 0x640   : > { %v4525_v53 = vunpack.c.l.bf16 %v4467_v24  ;;  %v4526_v7 = vunpack.c.h.bf16 %v4467_v24  ;;  %v5593_v36 = vpop.f32.mrb[104].mxu1 }
 0x641   : > { %v4660_v16 = vadd.f32 %v4659_v57, %v4658_v0  ;;  %v4206_v37 = vpop.f32.mrb[105].mxu1  ;;  %v4674_v54 = vsel %vm580_vm0, %v4527_v46, 0.0  ;;  %v4676_v61 = vsel %vm580_vm0, %v4528_v32, 0.0 }
 0x642   : > { %v4670_v9 = vsel %vm580_vm0, %v4525_v53, 0.0  ;;  %v5594_v10 = vpop.f32.mrb[106].mxu1  ;;  %v4672_v18 = vsel %vm580_vm0, %v4526_v7, 0.0 }
 0x643   : > { %v4661_v34 = vrot.slane %v4660_v16, 1  ;;  %v4671_v56 = vadd.f32 %v4670_v9, %v4669_v14  ;;  %v4266_v51 = vpack.c.bf16 %v5594_v10, %v5593_v36  ;;  %v4209_v11 = vpop.f32.mrb[107].mxu1  ;;  %v4712_v10 = vrot.slane %v8385_v39, 6 }
 0x644   : > { %v4265_v6 = vpack.c.bf16 %v4209_v11, %v4206_v37  ;;  %v8454_v22 = vpop.eup %5942 }
 0x645   : > { %v4662_v31 = vadd.f32 %v4661_v34, %v4660_v16  ;;  %v4673_v1 = vadd.f32 %v4672_v18, %v4671_v56  ;;  %v4470_v50 = vmul.bf16 %v8332_v20, %v4266_v51  ;;  %v4818_v52 = vrot.slane %v8454_v22, 5 }
 0x646   : > { %v4469_v55 = vmul.bf16 %v8338_v59, %v4265_v6  ;;  %v4814_v4 = vrot.slane %v8454_v22, 1  ;;  %v4815_v15 = vrot.slane %v8454_v22, 2  ;;  %v4816_v49 = vrot.slane %v8454_v22, 3 }
 0x647   : > { %v4727_v17 = vadd.f32 %v4711_v58, %v4662_v31  ;;  %v4675_v27 = vadd.f32 %v4674_v54, %v4673_v1  ;;  %v4531_v43 = vunpack.c.l.bf16 %v4470_v50  ;;  %v4532_v29 = vunpack.c.h.bf16 %v4470_v50 }
 0x648   : > { %v4529_v62 = vunpack.c.l.bf16 %v4469_v55  ;;  %v4530_v35 = vunpack.c.h.bf16 %v4469_v55  ;;  %v5597_v3 = vpop.f32.mrb[108].mxu1  ;;  %v4817_v47 = vrot.slane %v8454_v22, 4  ;;  %v4829_v40 = vmul.f32 %v8454_v22, %v8389_v38 }
 0x649   : > { %v4834_v5 = vmul.f32 %v4818_v52, %v4727_v17  ;;  %v4677_v20 = vadd.f32 %v4676_v61, %v4675_v27  ;;  %v4222_v60 = vpop.f32.mrb[109].mxu1  ;;  %v4687_v25 = vsel %vm580_vm0, %v4531_v43, 0.0  ;;  %v4830_v28 = vmul.f32 %v4814_v4, %v8396_v8 }
 0x64a   : > { %v4684_v59 = vsel %vm580_vm0, %v4529_v62, 0.0  ;;  %v4685_v23 = vsel %vm580_vm0, %v4530_v35, 0.0  ;;  %v5598_v41 = vpop.f32.mrb[110].mxu1  ;;  %v4831_v0 = vmul.f32 %v4815_v15, %v8414_v42  ;;  %v4832_v24 = vmul.f32 %v4816_v49, %v8430_v45 }
 0x64b   : > { %v4678_v13 = vrot.slane %v4677_v20, 4  ;;  %v4686_v33 = vadd.f32 %v4685_v23, %v4684_v59  ;;  %v4268_v63 = vpack.c.bf16 %v5598_v41, %v5597_v3  ;;  %v4225_v48 = vpop.f32.mrb[111].mxu1  ;;  %v4689_v57 = vsel %vm580_vm0, %v4532_v29, 0.0 }
 0x64c   : > { %v4267_v30 = vpack.c.bf16 %v4225_v48, %v4222_v60  ;;  %v4833_v53 = vmul.f32 %v4817_v47, %v8444_v21  ;;  %v4838_v7 = vpack.c.bf16 %v4830_v28, %v4830_v28  ;;  %v4842_v36 = vpack.c.bf16 %v4834_v5, %v4834_v5 }
 0x64d   : > { %v4679_v2 = vadd.f32 %v4678_v13, %v4677_v20  ;;  %v4688_v12 = vadd.f32 %v4687_v25, %v4686_v33  ;;  %v4472_v26 = vmul.bf16 %v4408_v44, %v4268_v63  ;;  %v4837_v38 = vpack.c.bf16 %v4829_v40, %v4829_v40 }
 0x64e   : > { %v4471_v14 = vmul.bf16 %v8428_v19, %v4267_v30  ;;  %v4839_v32 = vpack.c.bf16 %v4831_v0, %v4831_v0  ;;  %v4840_v42 = vpack.c.bf16 %v4832_v24, %v4832_v24  ;;  %v4841_v45 = vpack.c.bf16 %v4833_v53, %v4833_v53 }
 0x64f   : > { %v4680_v16 = vrot.slane %v4679_v2, 2  ;;  %v4690_v37 = vadd.f32 %v4689_v57, %v4688_v12  ;;  %v4535_v34 = vunpack.c.l.bf16 %v4472_v26  ;;  %v4536_v56 = vunpack.c.h.bf16 %v4472_v26 }
 0x650   : > { %v4533_v46 = vunpack.c.l.bf16 %v4471_v14  ;;  %v4534_v8 = vunpack.c.h.bf16 %v4471_v14  ;;  %v4869_v21 = vunpack.c.l.b16 %v4838_v7  ;;  %v4870_v6 = vunpack.c.l.b16 %v4839_v32  ;;  %v5246_v7 = vld [vmem:[%s8707_s25] ss:$0 sm:$0xff] }
 0x651   : > { %v4681_v9 = vadd.f32 %v4680_v16, %v4679_v2  ;;  %v4871_v31 = vunpack.c.l.b16 %v4840_v42  ;;  %v4868_v58 = vunpack.c.l.b16 %v4837_v38  ;;  %v4872_v1 = vunpack.c.l.b16 %v4841_v45 }
 0x652   : > { %v4691_v51 = vsel %vm580_vm0, %v4533_v46, 0.0  ;;  %v4693_v19 = vsel %vm580_vm0, %v4534_v8, 0.0  ;;  %v4873_v50 = vunpack.c.l.b16 %v4842_v36  ;;  %v4876_v54 = vrot.slane %v4869_v21, 7 }
 0x653   : > { %v4682_v11 = vrot.slane %v4681_v9, 1  ;;  %v4692_v18 = vadd.f32 %v4691_v51, %v4690_v37  ;;  %v4695_v55 = vsel %vm580_vm0, %v4535_v34, 0.0  ;;  %v4878_v52 = vrot.slane %v4870_v6, 6 }
 0x654   : > { %v4877_v27 = vsel %vm1999_vm8, %v4876_v54, %v4868_v58  ;;  %v4880_v43 = vrot.slane %v4871_v31, 5  ;;  %v4882_v62 = vrot.slane %v4872_v1, 4  ;;  %v4884_v35 = vrot.slane %v4873_v50, 3 }
 0x655   : > { %v4683_v61 = vadd.f32 %v4682_v11, %v4681_v9  ;;  %v4694_v17 = vadd.f32 %v4693_v19, %v4692_v18  ;;  %v4819_v15 = vrot.slane %v8454_v22, 6  ;;  %v4879_v5 = vsel %vm2001_vm9, %v4878_v52, %v4877_v27 }
 0x656   : > { %v4697_v20 = vsel %vm580_vm0, %v4536_v56, 0.0  ;;  %v4881_v60 = vsel %vm2003_vm10, %v4880_v43, %v4879_v5  ;;  %v4713_v28 = vrot.slane %v8385_v39, 7  ;;  %v4820_v2 = vrot.slane %v8454_v22, 7 }
 0x657   : > { %v4728_v3 = vadd.f32 %v4712_v10, %v4683_v61  ;;  %v4696_v4 = vadd.f32 %v4695_v55, %v4694_v17  ;;  %v4883_v59 = vsel %vm2005_vm11, %v4882_v62, %v4881_v60 }
 0x658   : > { %v4885_v23 = vsel %vm2007_vm12, %v4884_v35, %v4883_v59 }
 0x659   : > { %v4698_v49 = vadd.f32 %v4697_v20, %v4696_v4  ;;  %v4835_v29 = vmul.f32 %v4819_v15, %v4728_v3 }
 0x65b   : > { %v4699_v41 = vrot.slane %v4698_v49, 4  ;;  %v4843_v47 = vpack.c.bf16 %v4835_v29, %v4835_v29 }
 0x65d   : > { %v4700_v13 = vadd.f32 %v4699_v41, %v4698_v49  ;;  %v4874_v25 = vunpack.c.l.b16 %v4843_v47 }
 0x65f   : > { %v4701_v33 = vrot.slane %v4700_v13, 2  ;;  %v4886_v63 = vrot.slane %v4874_v25, 2 }
 0x661   : > { %v4702_v48 = vadd.f32 %v4701_v33, %v4700_v13  ;;  %v4887_v44 = vsel %vm2009_vm13, %v4886_v63, %v4885_v23 }
 0x663   : > { %v4703_v30 = vrot.slane %v4702_v48, 1 }
 0x665   : > { %v4704_v40 = vadd.f32 %v4703_v30, %v4702_v48 }
 0x667   : > { %v4729_v0 = vadd.f32 %v4713_v28, %v4704_v40 }
 0x669   : > { %v4836_v12 = vmul.f32 %v4820_v2, %v4729_v0 }
 0x66b   : > { %v4844_v26 = vpack.c.bf16 %v4836_v12, %v4836_v12 }
 0x66d   : > { %v4875_v24 = vunpack.c.l.b16 %v4844_v26 }
 0x66f   : > { %v4888_v57 = vrot.slane %v4875_v24, 1 }
 0x671   : > { %v4889_v14 = vsel %vm2011_vm14, %v4888_v57, %v4887_v44 }
 0x672   : > { %v4890_v53 = vpack.c.b16 %v4889_v14, %v4889_v14 }
 0x674   : > { %5620 = vmatmul.mubr.msk.bf16.vlgmr.msra.gmra.mrb[96].mxu0 %vm580_vm0, %v4890_v53 }
 0x747   : > { %v4952_v39 = vpop.f32.mrb[96].mxu0 }
 0x748   : > { %v4953_v22 = vadd.f32 %v5246_v7, %v4952_v39  ;;  %v5621_v36 = vpop.f32.mrb[97].mxu0 }
 0x749   : > { %v4955_v16 = vpop.f32.mrb[98].mxu0 }
 0x74a   : > { %4958 = vst [vmem:[%s449_s8] sm:$0xff] %v4953_v22  ;;  %v5622_v37 = vpop.f32.mrb[99].mxu0 }
 0x74b   : > { %6104 = shalt.err (!%p6101_p4)
}
 0x74c   : > { %s6105_s22 = scalar_lea.hbm %s8501_s13, 128  ;;  %s6109_s23 = scalar_lea.hbm %s8708_s10, 256 }
 0x74d   : > { %p6106_p9 = scmp.ne.s32.totalorder %s8501_s13, %s6105_s22  ;;  %p6110_p8 = scmp.lt.u32.totalorder %s8501_s13, %s8708_s10 }
 0x74e   : > { %p6111_p13 = scmp.lt.u32.totalorder %s6109_s23, %s6105_s22  ;;  %p6113_p10 = scmp.lt.u32.totalorder %s6105_s22, %s8501_s13 }
 0x74f   : > { %p6107_p0 = pnand %p6106_p9, %p6389_p5 }
 0x750   : > { %p6112_p6 = por %p6111_p13, %p6110_p8 }
 0x751   : > { %p6108_p11 = pneg %p6107_p0 }
 0x752   : > { %p6114_p3 = por %p6113_p10, %p6112_p6 }
 0x754   : > { %p6115_p7 = pnand %p6114_p3, %p6108_p11 }
 0x756   : > { %6118 = shalt.err (!%p6115_p7)
}
 0x757   : > { %5646 = dma.vmem_to_hbm [thread:$0]  (%p6389_p5), %s8503_s14, 128, %s8501_s13, %s4960_s27  }
 0x758 PF: > { %s8709_s8 = sld [smem:[#allocation15_spill]]  ;;  %s8710_s30 = sld [smem:[#allocation16_spill]] }
 0x759   : > { %p8712_p2 = scmp.ge.s32.totalorder %s6165_s20, 2 }
 0x75e   : > { %s4985_s3 = sand.u32 1, %s8709_s8   ;;  %p8711_p12 = scmp.ne.s32.totalorder %s8710_s30, 0 }
 0x75f   : > { %s4986_s21 = scalar_lea.sflag [#allocation4], %s4985_s3 }
 0x760   : > { %p5663_p1 = pnand %p8712_p2, %p8711_p12 }
 0x762   : > { %6148 = dma.done.wait (!%p5663_p1), %s4986_s21, 128  }
 0x763   : > { %6150 = vsyncadd (!%p5663_p1), %s4986_s21, 4294967168  ;;  %s8713_s28 = smov %s6385_s17  ;;  %p26_p4 = scmp.ge.s32.totalorder %s6354_s15, 4  }
 0x764   : > { %s8714_s17 = smov %s6157_s18  ;;  %s8715_s18 = smov %s6161_s19 }
 0x765   : > { %s8716_s19 = smov %s8713_s28  ;;  %s8717_s20 = smov %s6354_s15 }
 0x766   :  { %28 = sbr.rel (!%p26_p4) target bundleno = 12 (0xc), region = 121 }
 0x76d   :  { %4991 = vsyncpa [#allocation3], 1 }
 0x76e   :  { %4993 = vsyncpa [#allocation3 + $0x1], 1 }
 0x76f   :  { %4994 = vsyncpa [#allocation6], 1 }
 0x770   :  { %4995 = vsyncpa [#allocation9], 1 }
 0x771   :  { %4996 = vsyncpa [#allocation4], 1 }
 0x772   :  { %4998 = vsyncpa [#allocation4 + $0x1], 1 }

</bundles_post_ra>
